<compile_context>
chip_gen: v5e
topology: v5e:2x2
jax: 0.10.0
libtpu: 0.0.40
codegen_flags: <defaults>
</compile_context>

<pallas_src>
import math
from functools import partial

import jax
import jax.numpy as jnp
from jax import lax
from jax.experimental import pallas as pl
from jax.experimental.pallas import tpu as pltpu

LN_EPS = 1e-6            # torchvision ViT uses LayerNorm(eps=1e-6)
_INV_SQRT2 = 0.7071067811865476


# ------------------------------ fused kernel ------------------------------- #

def _vit_fused_kernel(
    patches_ref,                       # (1, S, C*P*P)  this batch's patches (row 0 = zeros)
    wp_ref,                            # (C*P*P, D)     patch-embed weight
    base_ref,                          # (S, D)         row0: cls+pos[0]; rows1..: conv_b+pos[1..]
    ln1_g_ref, ln1_b_ref,              # (L, 1, D)
    qkv_w_ref, qkv_b_ref,              # (L, D, 3D), (L, 1, 3D)
    out_w_ref, out_b_ref,              # (L, D, D),  (L, 1, D)
    ln2_g_ref, ln2_b_ref,              # (L, 1, D)
    w1_ref, b1_ref,                    # (L, D, M),  (L, 1, M)
    w2_ref, b2_ref,                    # (L, M, D),  (L, 1, D)
    lnf_g_ref, lnf_b_ref,              # (1, D)
    head_w_ref, head_b_ref,            # (D, O), (1, O)
    o_ref,                             # (1, 1, O)
    *, D, Hh, Dh, L, eps):
    f32 = jnp.float32
    bf16 = jnp.bfloat16

    def mm(a, b):
        # bf16 MXU matmul with f32 accumulation
        return jnp.dot(a.astype(bf16), b.astype(bf16), preferred_element_type=f32)

    def mm_nt(a, b):
        # contract last dim of both operands: (M, K) x (N, K) -> (M, N)
        return lax.dot_general(a.astype(bf16), b.astype(bf16),
                               (((1,), (1,)), ((), ())),
                               preferred_element_type=f32)

    def layernorm(x, g, b):
        mean = jnp.mean(x, axis=-1, keepdims=True)
        xc = x - mean
        var = jnp.mean(xc * xc, axis=-1, keepdims=True)
        return xc * lax.rsqrt(var + eps) * g + b

    # ---- patch embedding + cls token + positional embedding (fused) ----
    # patches row 0 is all zeros, so row 0 of x is exactly cls + pos[0].
    x = mm(patches_ref[0], wp_ref[...]) + base_ref[...]          # (S, D) f32

    scale = 1.0 / math.sqrt(Dh)

    for l in range(L):                                           # static unroll (L small)
        # -------- multi-head self-attention block --------
        y = layernorm(x, ln1_g_ref[l], ln1_b_ref[l])             # (S, D) f32
        qkv = mm(y, qkv_w_ref[l]) + qkv_b_ref[l]                 # (S, 3D) f32
        wo = out_w_ref[l]                                        # (D, D)
        acc = jnp.zeros_like(x)                                  # attention + out-proj acc
        for h in range(Hh):                                      # static unroll over heads
            qh = qkv[:, h * Dh:(h + 1) * Dh] * scale             # (S, Dh)
            kh = qkv[:, D + h * Dh:D + (h + 1) * Dh]
            vh = qkv[:, 2 * D + h * Dh:2 * D + (h + 1) * Dh]
            s = mm_nt(qh, kh)                                    # (S, S) f32 scores
            s = s - jnp.max(s, axis=-1, keepdims=True)
            p = jnp.exp(s)
            p = p * pl.reciprocal(jnp.sum(p, axis=-1, keepdims=True), approx=True)
            oh = mm(p, vh)                                       # (S, Dh)
            # fold head h directly into the output projection
            acc = acc + mm(oh, wo[h * Dh:(h + 1) * Dh, :])       # (S, D)
        x = x + acc + out_b_ref[l]                               # residual fused

        # -------- MLP block --------
        y2 = layernorm(x, ln2_g_ref[l], ln2_b_ref[l])
        hmid = mm(y2, w1_ref[l]) + b1_ref[l]                     # (S, M) f32
        hmid = 0.5 * hmid * (1.0 + lax.erf(hmid * _INV_SQRT2))   # exact GELU
        x = x + mm(hmid, w2_ref[l]) + b2_ref[l]                  # residual fused

    # ---- final LayerNorm, class token, classification head ----
    xf = layernorm(x, lnf_g_ref[...], lnf_b_ref[...])
    logits = mm(xf[0:1, :], head_w_ref[...]) + head_b_ref[...]   # (1, O)
    o_ref[...] = logits[None].astype(o_ref.dtype)                # (1, 1, O)


# --------------------------------- wrapper ---------------------------------- #

def _resident(arr):
    """Full-array VMEM-resident BlockSpec (constant block index across grid)."""
    zeros = (0,) * arr.ndim
    return pl.BlockSpec(arr.shape, lambda b, _z=zeros: _z)


def vit_forward(params, x, cfg):
    B, C, H, W = x.shape
    P, D, Hh = cfg["patch"], cfg["hidden"], cfg["heads"]
    L, O = cfg["layers"], cfg["output_dim"]
    Dh = D // Hh
    nh, nw = H // P, W // P
    Np = nh * nw
    S = Np + 1
    CPP = C * P * P

    # im2col for the non-overlapping PxP patch conv (pure layout, XLA glue)
    patches = (x.reshape(B, C, nh, P, nw, P)
                 .transpose(0, 2, 4, 1, 3, 5)
                 .reshape(B, Np, CPP))
    # prepend a zero row per batch -> row 0 of the token slab becomes the cls token
    patches_ext = jnp.concatenate(
        [jnp.zeros((B, 1, CPP), x.dtype), patches], axis=1)          # (B, S, CPP)
    w_patch = params["conv_w"].reshape(D, CPP).T                     # (CPP, D)

    # base slab: row 0 = cls + pos[0]; rows 1.. = conv bias + pos[1..]
    base = jnp.concatenate(
        [params["cls_token"].reshape(1, D),
         jnp.broadcast_to(params["conv_b"].reshape(1, D), (Np, D))], axis=0)
    base = base + params["pos_emb"].reshape(S, D)                    # (S, D)

    inputs = [
        patches_ext,
        w_patch,
        base,
        params["ln1_g"], params["ln1_b"],
        params["qkv_w"], params["qkv_b"],
        params["out_w"], params["out_b"],
        params["ln2_g"], params["ln2_b"],
        params["mlp_w1"], params["mlp_b1"],
        params["mlp_w2"], params["mlp_b2"],
        params["ln_g"].reshape(1, D), params["ln_b"].reshape(1, D),
        params["head_w"], params["head_b"].reshape(1, O),
    ]

    in_specs = ([pl.BlockSpec((1, S, CPP), lambda b: (b, 0, 0))]
                + [_resident(a) for a in inputs[1:]])

    kernel = partial(_vit_fused_kernel, D=D, Hh=Hh, Dh=Dh, L=L, eps=LN_EPS)

    logits = pl.pallas_call(
        kernel,
        out_shape=jax.ShapeDtypeStruct((B, 1, O), jnp.float32),
        grid=(B,),
        in_specs=in_specs,
        out_specs=pl.BlockSpec((1, 1, O), lambda b: (b, 0, 0)),
        compiler_params=pltpu.CompilerParams(
            dimension_semantics=("parallel",)),   # shards batch across v7x's 2 TCs
    )(*inputs)
    return logits.reshape(B, O)


# --------------------------- parameter construction ------------------------- #

def init_params(key, cfg):
    C, P, D = cfg["in_ch"], cfg["patch"], cfg["hidden"]
    M, O, L = cfg["mlp"], cfg["output_dim"], cfg["layers"]
    S = (cfg["image"] // P) ** 2 + 1

    def nrm(k, shape, scale=0.02):
        return scale * jax.random.normal(k, shape, dtype=jnp.float32)

    keys = jax.random.split(key, 8)
    f32 = jnp.float32
    return {
        "conv_w": nrm(keys[0], (D, C, P, P)),
        "conv_b": jnp.zeros((D,), f32),
        "cls_token": nrm(keys[1], (1, 1, D)),
        "pos_emb": nrm(keys[2], (1, S, D)),
        # per-layer params stacked along a leading layer axis
        "ln1_g": jnp.ones((L, 1, D), f32), "ln1_b": jnp.zeros((L, 1, D), f32),
        "qkv_w": nrm(keys[3], (L, D, 3 * D)), "qkv_b": jnp.zeros((L, 1, 3 * D), f32),
        "out_w": nrm(keys[4], (L, D, D)), "out_b": jnp.zeros((L, 1, D), f32),
        "ln2_g": jnp.ones((L, 1, D), f32), "ln2_b": jnp.zeros((L, 1, D), f32),
        "mlp_w1": nrm(keys[5], (L, D, M)), "mlp_b1": jnp.zeros((L, 1, M), f32),
        "mlp_w2": nrm(keys[6], (L, M, D)), "mlp_b2": jnp.zeros((L, 1, D), f32),
        "ln_g": jnp.ones((D,), f32), "ln_b": jnp.zeros((D,), f32),
        "head_w": nrm(keys[7], (D, O)), "head_b": jnp.zeros((O,), f32),
    }


# ----------------------------------- main ------------------------------------ #

if __name__ == "__main__":
    # Small synthetic ViT config (vit_b_32 architecture, scaled down).
    # TODO(synk): at real vit_b_32 sizes (D=768, mlp=3072) the fused full-VMEM
    # kernel must be re-tiled (K-reduction accumulator, per-chip VMEM limits).
    cfg = dict(image=32, patch=8, in_ch=3, hidden=32, heads=4,
               layers=2, mlp=64, output_dim=10)

    key = jax.random.PRNGKey(0)
    k_params, k_x = jax.random.split(key)
    params = init_params(k_params, cfg)
    x = jax.random.normal(k_x, (2, cfg["in_ch"], cfg["image"], cfg["image"]),
                          dtype=jnp.float32)  # NCHW, like PyTorch

    fwd = jax.jit(partial(vit_forward, cfg=cfg))
    logits = jax.block_until_ready(fwd(params, x))

    assert logits.shape == (2, cfg["output_dim"])
    assert bool(jnp.all(jnp.isfinite(logits)))
    print("KERNEL_OK")
</pallas_src>

<mosaic_0001>
module attributes {stable_mosaic.version = 11 : i64} {
  func.func @_vit_fused_kernel(%arg0: i32, %arg1: memref<1x17x192xf32, #tpu.memory_space<vmem>>, %arg2: memref<192x32xf32, #tpu.memory_space<vmem>>, %arg3: memref<17x32xf32, #tpu.memory_space<vmem>>, %arg4: memref<2x1x32xf32, #tpu.memory_space<vmem>>, %arg5: memref<2x1x32xf32, #tpu.memory_space<vmem>>, %arg6: memref<2x32x96xf32, #tpu.memory_space<vmem>>, %arg7: memref<2x1x96xf32, #tpu.memory_space<vmem>>, %arg8: memref<2x32x32xf32, #tpu.memory_space<vmem>>, %arg9: memref<2x1x32xf32, #tpu.memory_space<vmem>>, %arg10: memref<2x1x32xf32, #tpu.memory_space<vmem>>, %arg11: memref<2x1x32xf32, #tpu.memory_space<vmem>>, %arg12: memref<2x32x64xf32, #tpu.memory_space<vmem>>, %arg13: memref<2x1x64xf32, #tpu.memory_space<vmem>>, %arg14: memref<2x64x32xf32, #tpu.memory_space<vmem>>, %arg15: memref<2x1x32xf32, #tpu.memory_space<vmem>>, %arg16: memref<1x32xf32, #tpu.memory_space<vmem>>, %arg17: memref<1x32xf32, #tpu.memory_space<vmem>>, %arg18: memref<32x10xf32, #tpu.memory_space<vmem>>, %arg19: memref<1x10xf32, #tpu.memory_space<vmem>>, %arg20: memref<1x1x10xf32, #tpu.memory_space<vmem>>) attributes {dimension_semantics = [#tpu.dimension_semantics<parallel>], iteration_bounds = array<i64: 2>, scalar_prefetch = 0 : i64, scratch_operands = 0 : i64, tpu.core_type = #tpu.core_type<tc>, window_params = [{transform_indices = @transform_0, window_bounds = array<i64: 1, 17, 192>}, {pipeline_mode = #tpu.pipeline_mode<synchronous>, transform_indices = @transform_1, window_bounds = array<i64: 192, 32>}, {pipeline_mode = #tpu.pipeline_mode<synchronous>, transform_indices = @transform_2, window_bounds = array<i64: 17, 32>}, {pipeline_mode = #tpu.pipeline_mode<synchronous>, transform_indices = @transform_3, window_bounds = array<i64: 2, 1, 32>}, {pipeline_mode = #tpu.pipeline_mode<synchronous>, transform_indices = @transform_4, window_bounds = array<i64: 2, 1, 32>}, {pipeline_mode = #tpu.pipeline_mode<synchronous>, transform_indices = @transform_5, window_bounds = array<i64: 2, 32, 96>}, {pipeline_mode = #tpu.pipeline_mode<synchronous>, transform_indices = @transform_6, window_bounds = array<i64: 2, 1, 96>}, {pipeline_mode = #tpu.pipeline_mode<synchronous>, transform_indices = @transform_7, window_bounds = array<i64: 2, 32, 32>}, {pipeline_mode = #tpu.pipeline_mode<synchronous>, transform_indices = @transform_8, window_bounds = array<i64: 2, 1, 32>}, {pipeline_mode = #tpu.pipeline_mode<synchronous>, transform_indices = @transform_9, window_bounds = array<i64: 2, 1, 32>}, {pipeline_mode = #tpu.pipeline_mode<synchronous>, transform_indices = @transform_10, window_bounds = array<i64: 2, 1, 32>}, {pipeline_mode = #tpu.pipeline_mode<synchronous>, transform_indices = @transform_11, window_bounds = array<i64: 2, 32, 64>}, {pipeline_mode = #tpu.pipeline_mode<synchronous>, transform_indices = @transform_12, window_bounds = array<i64: 2, 1, 64>}, {pipeline_mode = #tpu.pipeline_mode<synchronous>, transform_indices = @transform_13, window_bounds = array<i64: 2, 64, 32>}, {pipeline_mode = #tpu.pipeline_mode<synchronous>, transform_indices = @transform_14, window_bounds = array<i64: 2, 1, 32>}, {pipeline_mode = #tpu.pipeline_mode<synchronous>, transform_indices = @transform_15, window_bounds = array<i64: 1, 32>}, {pipeline_mode = #tpu.pipeline_mode<synchronous>, transform_indices = @transform_16, window_bounds = array<i64: 1, 32>}, {pipeline_mode = #tpu.pipeline_mode<synchronous>, transform_indices = @transform_17, window_bounds = array<i64: 32, 10>}, {pipeline_mode = #tpu.pipeline_mode<synchronous>, transform_indices = @transform_18, window_bounds = array<i64: 1, 10>}, {transform_indices = @transform_19, window_bounds = array<i64: 1, 1, 10>}]} {
    %c0 = arith.constant 0 : index
    %c0_0 = arith.constant 0 : index
    %c0_1 = arith.constant 0 : index
    %0 = vector.load %arg1[%c0, %c0_0, %c0_1] : memref<1x17x192xf32, #tpu.memory_space<vmem>>, vector<1x17x192xf32>
    %1 = vector.shape_cast %0 : vector<1x17x192xf32> to vector<17x192xf32>
    %c0_2 = arith.constant 0 : index
    %c0_3 = arith.constant 0 : index
    %2 = vector.load %arg2[%c0_2, %c0_3] : memref<192x32xf32, #tpu.memory_space<vmem>>, vector<192x32xf32>
    %3 = arith.truncf %1 : vector<17x192xf32> to vector<17x192xbf16>
    %4 = arith.truncf %2 : vector<192x32xf32> to vector<192x32xbf16>
    %cst = arith.constant dense<0.000000e+00> : vector<17x32xf32>
    %5 = tpu.matmul %3, %4, %cst {dimension_numbers = #tpu.dot_dimension_numbers<[1], [0], [0], [1], [0, 0, 1, 1], [], []>} : vector<17x192xbf16>, vector<192x32xbf16>, vector<17x32xf32> -> vector<17x32xf32>
    %c0_4 = arith.constant 0 : index
    %c0_5 = arith.constant 0 : index
    %6 = vector.load %arg3[%c0_4, %c0_5] : memref<17x32xf32, #tpu.memory_space<vmem>>, vector<17x32xf32>
    %7 = arith.addf %5, %6 : vector<17x32xf32>
    %c0_6 = arith.constant 0 : index
    %c0_7 = arith.constant 0 : index
    %c0_8 = arith.constant 0 : index
    %8 = vector.load %arg4[%c0_6, %c0_7, %c0_8] : memref<2x1x32xf32, #tpu.memory_space<vmem>>, vector<1x1x32xf32>
    %9 = vector.shape_cast %8 : vector<1x1x32xf32> to vector<1x32xf32>
    %c0_9 = arith.constant 0 : index
    %c0_10 = arith.constant 0 : index
    %c0_11 = arith.constant 0 : index
    %10 = vector.load %arg5[%c0_9, %c0_10, %c0_11] : memref<2x1x32xf32, #tpu.memory_space<vmem>>, vector<1x1x32xf32>
    %11 = vector.shape_cast %10 : vector<1x1x32xf32> to vector<1x32xf32>
    %cst_12 = arith.constant dense<0.000000e+00> : vector<17xf32>
    %12 = vector.multi_reduction <add>, %7, %cst_12 [1] : vector<17x32xf32> to vector<17xf32>
    %13 = vector.shape_cast %12 : vector<17xf32> to vector<17x1xf32>
    %cst_13 = arith.constant 3.200000e+01 : f32
    %14 = vector.broadcast %cst_13 : f32 to vector<17x1xf32>
    %15 = arith.divf %13, %14 : vector<17x1xf32>
    %16 = vector.broadcast %15 : vector<17x1xf32> to vector<17x32xf32>
    %17 = arith.subf %7, %16 : vector<17x32xf32>
    %18 = arith.mulf %17, %17 : vector<17x32xf32>
    %cst_14 = arith.constant dense<0.000000e+00> : vector<17xf32>
    %19 = vector.multi_reduction <add>, %18, %cst_14 [1] : vector<17x32xf32> to vector<17xf32>
    %20 = vector.shape_cast %19 : vector<17xf32> to vector<17x1xf32>
    %cst_15 = arith.constant 3.200000e+01 : f32
    %21 = vector.broadcast %cst_15 : f32 to vector<17x1xf32>
    %22 = arith.divf %20, %21 : vector<17x1xf32>
    %cst_16 = arith.constant 9.99999997E-7 : f32
    %23 = vector.broadcast %cst_16 : f32 to vector<17x1xf32>
    %24 = arith.addf %22, %23 : vector<17x1xf32>
    %25 = math.rsqrt %24 : vector<17x1xf32>
    %26 = vector.broadcast %25 : vector<17x1xf32> to vector<17x32xf32>
    %27 = arith.mulf %17, %26 : vector<17x32xf32>
    %28 = vector.broadcast %9 : vector<1x32xf32> to vector<17x32xf32>
    %29 = arith.mulf %27, %28 : vector<17x32xf32>
    %30 = vector.broadcast %11 : vector<1x32xf32> to vector<17x32xf32>
    %31 = arith.addf %29, %30 : vector<17x32xf32>
    %c0_17 = arith.constant 0 : index
    %c0_18 = arith.constant 0 : index
    %c0_19 = arith.constant 0 : index
    %32 = vector.load %arg6[%c0_17, %c0_18, %c0_19] : memref<2x32x96xf32, #tpu.memory_space<vmem>>, vector<1x32x96xf32>
    %33 = vector.shape_cast %32 : vector<1x32x96xf32> to vector<32x96xf32>
    %34 = arith.truncf %31 : vector<17x32xf32> to vector<17x32xbf16>
    %35 = arith.truncf %33 : vector<32x96xf32> to vector<32x96xbf16>
    %cst_20 = arith.constant dense<0.000000e+00> : vector<17x96xf32>
    %36 = tpu.matmul %34, %35, %cst_20 {dimension_numbers = #tpu.dot_dimension_numbers<[1], [0], [0], [1], [0, 0, 1, 1], [], []>} : vector<17x32xbf16>, vector<32x96xbf16>, vector<17x96xf32> -> vector<17x96xf32>
    %c0_21 = arith.constant 0 : index
    %c0_22 = arith.constant 0 : index
    %c0_23 = arith.constant 0 : index
    %37 = vector.load %arg7[%c0_21, %c0_22, %c0_23] : memref<2x1x96xf32, #tpu.memory_space<vmem>>, vector<1x1x96xf32>
    %38 = vector.shape_cast %37 : vector<1x1x96xf32> to vector<1x96xf32>
    %39 = vector.broadcast %38 : vector<1x96xf32> to vector<17x96xf32>
    %40 = arith.addf %36, %39 : vector<17x96xf32>
    %c0_24 = arith.constant 0 : index
    %c0_25 = arith.constant 0 : index
    %c0_26 = arith.constant 0 : index
    %41 = vector.load %arg8[%c0_24, %c0_25, %c0_26] : memref<2x32x32xf32, #tpu.memory_space<vmem>>, vector<1x32x32xf32>
    %42 = vector.shape_cast %41 : vector<1x32x32xf32> to vector<32x32xf32>
    %cst_27 = arith.constant 0.000000e+00 : f32
    %43 = vector.broadcast %cst_27 : f32 to vector<17x32xf32>
    %44 = vector.extract_strided_slice %40 {offsets = [0, 0], sizes = [17, 8], strides = [1, 1]} : vector<17x96xf32> to vector<17x8xf32>
    %cst_28 = arith.constant 0.353553385 : f32
    %45 = vector.broadcast %cst_28 : f32 to vector<17x8xf32>
    %46 = arith.mulf %44, %45 : vector<17x8xf32>
    %47 = vector.extract_strided_slice %40 {offsets = [0, 32], sizes = [17, 8], strides = [1, 1]} : vector<17x96xf32> to vector<17x8xf32>
    %48 = vector.extract_strided_slice %40 {offsets = [0, 64], sizes = [17, 8], strides = [1, 1]} : vector<17x96xf32> to vector<17x8xf32>
    %49 = arith.truncf %46 : vector<17x8xf32> to vector<17x8xbf16>
    %50 = arith.truncf %47 : vector<17x8xf32> to vector<17x8xbf16>
    %cst_29 = arith.constant dense<0.000000e+00> : vector<17x17xf32>
    %51 = tpu.matmul %49, %50, %cst_29 {dimension_numbers = #tpu.dot_dimension_numbers<[1], [1], [0], [0], [0, 0, 1, 0], [], []>} : vector<17x8xbf16>, vector<17x8xbf16>, vector<17x17xf32> -> vector<17x17xf32>
    %cst_30 = arith.constant dense<0xFF800000> : vector<17xf32>
    %52 = vector.multi_reduction <maximumf>, %51, %cst_30 [1] : vector<17x17xf32> to vector<17xf32>
    %53 = vector.shape_cast %52 : vector<17xf32> to vector<17x1xf32>
    %54 = vector.broadcast %53 : vector<17x1xf32> to vector<17x17xf32>
    %55 = arith.subf %51, %54 : vector<17x17xf32>
    %56 = math.exp %55 : vector<17x17xf32>
    %cst_31 = arith.constant dense<0.000000e+00> : vector<17xf32>
    %57 = vector.multi_reduction <add>, %56, %cst_31 [1] : vector<17x17xf32> to vector<17xf32>
    %58 = vector.shape_cast %57 : vector<17xf32> to vector<17x1xf32>
    %59 = tpu.reciprocal %58 {approx = true} : vector<17x1xf32> -> vector<17x1xf32>
    %60 = vector.broadcast %59 : vector<17x1xf32> to vector<17x17xf32>
    %61 = arith.mulf %56, %60 : vector<17x17xf32>
    %62 = arith.truncf %61 : vector<17x17xf32> to vector<17x17xbf16>
    %63 = arith.truncf %48 : vector<17x8xf32> to vector<17x8xbf16>
    %cst_32 = arith.constant dense<0.000000e+00> : vector<17x8xf32>
    %64 = tpu.matmul %62, %63, %cst_32 {dimension_numbers = #tpu.dot_dimension_numbers<[1], [0], [0], [1], [0, 0, 1, 1], [], []>} : vector<17x17xbf16>, vector<17x8xbf16>, vector<17x8xf32> -> vector<17x8xf32>
    %65 = vector.extract_strided_slice %42 {offsets = [0, 0], sizes = [8, 32], strides = [1, 1]} : vector<32x32xf32> to vector<8x32xf32>
    %66 = arith.truncf %64 : vector<17x8xf32> to vector<17x8xbf16>
    %67 = arith.truncf %65 : vector<8x32xf32> to vector<8x32xbf16>
    %cst_33 = arith.constant dense<0.000000e+00> : vector<17x32xf32>
    %68 = tpu.matmul %66, %67, %cst_33 {dimension_numbers = #tpu.dot_dimension_numbers<[1], [0], [0], [1], [0, 0, 1, 1], [], []>} : vector<17x8xbf16>, vector<8x32xbf16>, vector<17x32xf32> -> vector<17x32xf32>
    %69 = arith.addf %43, %68 : vector<17x32xf32>
    %70 = vector.extract_strided_slice %40 {offsets = [0, 8], sizes = [17, 8], strides = [1, 1]} : vector<17x96xf32> to vector<17x8xf32>
    %cst_34 = arith.constant 0.353553385 : f32
    %71 = vector.broadcast %cst_34 : f32 to vector<17x8xf32>
    %72 = arith.mulf %70, %71 : vector<17x8xf32>
    %73 = vector.extract_strided_slice %40 {offsets = [0, 40], sizes = [17, 8], strides = [1, 1]} : vector<17x96xf32> to vector<17x8xf32>
    %74 = vector.extract_strided_slice %40 {offsets = [0, 72], sizes = [17, 8], strides = [1, 1]} : vector<17x96xf32> to vector<17x8xf32>
    %75 = arith.truncf %72 : vector<17x8xf32> to vector<17x8xbf16>
    %76 = arith.truncf %73 : vector<17x8xf32> to vector<17x8xbf16>
    %cst_35 = arith.constant dense<0.000000e+00> : vector<17x17xf32>
    %77 = tpu.matmul %75, %76, %cst_35 {dimension_numbers = #tpu.dot_dimension_numbers<[1], [1], [0], [0], [0, 0, 1, 0], [], []>} : vector<17x8xbf16>, vector<17x8xbf16>, vector<17x17xf32> -> vector<17x17xf32>
    %cst_36 = arith.constant dense<0xFF800000> : vector<17xf32>
    %78 = vector.multi_reduction <maximumf>, %77, %cst_36 [1] : vector<17x17xf32> to vector<17xf32>
    %79 = vector.shape_cast %78 : vector<17xf32> to vector<17x1xf32>
    %80 = vector.broadcast %79 : vector<17x1xf32> to vector<17x17xf32>
    %81 = arith.subf %77, %80 : vector<17x17xf32>
    %82 = math.exp %81 : vector<17x17xf32>
    %cst_37 = arith.constant dense<0.000000e+00> : vector<17xf32>
    %83 = vector.multi_reduction <add>, %82, %cst_37 [1] : vector<17x17xf32> to vector<17xf32>
    %84 = vector.shape_cast %83 : vector<17xf32> to vector<17x1xf32>
    %85 = tpu.reciprocal %84 {approx = true} : vector<17x1xf32> -> vector<17x1xf32>
    %86 = vector.broadcast %85 : vector<17x1xf32> to vector<17x17xf32>
    %87 = arith.mulf %82, %86 : vector<17x17xf32>
    %88 = arith.truncf %87 : vector<17x17xf32> to vector<17x17xbf16>
    %89 = arith.truncf %74 : vector<17x8xf32> to vector<17x8xbf16>
    %cst_38 = arith.constant dense<0.000000e+00> : vector<17x8xf32>
    %90 = tpu.matmul %88, %89, %cst_38 {dimension_numbers = #tpu.dot_dimension_numbers<[1], [0], [0], [1], [0, 0, 1, 1], [], []>} : vector<17x17xbf16>, vector<17x8xbf16>, vector<17x8xf32> -> vector<17x8xf32>
    %91 = vector.extract_strided_slice %42 {offsets = [8, 0], sizes = [8, 32], strides = [1, 1]} : vector<32x32xf32> to vector<8x32xf32>
    %92 = arith.truncf %90 : vector<17x8xf32> to vector<17x8xbf16>
    %93 = arith.truncf %91 : vector<8x32xf32> to vector<8x32xbf16>
    %cst_39 = arith.constant dense<0.000000e+00> : vector<17x32xf32>
    %94 = tpu.matmul %92, %93, %cst_39 {dimension_numbers = #tpu.dot_dimension_numbers<[1], [0], [0], [1], [0, 0, 1, 1], [], []>} : vector<17x8xbf16>, vector<8x32xbf16>, vector<17x32xf32> -> vector<17x32xf32>
    %95 = arith.addf %69, %94 : vector<17x32xf32>
    %96 = vector.extract_strided_slice %40 {offsets = [0, 16], sizes = [17, 8], strides = [1, 1]} : vector<17x96xf32> to vector<17x8xf32>
    %cst_40 = arith.constant 0.353553385 : f32
    %97 = vector.broadcast %cst_40 : f32 to vector<17x8xf32>
    %98 = arith.mulf %96, %97 : vector<17x8xf32>
    %99 = vector.extract_strided_slice %40 {offsets = [0, 48], sizes = [17, 8], strides = [1, 1]} : vector<17x96xf32> to vector<17x8xf32>
    %100 = vector.extract_strided_slice %40 {offsets = [0, 80], sizes = [17, 8], strides = [1, 1]} : vector<17x96xf32> to vector<17x8xf32>
    %101 = arith.truncf %98 : vector<17x8xf32> to vector<17x8xbf16>
    %102 = arith.truncf %99 : vector<17x8xf32> to vector<17x8xbf16>
    %cst_41 = arith.constant dense<0.000000e+00> : vector<17x17xf32>
    %103 = tpu.matmul %101, %102, %cst_41 {dimension_numbers = #tpu.dot_dimension_numbers<[1], [1], [0], [0], [0, 0, 1, 0], [], []>} : vector<17x8xbf16>, vector<17x8xbf16>, vector<17x17xf32> -> vector<17x17xf32>
    %cst_42 = arith.constant dense<0xFF800000> : vector<17xf32>
    %104 = vector.multi_reduction <maximumf>, %103, %cst_42 [1] : vector<17x17xf32> to vector<17xf32>
    %105 = vector.shape_cast %104 : vector<17xf32> to vector<17x1xf32>
    %106 = vector.broadcast %105 : vector<17x1xf32> to vector<17x17xf32>
    %107 = arith.subf %103, %106 : vector<17x17xf32>
    %108 = math.exp %107 : vector<17x17xf32>
    %cst_43 = arith.constant dense<0.000000e+00> : vector<17xf32>
    %109 = vector.multi_reduction <add>, %108, %cst_43 [1] : vector<17x17xf32> to vector<17xf32>
    %110 = vector.shape_cast %109 : vector<17xf32> to vector<17x1xf32>
    %111 = tpu.reciprocal %110 {approx = true} : vector<17x1xf32> -> vector<17x1xf32>
    %112 = vector.broadcast %111 : vector<17x1xf32> to vector<17x17xf32>
    %113 = arith.mulf %108, %112 : vector<17x17xf32>
    %114 = arith.truncf %113 : vector<17x17xf32> to vector<17x17xbf16>
    %115 = arith.truncf %100 : vector<17x8xf32> to vector<17x8xbf16>
    %cst_44 = arith.constant dense<0.000000e+00> : vector<17x8xf32>
    %116 = tpu.matmul %114, %115, %cst_44 {dimension_numbers = #tpu.dot_dimension_numbers<[1], [0], [0], [1], [0, 0, 1, 1], [], []>} : vector<17x17xbf16>, vector<17x8xbf16>, vector<17x8xf32> -> vector<17x8xf32>
    %117 = vector.extract_strided_slice %42 {offsets = [16, 0], sizes = [8, 32], strides = [1, 1]} : vector<32x32xf32> to vector<8x32xf32>
    %118 = arith.truncf %116 : vector<17x8xf32> to vector<17x8xbf16>
    %119 = arith.truncf %117 : vector<8x32xf32> to vector<8x32xbf16>
    %cst_45 = arith.constant dense<0.000000e+00> : vector<17x32xf32>
    %120 = tpu.matmul %118, %119, %cst_45 {dimension_numbers = #tpu.dot_dimension_numbers<[1], [0], [0], [1], [0, 0, 1, 1], [], []>} : vector<17x8xbf16>, vector<8x32xbf16>, vector<17x32xf32> -> vector<17x32xf32>
    %121 = arith.addf %95, %120 : vector<17x32xf32>
    %122 = vector.extract_strided_slice %40 {offsets = [0, 24], sizes = [17, 8], strides = [1, 1]} : vector<17x96xf32> to vector<17x8xf32>
    %cst_46 = arith.constant 0.353553385 : f32
    %123 = vector.broadcast %cst_46 : f32 to vector<17x8xf32>
    %124 = arith.mulf %122, %123 : vector<17x8xf32>
    %125 = vector.extract_strided_slice %40 {offsets = [0, 56], sizes = [17, 8], strides = [1, 1]} : vector<17x96xf32> to vector<17x8xf32>
    %126 = vector.extract_strided_slice %40 {offsets = [0, 88], sizes = [17, 8], strides = [1, 1]} : vector<17x96xf32> to vector<17x8xf32>
    %127 = arith.truncf %124 : vector<17x8xf32> to vector<17x8xbf16>
    %128 = arith.truncf %125 : vector<17x8xf32> to vector<17x8xbf16>
    %cst_47 = arith.constant dense<0.000000e+00> : vector<17x17xf32>
    %129 = tpu.matmul %127, %128, %cst_47 {dimension_numbers = #tpu.dot_dimension_numbers<[1], [1], [0], [0], [0, 0, 1, 0], [], []>} : vector<17x8xbf16>, vector<17x8xbf16>, vector<17x17xf32> -> vector<17x17xf32>
    %cst_48 = arith.constant dense<0xFF800000> : vector<17xf32>
    %130 = vector.multi_reduction <maximumf>, %129, %cst_48 [1] : vector<17x17xf32> to vector<17xf32>
    %131 = vector.shape_cast %130 : vector<17xf32> to vector<17x1xf32>
    %132 = vector.broadcast %131 : vector<17x1xf32> to vector<17x17xf32>
    %133 = arith.subf %129, %132 : vector<17x17xf32>
    %134 = math.exp %133 : vector<17x17xf32>
    %cst_49 = arith.constant dense<0.000000e+00> : vector<17xf32>
    %135 = vector.multi_reduction <add>, %134, %cst_49 [1] : vector<17x17xf32> to vector<17xf32>
    %136 = vector.shape_cast %135 : vector<17xf32> to vector<17x1xf32>
    %137 = tpu.reciprocal %136 {approx = true} : vector<17x1xf32> -> vector<17x1xf32>
    %138 = vector.broadcast %137 : vector<17x1xf32> to vector<17x17xf32>
    %139 = arith.mulf %134, %138 : vector<17x17xf32>
    %140 = arith.truncf %139 : vector<17x17xf32> to vector<17x17xbf16>
    %141 = arith.truncf %126 : vector<17x8xf32> to vector<17x8xbf16>
    %cst_50 = arith.constant dense<0.000000e+00> : vector<17x8xf32>
    %142 = tpu.matmul %140, %141, %cst_50 {dimension_numbers = #tpu.dot_dimension_numbers<[1], [0], [0], [1], [0, 0, 1, 1], [], []>} : vector<17x17xbf16>, vector<17x8xbf16>, vector<17x8xf32> -> vector<17x8xf32>
    %143 = vector.extract_strided_slice %42 {offsets = [24, 0], sizes = [8, 32], strides = [1, 1]} : vector<32x32xf32> to vector<8x32xf32>
    %144 = arith.truncf %142 : vector<17x8xf32> to vector<17x8xbf16>
    %145 = arith.truncf %143 : vector<8x32xf32> to vector<8x32xbf16>
    %cst_51 = arith.constant dense<0.000000e+00> : vector<17x32xf32>
    %146 = tpu.matmul %144, %145, %cst_51 {dimension_numbers = #tpu.dot_dimension_numbers<[1], [0], [0], [1], [0, 0, 1, 1], [], []>} : vector<17x8xbf16>, vector<8x32xbf16>, vector<17x32xf32> -> vector<17x32xf32>
    %147 = arith.addf %121, %146 : vector<17x32xf32>
    %148 = arith.addf %7, %147 : vector<17x32xf32>
    %c0_52 = arith.constant 0 : index
    %c0_53 = arith.constant 0 : index
    %c0_54 = arith.constant 0 : index
    %149 = vector.load %arg9[%c0_52, %c0_53, %c0_54] : memref<2x1x32xf32, #tpu.memory_space<vmem>>, vector<1x1x32xf32>
    %150 = vector.shape_cast %149 : vector<1x1x32xf32> to vector<1x32xf32>
    %151 = vector.broadcast %150 : vector<1x32xf32> to vector<17x32xf32>
    %152 = arith.addf %148, %151 : vector<17x32xf32>
    %c0_55 = arith.constant 0 : index
    %c0_56 = arith.constant 0 : index
    %c0_57 = arith.constant 0 : index
    %153 = vector.load %arg10[%c0_55, %c0_56, %c0_57] : memref<2x1x32xf32, #tpu.memory_space<vmem>>, vector<1x1x32xf32>
    %154 = vector.shape_cast %153 : vector<1x1x32xf32> to vector<1x32xf32>
    %c0_58 = arith.constant 0 : index
    %c0_59 = arith.constant 0 : index
    %c0_60 = arith.constant 0 : index
    %155 = vector.load %arg11[%c0_58, %c0_59, %c0_60] : memref<2x1x32xf32, #tpu.memory_space<vmem>>, vector<1x1x32xf32>
    %156 = vector.shape_cast %155 : vector<1x1x32xf32> to vector<1x32xf32>
    %cst_61 = arith.constant dense<0.000000e+00> : vector<17xf32>
    %157 = vector.multi_reduction <add>, %152, %cst_61 [1] : vector<17x32xf32> to vector<17xf32>
    %158 = vector.shape_cast %157 : vector<17xf32> to vector<17x1xf32>
    %cst_62 = arith.constant 3.200000e+01 : f32
    %159 = vector.broadcast %cst_62 : f32 to vector<17x1xf32>
    %160 = arith.divf %158, %159 : vector<17x1xf32>
    %161 = vector.broadcast %160 : vector<17x1xf32> to vector<17x32xf32>
    %162 = arith.subf %152, %161 : vector<17x32xf32>
    %163 = arith.mulf %162, %162 : vector<17x32xf32>
    %cst_63 = arith.constant dense<0.000000e+00> : vector<17xf32>
    %164 = vector.multi_reduction <add>, %163, %cst_63 [1] : vector<17x32xf32> to vector<17xf32>
    %165 = vector.shape_cast %164 : vector<17xf32> to vector<17x1xf32>
    %cst_64 = arith.constant 3.200000e+01 : f32
    %166 = vector.broadcast %cst_64 : f32 to vector<17x1xf32>
    %167 = arith.divf %165, %166 : vector<17x1xf32>
    %cst_65 = arith.constant 9.99999997E-7 : f32
    %168 = vector.broadcast %cst_65 : f32 to vector<17x1xf32>
    %169 = arith.addf %167, %168 : vector<17x1xf32>
    %170 = math.rsqrt %169 : vector<17x1xf32>
    %171 = vector.broadcast %170 : vector<17x1xf32> to vector<17x32xf32>
    %172 = arith.mulf %162, %171 : vector<17x32xf32>
    %173 = vector.broadcast %154 : vector<1x32xf32> to vector<17x32xf32>
    %174 = arith.mulf %172, %173 : vector<17x32xf32>
    %175 = vector.broadcast %156 : vector<1x32xf32> to vector<17x32xf32>
    %176 = arith.addf %174, %175 : vector<17x32xf32>
    %c0_66 = arith.constant 0 : index
    %c0_67 = arith.constant 0 : index
    %c0_68 = arith.constant 0 : index
    %177 = vector.load %arg12[%c0_66, %c0_67, %c0_68] : memref<2x32x64xf32, #tpu.memory_space<vmem>>, vector<1x32x64xf32>
    %178 = vector.shape_cast %177 : vector<1x32x64xf32> to vector<32x64xf32>
    %179 = arith.truncf %176 : vector<17x32xf32> to vector<17x32xbf16>
    %180 = arith.truncf %178 : vector<32x64xf32> to vector<32x64xbf16>
    %cst_69 = arith.constant dense<0.000000e+00> : vector<17x64xf32>
    %181 = tpu.matmul %179, %180, %cst_69 {dimension_numbers = #tpu.dot_dimension_numbers<[1], [0], [0], [1], [0, 0, 1, 1], [], []>} : vector<17x32xbf16>, vector<32x64xbf16>, vector<17x64xf32> -> vector<17x64xf32>
    %c0_70 = arith.constant 0 : index
    %c0_71 = arith.constant 0 : index
    %c0_72 = arith.constant 0 : index
    %182 = vector.load %arg13[%c0_70, %c0_71, %c0_72] : memref<2x1x64xf32, #tpu.memory_space<vmem>>, vector<1x1x64xf32>
    %183 = vector.shape_cast %182 : vector<1x1x64xf32> to vector<1x64xf32>
    %184 = vector.broadcast %183 : vector<1x64xf32> to vector<17x64xf32>
    %185 = arith.addf %181, %184 : vector<17x64xf32>
    %cst_73 = arith.constant 5.000000e-01 : f32
    %186 = vector.broadcast %cst_73 : f32 to vector<17x64xf32>
    %187 = arith.mulf %186, %185 : vector<17x64xf32>
    %cst_74 = arith.constant 0.707106769 : f32
    %188 = vector.broadcast %cst_74 : f32 to vector<17x64xf32>
    %189 = arith.mulf %185, %188 : vector<17x64xf32>
    %190 = math.erf %189 : vector<17x64xf32>
    %cst_75 = arith.constant 1.000000e+00 : f32
    %191 = vector.broadcast %cst_75 : f32 to vector<17x64xf32>
    %192 = arith.addf %191, %190 : vector<17x64xf32>
    %193 = arith.mulf %187, %192 : vector<17x64xf32>
    %c0_76 = arith.constant 0 : index
    %c0_77 = arith.constant 0 : index
    %c0_78 = arith.constant 0 : index
    %194 = vector.load %arg14[%c0_76, %c0_77, %c0_78] : memref<2x64x32xf32, #tpu.memory_space<vmem>>, vector<1x64x32xf32>
    %195 = vector.shape_cast %194 : vector<1x64x32xf32> to vector<64x32xf32>
    %196 = arith.truncf %193 : vector<17x64xf32> to vector<17x64xbf16>
    %197 = arith.truncf %195 : vector<64x32xf32> to vector<64x32xbf16>
    %cst_79 = arith.constant dense<0.000000e+00> : vector<17x32xf32>
    %198 = tpu.matmul %196, %197, %cst_79 {dimension_numbers = #tpu.dot_dimension_numbers<[1], [0], [0], [1], [0, 0, 1, 1], [], []>} : vector<17x64xbf16>, vector<64x32xbf16>, vector<17x32xf32> -> vector<17x32xf32>
    %199 = arith.addf %152, %198 : vector<17x32xf32>
    %c0_80 = arith.constant 0 : index
    %c0_81 = arith.constant 0 : index
    %c0_82 = arith.constant 0 : index
    %200 = vector.load %arg15[%c0_80, %c0_81, %c0_82] : memref<2x1x32xf32, #tpu.memory_space<vmem>>, vector<1x1x32xf32>
    %201 = vector.shape_cast %200 : vector<1x1x32xf32> to vector<1x32xf32>
    %202 = vector.broadcast %201 : vector<1x32xf32> to vector<17x32xf32>
    %203 = arith.addf %199, %202 : vector<17x32xf32>
    %c1 = arith.constant 1 : index
    %c0_83 = arith.constant 0 : index
    %c0_84 = arith.constant 0 : index
    %204 = vector.load %arg4[%c1, %c0_83, %c0_84] : memref<2x1x32xf32, #tpu.memory_space<vmem>>, vector<1x1x32xf32>
    %205 = vector.shape_cast %204 : vector<1x1x32xf32> to vector<1x32xf32>
    %c1_85 = arith.constant 1 : index
    %c0_86 = arith.constant 0 : index
    %c0_87 = arith.constant 0 : index
    %206 = vector.load %arg5[%c1_85, %c0_86, %c0_87] : memref<2x1x32xf32, #tpu.memory_space<vmem>>, vector<1x1x32xf32>
    %207 = vector.shape_cast %206 : vector<1x1x32xf32> to vector<1x32xf32>
    %cst_88 = arith.constant dense<0.000000e+00> : vector<17xf32>
    %208 = vector.multi_reduction <add>, %203, %cst_88 [1] : vector<17x32xf32> to vector<17xf32>
    %209 = vector.shape_cast %208 : vector<17xf32> to vector<17x1xf32>
    %cst_89 = arith.constant 3.200000e+01 : f32
    %210 = vector.broadcast %cst_89 : f32 to vector<17x1xf32>
    %211 = arith.divf %209, %210 : vector<17x1xf32>
    %212 = vector.broadcast %211 : vector<17x1xf32> to vector<17x32xf32>
    %213 = arith.subf %203, %212 : vector<17x32xf32>
    %214 = arith.mulf %213, %213 : vector<17x32xf32>
    %cst_90 = arith.constant dense<0.000000e+00> : vector<17xf32>
    %215 = vector.multi_reduction <add>, %214, %cst_90 [1] : vector<17x32xf32> to vector<17xf32>
    %216 = vector.shape_cast %215 : vector<17xf32> to vector<17x1xf32>
    %cst_91 = arith.constant 3.200000e+01 : f32
    %217 = vector.broadcast %cst_91 : f32 to vector<17x1xf32>
    %218 = arith.divf %216, %217 : vector<17x1xf32>
    %cst_92 = arith.constant 9.99999997E-7 : f32
    %219 = vector.broadcast %cst_92 : f32 to vector<17x1xf32>
    %220 = arith.addf %218, %219 : vector<17x1xf32>
    %221 = math.rsqrt %220 : vector<17x1xf32>
    %222 = vector.broadcast %221 : vector<17x1xf32> to vector<17x32xf32>
    %223 = arith.mulf %213, %222 : vector<17x32xf32>
    %224 = vector.broadcast %205 : vector<1x32xf32> to vector<17x32xf32>
    %225 = arith.mulf %223, %224 : vector<17x32xf32>
    %226 = vector.broadcast %207 : vector<1x32xf32> to vector<17x32xf32>
    %227 = arith.addf %225, %226 : vector<17x32xf32>
    %c1_93 = arith.constant 1 : index
    %c0_94 = arith.constant 0 : index
    %c0_95 = arith.constant 0 : index
    %228 = vector.load %arg6[%c1_93, %c0_94, %c0_95] : memref<2x32x96xf32, #tpu.memory_space<vmem>>, vector<1x32x96xf32>
    %229 = vector.shape_cast %228 : vector<1x32x96xf32> to vector<32x96xf32>
    %230 = arith.truncf %227 : vector<17x32xf32> to vector<17x32xbf16>
    %231 = arith.truncf %229 : vector<32x96xf32> to vector<32x96xbf16>
    %cst_96 = arith.constant dense<0.000000e+00> : vector<17x96xf32>
    %232 = tpu.matmul %230, %231, %cst_96 {dimension_numbers = #tpu.dot_dimension_numbers<[1], [0], [0], [1], [0, 0, 1, 1], [], []>} : vector<17x32xbf16>, vector<32x96xbf16>, vector<17x96xf32> -> vector<17x96xf32>
    %c1_97 = arith.constant 1 : index
    %c0_98 = arith.constant 0 : index
    %c0_99 = arith.constant 0 : index
    %233 = vector.load %arg7[%c1_97, %c0_98, %c0_99] : memref<2x1x96xf32, #tpu.memory_space<vmem>>, vector<1x1x96xf32>
    %234 = vector.shape_cast %233 : vector<1x1x96xf32> to vector<1x96xf32>
    %235 = vector.broadcast %234 : vector<1x96xf32> to vector<17x96xf32>
    %236 = arith.addf %232, %235 : vector<17x96xf32>
    %c1_100 = arith.constant 1 : index
    %c0_101 = arith.constant 0 : index
    %c0_102 = arith.constant 0 : index
    %237 = vector.load %arg8[%c1_100, %c0_101, %c0_102] : memref<2x32x32xf32, #tpu.memory_space<vmem>>, vector<1x32x32xf32>
    %238 = vector.shape_cast %237 : vector<1x32x32xf32> to vector<32x32xf32>
    %cst_103 = arith.constant 0.000000e+00 : f32
    %239 = vector.broadcast %cst_103 : f32 to vector<17x32xf32>
    %240 = vector.extract_strided_slice %236 {offsets = [0, 0], sizes = [17, 8], strides = [1, 1]} : vector<17x96xf32> to vector<17x8xf32>
    %cst_104 = arith.constant 0.353553385 : f32
    %241 = vector.broadcast %cst_104 : f32 to vector<17x8xf32>
    %242 = arith.mulf %240, %241 : vector<17x8xf32>
    %243 = vector.extract_strided_slice %236 {offsets = [0, 32], sizes = [17, 8], strides = [1, 1]} : vector<17x96xf32> to vector<17x8xf32>
    %244 = vector.extract_strided_slice %236 {offsets = [0, 64], sizes = [17, 8], strides = [1, 1]} : vector<17x96xf32> to vector<17x8xf32>
    %245 = arith.truncf %242 : vector<17x8xf32> to vector<17x8xbf16>
    %246 = arith.truncf %243 : vector<17x8xf32> to vector<17x8xbf16>
    %cst_105 = arith.constant dense<0.000000e+00> : vector<17x17xf32>
    %247 = tpu.matmul %245, %246, %cst_105 {dimension_numbers = #tpu.dot_dimension_numbers<[1], [1], [0], [0], [0, 0, 1, 0], [], []>} : vector<17x8xbf16>, vector<17x8xbf16>, vector<17x17xf32> -> vector<17x17xf32>
    %cst_106 = arith.constant dense<0xFF800000> : vector<17xf32>
    %248 = vector.multi_reduction <maximumf>, %247, %cst_106 [1] : vector<17x17xf32> to vector<17xf32>
    %249 = vector.shape_cast %248 : vector<17xf32> to vector<17x1xf32>
    %250 = vector.broadcast %249 : vector<17x1xf32> to vector<17x17xf32>
    %251 = arith.subf %247, %250 : vector<17x17xf32>
    %252 = math.exp %251 : vector<17x17xf32>
    %cst_107 = arith.constant dense<0.000000e+00> : vector<17xf32>
    %253 = vector.multi_reduction <add>, %252, %cst_107 [1] : vector<17x17xf32> to vector<17xf32>
    %254 = vector.shape_cast %253 : vector<17xf32> to vector<17x1xf32>
    %255 = tpu.reciprocal %254 {approx = true} : vector<17x1xf32> -> vector<17x1xf32>
    %256 = vector.broadcast %255 : vector<17x1xf32> to vector<17x17xf32>
    %257 = arith.mulf %252, %256 : vector<17x17xf32>
    %258 = arith.truncf %257 : vector<17x17xf32> to vector<17x17xbf16>
    %259 = arith.truncf %244 : vector<17x8xf32> to vector<17x8xbf16>
    %cst_108 = arith.constant dense<0.000000e+00> : vector<17x8xf32>
    %260 = tpu.matmul %258, %259, %cst_108 {dimension_numbers = #tpu.dot_dimension_numbers<[1], [0], [0], [1], [0, 0, 1, 1], [], []>} : vector<17x17xbf16>, vector<17x8xbf16>, vector<17x8xf32> -> vector<17x8xf32>
    %261 = vector.extract_strided_slice %238 {offsets = [0, 0], sizes = [8, 32], strides = [1, 1]} : vector<32x32xf32> to vector<8x32xf32>
    %262 = arith.truncf %260 : vector<17x8xf32> to vector<17x8xbf16>
    %263 = arith.truncf %261 : vector<8x32xf32> to vector<8x32xbf16>
    %cst_109 = arith.constant dense<0.000000e+00> : vector<17x32xf32>
    %264 = tpu.matmul %262, %263, %cst_109 {dimension_numbers = #tpu.dot_dimension_numbers<[1], [0], [0], [1], [0, 0, 1, 1], [], []>} : vector<17x8xbf16>, vector<8x32xbf16>, vector<17x32xf32> -> vector<17x32xf32>
    %265 = arith.addf %239, %264 : vector<17x32xf32>
    %266 = vector.extract_strided_slice %236 {offsets = [0, 8], sizes = [17, 8], strides = [1, 1]} : vector<17x96xf32> to vector<17x8xf32>
    %cst_110 = arith.constant 0.353553385 : f32
    %267 = vector.broadcast %cst_110 : f32 to vector<17x8xf32>
    %268 = arith.mulf %266, %267 : vector<17x8xf32>
    %269 = vector.extract_strided_slice %236 {offsets = [0, 40], sizes = [17, 8], strides = [1, 1]} : vector<17x96xf32> to vector<17x8xf32>
    %270 = vector.extract_strided_slice %236 {offsets = [0, 72], sizes = [17, 8], strides = [1, 1]} : vector<17x96xf32> to vector<17x8xf32>
    %271 = arith.truncf %268 : vector<17x8xf32> to vector<17x8xbf16>
    %272 = arith.truncf %269 : vector<17x8xf32> to vector<17x8xbf16>
    %cst_111 = arith.constant dense<0.000000e+00> : vector<17x17xf32>
    %273 = tpu.matmul %271, %272, %cst_111 {dimension_numbers = #tpu.dot_dimension_numbers<[1], [1], [0], [0], [0, 0, 1, 0], [], []>} : vector<17x8xbf16>, vector<17x8xbf16>, vector<17x17xf32> -> vector<17x17xf32>
    %cst_112 = arith.constant dense<0xFF800000> : vector<17xf32>
    %274 = vector.multi_reduction <maximumf>, %273, %cst_112 [1] : vector<17x17xf32> to vector<17xf32>
    %275 = vector.shape_cast %274 : vector<17xf32> to vector<17x1xf32>
    %276 = vector.broadcast %275 : vector<17x1xf32> to vector<17x17xf32>
    %277 = arith.subf %273, %276 : vector<17x17xf32>
    %278 = math.exp %277 : vector<17x17xf32>
    %cst_113 = arith.constant dense<0.000000e+00> : vector<17xf32>
    %279 = vector.multi_reduction <add>, %278, %cst_113 [1] : vector<17x17xf32> to vector<17xf32>
    %280 = vector.shape_cast %279 : vector<17xf32> to vector<17x1xf32>
    %281 = tpu.reciprocal %280 {approx = true} : vector<17x1xf32> -> vector<17x1xf32>
    %282 = vector.broadcast %281 : vector<17x1xf32> to vector<17x17xf32>
    %283 = arith.mulf %278, %282 : vector<17x17xf32>
    %284 = arith.truncf %283 : vector<17x17xf32> to vector<17x17xbf16>
    %285 = arith.truncf %270 : vector<17x8xf32> to vector<17x8xbf16>
    %cst_114 = arith.constant dense<0.000000e+00> : vector<17x8xf32>
    %286 = tpu.matmul %284, %285, %cst_114 {dimension_numbers = #tpu.dot_dimension_numbers<[1], [0], [0], [1], [0, 0, 1, 1], [], []>} : vector<17x17xbf16>, vector<17x8xbf16>, vector<17x8xf32> -> vector<17x8xf32>
    %287 = vector.extract_strided_slice %238 {offsets = [8, 0], sizes = [8, 32], strides = [1, 1]} : vector<32x32xf32> to vector<8x32xf32>
    %288 = arith.truncf %286 : vector<17x8xf32> to vector<17x8xbf16>
    %289 = arith.truncf %287 : vector<8x32xf32> to vector<8x32xbf16>
    %cst_115 = arith.constant dense<0.000000e+00> : vector<17x32xf32>
    %290 = tpu.matmul %288, %289, %cst_115 {dimension_numbers = #tpu.dot_dimension_numbers<[1], [0], [0], [1], [0, 0, 1, 1], [], []>} : vector<17x8xbf16>, vector<8x32xbf16>, vector<17x32xf32> -> vector<17x32xf32>
    %291 = arith.addf %265, %290 : vector<17x32xf32>
    %292 = vector.extract_strided_slice %236 {offsets = [0, 16], sizes = [17, 8], strides = [1, 1]} : vector<17x96xf32> to vector<17x8xf32>
    %cst_116 = arith.constant 0.353553385 : f32
    %293 = vector.broadcast %cst_116 : f32 to vector<17x8xf32>
    %294 = arith.mulf %292, %293 : vector<17x8xf32>
    %295 = vector.extract_strided_slice %236 {offsets = [0, 48], sizes = [17, 8], strides = [1, 1]} : vector<17x96xf32> to vector<17x8xf32>
    %296 = vector.extract_strided_slice %236 {offsets = [0, 80], sizes = [17, 8], strides = [1, 1]} : vector<17x96xf32> to vector<17x8xf32>
    %297 = arith.truncf %294 : vector<17x8xf32> to vector<17x8xbf16>
    %298 = arith.truncf %295 : vector<17x8xf32> to vector<17x8xbf16>
    %cst_117 = arith.constant dense<0.000000e+00> : vector<17x17xf32>
    %299 = tpu.matmul %297, %298, %cst_117 {dimension_numbers = #tpu.dot_dimension_numbers<[1], [1], [0], [0], [0, 0, 1, 0], [], []>} : vector<17x8xbf16>, vector<17x8xbf16>, vector<17x17xf32> -> vector<17x17xf32>
    %cst_118 = arith.constant dense<0xFF800000> : vector<17xf32>
    %300 = vector.multi_reduction <maximumf>, %299, %cst_118 [1] : vector<17x17xf32> to vector<17xf32>
    %301 = vector.shape_cast %300 : vector<17xf32> to vector<17x1xf32>
    %302 = vector.broadcast %301 : vector<17x1xf32> to vector<17x17xf32>
    %303 = arith.subf %299, %302 : vector<17x17xf32>
    %304 = math.exp %303 : vector<17x17xf32>
    %cst_119 = arith.constant dense<0.000000e+00> : vector<17xf32>
    %305 = vector.multi_reduction <add>, %304, %cst_119 [1] : vector<17x17xf32> to vector<17xf32>
    %306 = vector.shape_cast %305 : vector<17xf32> to vector<17x1xf32>
    %307 = tpu.reciprocal %306 {approx = true} : vector<17x1xf32> -> vector<17x1xf32>
    %308 = vector.broadcast %307 : vector<17x1xf32> to vector<17x17xf32>
    %309 = arith.mulf %304, %308 : vector<17x17xf32>
    %310 = arith.truncf %309 : vector<17x17xf32> to vector<17x17xbf16>
    %311 = arith.truncf %296 : vector<17x8xf32> to vector<17x8xbf16>
    %cst_120 = arith.constant dense<0.000000e+00> : vector<17x8xf32>
    %312 = tpu.matmul %310, %311, %cst_120 {dimension_numbers = #tpu.dot_dimension_numbers<[1], [0], [0], [1], [0, 0, 1, 1], [], []>} : vector<17x17xbf16>, vector<17x8xbf16>, vector<17x8xf32> -> vector<17x8xf32>
    %313 = vector.extract_strided_slice %238 {offsets = [16, 0], sizes = [8, 32], strides = [1, 1]} : vector<32x32xf32> to vector<8x32xf32>
    %314 = arith.truncf %312 : vector<17x8xf32> to vector<17x8xbf16>
    %315 = arith.truncf %313 : vector<8x32xf32> to vector<8x32xbf16>
    %cst_121 = arith.constant dense<0.000000e+00> : vector<17x32xf32>
    %316 = tpu.matmul %314, %315, %cst_121 {dimension_numbers = #tpu.dot_dimension_numbers<[1], [0], [0], [1], [0, 0, 1, 1], [], []>} : vector<17x8xbf16>, vector<8x32xbf16>, vector<17x32xf32> -> vector<17x32xf32>
    %317 = arith.addf %291, %316 : vector<17x32xf32>
    %318 = vector.extract_strided_slice %236 {offsets = [0, 24], sizes = [17, 8], strides = [1, 1]} : vector<17x96xf32> to vector<17x8xf32>
    %cst_122 = arith.constant 0.353553385 : f32
    %319 = vector.broadcast %cst_122 : f32 to vector<17x8xf32>
    %320 = arith.mulf %318, %319 : vector<17x8xf32>
    %321 = vector.extract_strided_slice %236 {offsets = [0, 56], sizes = [17, 8], strides = [1, 1]} : vector<17x96xf32> to vector<17x8xf32>
    %322 = vector.extract_strided_slice %236 {offsets = [0, 88], sizes = [17, 8], strides = [1, 1]} : vector<17x96xf32> to vector<17x8xf32>
    %323 = arith.truncf %320 : vector<17x8xf32> to vector<17x8xbf16>
    %324 = arith.truncf %321 : vector<17x8xf32> to vector<17x8xbf16>
    %cst_123 = arith.constant dense<0.000000e+00> : vector<17x17xf32>
    %325 = tpu.matmul %323, %324, %cst_123 {dimension_numbers = #tpu.dot_dimension_numbers<[1], [1], [0], [0], [0, 0, 1, 0], [], []>} : vector<17x8xbf16>, vector<17x8xbf16>, vector<17x17xf32> -> vector<17x17xf32>
    %cst_124 = arith.constant dense<0xFF800000> : vector<17xf32>
    %326 = vector.multi_reduction <maximumf>, %325, %cst_124 [1] : vector<17x17xf32> to vector<17xf32>
    %327 = vector.shape_cast %326 : vector<17xf32> to vector<17x1xf32>
    %328 = vector.broadcast %327 : vector<17x1xf32> to vector<17x17xf32>
    %329 = arith.subf %325, %328 : vector<17x17xf32>
    %330 = math.exp %329 : vector<17x17xf32>
    %cst_125 = arith.constant dense<0.000000e+00> : vector<17xf32>
    %331 = vector.multi_reduction <add>, %330, %cst_125 [1] : vector<17x17xf32> to vector<17xf32>
    %332 = vector.shape_cast %331 : vector<17xf32> to vector<17x1xf32>
    %333 = tpu.reciprocal %332 {approx = true} : vector<17x1xf32> -> vector<17x1xf32>
    %334 = vector.broadcast %333 : vector<17x1xf32> to vector<17x17xf32>
    %335 = arith.mulf %330, %334 : vector<17x17xf32>
    %336 = arith.truncf %335 : vector<17x17xf32> to vector<17x17xbf16>
    %337 = arith.truncf %322 : vector<17x8xf32> to vector<17x8xbf16>
    %cst_126 = arith.constant dense<0.000000e+00> : vector<17x8xf32>
    %338 = tpu.matmul %336, %337, %cst_126 {dimension_numbers = #tpu.dot_dimension_numbers<[1], [0], [0], [1], [0, 0, 1, 1], [], []>} : vector<17x17xbf16>, vector<17x8xbf16>, vector<17x8xf32> -> vector<17x8xf32>
    %339 = vector.extract_strided_slice %238 {offsets = [24, 0], sizes = [8, 32], strides = [1, 1]} : vector<32x32xf32> to vector<8x32xf32>
    %340 = arith.truncf %338 : vector<17x8xf32> to vector<17x8xbf16>
    %341 = arith.truncf %339 : vector<8x32xf32> to vector<8x32xbf16>
    %cst_127 = arith.constant dense<0.000000e+00> : vector<17x32xf32>
    %342 = tpu.matmul %340, %341, %cst_127 {dimension_numbers = #tpu.dot_dimension_numbers<[1], [0], [0], [1], [0, 0, 1, 1], [], []>} : vector<17x8xbf16>, vector<8x32xbf16>, vector<17x32xf32> -> vector<17x32xf32>
    %343 = arith.addf %317, %342 : vector<17x32xf32>
    %344 = arith.addf %203, %343 : vector<17x32xf32>
    %c1_128 = arith.constant 1 : index
    %c0_129 = arith.constant 0 : index
    %c0_130 = arith.constant 0 : index
    %345 = vector.load %arg9[%c1_128, %c0_129, %c0_130] : memref<2x1x32xf32, #tpu.memory_space<vmem>>, vector<1x1x32xf32>
    %346 = vector.shape_cast %345 : vector<1x1x32xf32> to vector<1x32xf32>
    %347 = vector.broadcast %346 : vector<1x32xf32> to vector<17x32xf32>
    %348 = arith.addf %344, %347 : vector<17x32xf32>
    %c1_131 = arith.constant 1 : index
    %c0_132 = arith.constant 0 : index
    %c0_133 = arith.constant 0 : index
    %349 = vector.load %arg10[%c1_131, %c0_132, %c0_133] : memref<2x1x32xf32, #tpu.memory_space<vmem>>, vector<1x1x32xf32>
    %350 = vector.shape_cast %349 : vector<1x1x32xf32> to vector<1x32xf32>
    %c1_134 = arith.constant 1 : index
    %c0_135 = arith.constant 0 : index
    %c0_136 = arith.constant 0 : index
    %351 = vector.load %arg11[%c1_134, %c0_135, %c0_136] : memref<2x1x32xf32, #tpu.memory_space<vmem>>, vector<1x1x32xf32>
    %352 = vector.shape_cast %351 : vector<1x1x32xf32> to vector<1x32xf32>
    %cst_137 = arith.constant dense<0.000000e+00> : vector<17xf32>
    %353 = vector.multi_reduction <add>, %348, %cst_137 [1] : vector<17x32xf32> to vector<17xf32>
    %354 = vector.shape_cast %353 : vector<17xf32> to vector<17x1xf32>
    %cst_138 = arith.constant 3.200000e+01 : f32
    %355 = vector.broadcast %cst_138 : f32 to vector<17x1xf32>
    %356 = arith.divf %354, %355 : vector<17x1xf32>
    %357 = vector.broadcast %356 : vector<17x1xf32> to vector<17x32xf32>
    %358 = arith.subf %348, %357 : vector<17x32xf32>
    %359 = arith.mulf %358, %358 : vector<17x32xf32>
    %cst_139 = arith.constant dense<0.000000e+00> : vector<17xf32>
    %360 = vector.multi_reduction <add>, %359, %cst_139 [1] : vector<17x32xf32> to vector<17xf32>
    %361 = vector.shape_cast %360 : vector<17xf32> to vector<17x1xf32>
    %cst_140 = arith.constant 3.200000e+01 : f32
    %362 = vector.broadcast %cst_140 : f32 to vector<17x1xf32>
    %363 = arith.divf %361, %362 : vector<17x1xf32>
    %cst_141 = arith.constant 9.99999997E-7 : f32
    %364 = vector.broadcast %cst_141 : f32 to vector<17x1xf32>
    %365 = arith.addf %363, %364 : vector<17x1xf32>
    %366 = math.rsqrt %365 : vector<17x1xf32>
    %367 = vector.broadcast %366 : vector<17x1xf32> to vector<17x32xf32>
    %368 = arith.mulf %358, %367 : vector<17x32xf32>
    %369 = vector.broadcast %350 : vector<1x32xf32> to vector<17x32xf32>
    %370 = arith.mulf %368, %369 : vector<17x32xf32>
    %371 = vector.broadcast %352 : vector<1x32xf32> to vector<17x32xf32>
    %372 = arith.addf %370, %371 : vector<17x32xf32>
    %c1_142 = arith.constant 1 : index
    %c0_143 = arith.constant 0 : index
    %c0_144 = arith.constant 0 : index
    %373 = vector.load %arg12[%c1_142, %c0_143, %c0_144] : memref<2x32x64xf32, #tpu.memory_space<vmem>>, vector<1x32x64xf32>
    %374 = vector.shape_cast %373 : vector<1x32x64xf32> to vector<32x64xf32>
    %375 = arith.truncf %372 : vector<17x32xf32> to vector<17x32xbf16>
    %376 = arith.truncf %374 : vector<32x64xf32> to vector<32x64xbf16>
    %cst_145 = arith.constant dense<0.000000e+00> : vector<17x64xf32>
    %377 = tpu.matmul %375, %376, %cst_145 {dimension_numbers = #tpu.dot_dimension_numbers<[1], [0], [0], [1], [0, 0, 1, 1], [], []>} : vector<17x32xbf16>, vector<32x64xbf16>, vector<17x64xf32> -> vector<17x64xf32>
    %c1_146 = arith.constant 1 : index
    %c0_147 = arith.constant 0 : index
    %c0_148 = arith.constant 0 : index
    %378 = vector.load %arg13[%c1_146, %c0_147, %c0_148] : memref<2x1x64xf32, #tpu.memory_space<vmem>>, vector<1x1x64xf32>
    %379 = vector.shape_cast %378 : vector<1x1x64xf32> to vector<1x64xf32>
    %380 = vector.broadcast %379 : vector<1x64xf32> to vector<17x64xf32>
    %381 = arith.addf %377, %380 : vector<17x64xf32>
    %cst_149 = arith.constant 5.000000e-01 : f32
    %382 = vector.broadcast %cst_149 : f32 to vector<17x64xf32>
    %383 = arith.mulf %382, %381 : vector<17x64xf32>
    %cst_150 = arith.constant 0.707106769 : f32
    %384 = vector.broadcast %cst_150 : f32 to vector<17x64xf32>
    %385 = arith.mulf %381, %384 : vector<17x64xf32>
    %386 = math.erf %385 : vector<17x64xf32>
    %cst_151 = arith.constant 1.000000e+00 : f32
    %387 = vector.broadcast %cst_151 : f32 to vector<17x64xf32>
    %388 = arith.addf %387, %386 : vector<17x64xf32>
    %389 = arith.mulf %383, %388 : vector<17x64xf32>
    %c1_152 = arith.constant 1 : index
    %c0_153 = arith.constant 0 : index
    %c0_154 = arith.constant 0 : index
    %390 = vector.load %arg14[%c1_152, %c0_153, %c0_154] : memref<2x64x32xf32, #tpu.memory_space<vmem>>, vector<1x64x32xf32>
    %391 = vector.shape_cast %390 : vector<1x64x32xf32> to vector<64x32xf32>
    %392 = arith.truncf %389 : vector<17x64xf32> to vector<17x64xbf16>
    %393 = arith.truncf %391 : vector<64x32xf32> to vector<64x32xbf16>
    %cst_155 = arith.constant dense<0.000000e+00> : vector<17x32xf32>
    %394 = tpu.matmul %392, %393, %cst_155 {dimension_numbers = #tpu.dot_dimension_numbers<[1], [0], [0], [1], [0, 0, 1, 1], [], []>} : vector<17x64xbf16>, vector<64x32xbf16>, vector<17x32xf32> -> vector<17x32xf32>
    %395 = arith.addf %348, %394 : vector<17x32xf32>
    %c1_156 = arith.constant 1 : index
    %c0_157 = arith.constant 0 : index
    %c0_158 = arith.constant 0 : index
    %396 = vector.load %arg15[%c1_156, %c0_157, %c0_158] : memref<2x1x32xf32, #tpu.memory_space<vmem>>, vector<1x1x32xf32>
    %397 = vector.shape_cast %396 : vector<1x1x32xf32> to vector<1x32xf32>
    %398 = vector.broadcast %397 : vector<1x32xf32> to vector<17x32xf32>
    %399 = arith.addf %395, %398 : vector<17x32xf32>
    %c0_159 = arith.constant 0 : index
    %c0_160 = arith.constant 0 : index
    %400 = vector.load %arg16[%c0_159, %c0_160] : memref<1x32xf32, #tpu.memory_space<vmem>>, vector<1x32xf32>
    %c0_161 = arith.constant 0 : index
    %c0_162 = arith.constant 0 : index
    %401 = vector.load %arg17[%c0_161, %c0_162] : memref<1x32xf32, #tpu.memory_space<vmem>>, vector<1x32xf32>
    %cst_163 = arith.constant dense<0.000000e+00> : vector<17xf32>
    %402 = vector.multi_reduction <add>, %399, %cst_163 [1] : vector<17x32xf32> to vector<17xf32>
    %403 = vector.shape_cast %402 : vector<17xf32> to vector<17x1xf32>
    %cst_164 = arith.constant 3.200000e+01 : f32
    %404 = vector.broadcast %cst_164 : f32 to vector<17x1xf32>
    %405 = arith.divf %403, %404 : vector<17x1xf32>
    %406 = vector.broadcast %405 : vector<17x1xf32> to vector<17x32xf32>
    %407 = arith.subf %399, %406 : vector<17x32xf32>
    %408 = arith.mulf %407, %407 : vector<17x32xf32>
    %cst_165 = arith.constant dense<0.000000e+00> : vector<17xf32>
    %409 = vector.multi_reduction <add>, %408, %cst_165 [1] : vector<17x32xf32> to vector<17xf32>
    %410 = vector.shape_cast %409 : vector<17xf32> to vector<17x1xf32>
    %cst_166 = arith.constant 3.200000e+01 : f32
    %411 = vector.broadcast %cst_166 : f32 to vector<17x1xf32>
    %412 = arith.divf %410, %411 : vector<17x1xf32>
    %cst_167 = arith.constant 9.99999997E-7 : f32
    %413 = vector.broadcast %cst_167 : f32 to vector<17x1xf32>
    %414 = arith.addf %412, %413 : vector<17x1xf32>
    %415 = math.rsqrt %414 : vector<17x1xf32>
    %416 = vector.broadcast %415 : vector<17x1xf32> to vector<17x32xf32>
    %417 = arith.mulf %407, %416 : vector<17x32xf32>
    %418 = vector.broadcast %400 : vector<1x32xf32> to vector<17x32xf32>
    %419 = arith.mulf %417, %418 : vector<17x32xf32>
    %420 = vector.broadcast %401 : vector<1x32xf32> to vector<17x32xf32>
    %421 = arith.addf %419, %420 : vector<17x32xf32>
    %422 = vector.extract_strided_slice %421 {offsets = [0, 0], sizes = [1, 32], strides = [1, 1]} : vector<17x32xf32> to vector<1x32xf32>
    %c0_168 = arith.constant 0 : index
    %c0_169 = arith.constant 0 : index
    %423 = vector.load %arg18[%c0_168, %c0_169] : memref<32x10xf32, #tpu.memory_space<vmem>>, vector<32x10xf32>
    %424 = arith.truncf %422 : vector<1x32xf32> to vector<1x32xbf16>
    %425 = arith.truncf %423 : vector<32x10xf32> to vector<32x10xbf16>
    %cst_170 = arith.constant dense<0.000000e+00> : vector<1x10xf32>
    %426 = tpu.matmul %424, %425, %cst_170 {dimension_numbers = #tpu.dot_dimension_numbers<[1], [0], [0], [1], [0, 0, 1, 1], [], []>} : vector<1x32xbf16>, vector<32x10xbf16>, vector<1x10xf32> -> vector<1x10xf32>
    %c0_171 = arith.constant 0 : index
    %c0_172 = arith.constant 0 : index
    %427 = vector.load %arg19[%c0_171, %c0_172] : memref<1x10xf32, #tpu.memory_space<vmem>>, vector<1x10xf32>
    %428 = arith.addf %426, %427 : vector<1x10xf32>
    %429 = vector.shape_cast %428 : vector<1x10xf32> to vector<1x1x10xf32>
    %c0_173 = arith.constant 0 : index
    %c0_174 = arith.constant 0 : index
    %c0_175 = arith.constant 0 : index
    %430 = vector.load %arg20[%c0_173, %c0_174, %c0_175] : memref<1x1x10xf32, #tpu.memory_space<vmem>>, vector<1x1x10xf32>
    tpu.vector_store %arg20[%c0_173, %c0_174, %c0_175], %429 {strides = array<i32>} : memref<1x1x10xf32, #tpu.memory_space<vmem>>, vector<1x1x10xf32>,
    return
  }
  func.func @transform_0(%arg0: i32) -> (i32, i32, i32) {
    %c0_i32 = arith.constant 0 : i32
    %c0_i32_0 = arith.constant 0 : i32
    %c0_i32_1 = arith.constant 0 : i32
    return %arg0, %c0_i32, %c0_i32_0 : i32, i32, i32
  }
  func.func @transform_1(%arg0: i32) -> (i32, i32) {
    %c0_i32 = arith.constant 0 : i32
    %c0_i32_0 = arith.constant 0 : i32
    %c0_i32_1 = arith.constant 0 : i32
    return %c0_i32, %c0_i32_0 : i32, i32
  }
  func.func @transform_2(%arg0: i32) -> (i32, i32) {
    %c0_i32 = arith.constant 0 : i32
    %c0_i32_0 = arith.constant 0 : i32
    %c0_i32_1 = arith.constant 0 : i32
    return %c0_i32, %c0_i32_0 : i32, i32
  }
  func.func @transform_3(%arg0: i32) -> (i32, i32, i32) {
    %c0_i32 = arith.constant 0 : i32
    %c0_i32_0 = arith.constant 0 : i32
    %c0_i32_1 = arith.constant 0 : i32
    %c0_i32_2 = arith.constant 0 : i32
    return %c0_i32, %c0_i32_0, %c0_i32_1 : i32, i32, i32
  }
  func.func @transform_4(%arg0: i32) -> (i32, i32, i32) {
    %c0_i32 = arith.constant 0 : i32
    %c0_i32_0 = arith.constant 0 : i32
    %c0_i32_1 = arith.constant 0 : i32
    %c0_i32_2 = arith.constant 0 : i32
    return %c0_i32, %c0_i32_0, %c0_i32_1 : i32, i32, i32
  }
  func.func @transform_5(%arg0: i32) -> (i32, i32, i32) {
    %c0_i32 = arith.constant 0 : i32
    %c0_i32_0 = arith.constant 0 : i32
    %c0_i32_1 = arith.constant 0 : i32
    %c0_i32_2 = arith.constant 0 : i32
    return %c0_i32, %c0_i32_0, %c0_i32_1 : i32, i32, i32
  }
  func.func @transform_6(%arg0: i32) -> (i32, i32, i32) {
    %c0_i32 = arith.constant 0 : i32
    %c0_i32_0 = arith.constant 0 : i32
    %c0_i32_1 = arith.constant 0 : i32
    %c0_i32_2 = arith.constant 0 : i32
    return %c0_i32, %c0_i32_0, %c0_i32_1 : i32, i32, i32
  }
  func.func @transform_7(%arg0: i32) -> (i32, i32, i32) {
    %c0_i32 = arith.constant 0 : i32
    %c0_i32_0 = arith.constant 0 : i32
    %c0_i32_1 = arith.constant 0 : i32
    %c0_i32_2 = arith.constant 0 : i32
    return %c0_i32, %c0_i32_0, %c0_i32_1 : i32, i32, i32
  }
  func.func @transform_8(%arg0: i32) -> (i32, i32, i32) {
    %c0_i32 = arith.constant 0 : i32
    %c0_i32_0 = arith.constant 0 : i32
    %c0_i32_1 = arith.constant 0 : i32
    %c0_i32_2 = arith.constant 0 : i32
    return %c0_i32, %c0_i32_0, %c0_i32_1 : i32, i32, i32
  }
  func.func @transform_9(%arg0: i32) -> (i32, i32, i32) {
    %c0_i32 = arith.constant 0 : i32
    %c0_i32_0 = arith.constant 0 : i32
    %c0_i32_1 = arith.constant 0 : i32
    %c0_i32_2 = arith.constant 0 : i32
    return %c0_i32, %c0_i32_0, %c0_i32_1 : i32, i32, i32
  }
  func.func @transform_10(%arg0: i32) -> (i32, i32, i32) {
    %c0_i32 = arith.constant 0 : i32
    %c0_i32_0 = arith.constant 0 : i32
    %c0_i32_1 = arith.constant 0 : i32
    %c0_i32_2 = arith.constant 0 : i32
    return %c0_i32, %c0_i32_0, %c0_i32_1 : i32, i32, i32
  }
  func.func @transform_11(%arg0: i32) -> (i32, i32, i32) {
    %c0_i32 = arith.constant 0 : i32
    %c0_i32_0 = arith.constant 0 : i32
    %c0_i32_1 = arith.constant 0 : i32
    %c0_i32_2 = arith.constant 0 : i32
    return %c0_i32, %c0_i32_0, %c0_i32_1 : i32, i32, i32
  }
  func.func @transform_12(%arg0: i32) -> (i32, i32, i32) {
    %c0_i32 = arith.constant 0 : i32
    %c0_i32_0 = arith.constant 0 : i32
    %c0_i32_1 = arith.constant 0 : i32
    %c0_i32_2 = arith.constant 0 : i32
    return %c0_i32, %c0_i32_0, %c0_i32_1 : i32, i32, i32
  }
  func.func @transform_13(%arg0: i32) -> (i32, i32, i32) {
    %c0_i32 = arith.constant 0 : i32
    %c0_i32_0 = arith.constant 0 : i32
    %c0_i32_1 = arith.constant 0 : i32
    %c0_i32_2 = arith.constant 0 : i32
    return %c0_i32, %c0_i32_0, %c0_i32_1 : i32, i32, i32
  }
  func.func @transform_14(%arg0: i32) -> (i32, i32, i32) {
    %c0_i32 = arith.constant 0 : i32
    %c0_i32_0 = arith.constant 0 : i32
    %c0_i32_1 = arith.constant 0 : i32
    %c0_i32_2 = arith.constant 0 : i32
    return %c0_i32, %c0_i32_0, %c0_i32_1 : i32, i32, i32
  }
  func.func @transform_15(%arg0: i32) -> (i32, i32) {
    %c0_i32 = arith.constant 0 : i32
    %c0_i32_0 = arith.constant 0 : i32
    %c0_i32_1 = arith.constant 0 : i32
    return %c0_i32, %c0_i32_0 : i32, i32
  }
  func.func @transform_16(%arg0: i32) -> (i32, i32) {
    %c0_i32 = arith.constant 0 : i32
    %c0_i32_0 = arith.constant 0 : i32
    %c0_i32_1 = arith.constant 0 : i32
    return %c0_i32, %c0_i32_0 : i32, i32
  }
  func.func @transform_17(%arg0: i32) -> (i32, i32) {
    %c0_i32 = arith.constant 0 : i32
    %c0_i32_0 = arith.constant 0 : i32
    %c0_i32_1 = arith.constant 0 : i32
    return %c0_i32, %c0_i32_0 : i32, i32
  }
  func.func @transform_18(%arg0: i32) -> (i32, i32) {
    %c0_i32 = arith.constant 0 : i32
    %c0_i32_0 = arith.constant 0 : i32
    %c0_i32_1 = arith.constant 0 : i32
    return %c0_i32, %c0_i32_0 : i32, i32
  }
  func.func @transform_19(%arg0: i32) -> (i32, i32, i32) {
    %c0_i32 = arith.constant 0 : i32
    %c0_i32_0 = arith.constant 0 : i32
    %c0_i32_1 = arith.constant 0 : i32
    return %arg0, %c0_i32, %c0_i32_0 : i32, i32, i32
  }
}

</mosaic_0001>

<bundles_post_ra>
// kernel: vit_forward.1
= control target key start
LH: loop header
LB: loop body
LE: loop exit
PB: predicated region body
PF: predicated region fallthrough
CT: control target
= control target key end

     0   :  { %s4184_s0 = inlined_call_operand.vmem [shape: f32[2,17,192], index: 0, kind: input, shape index: {}]   ;;  %s4185_s1 = inlined_call_operand.vmem [shape: f32[192,32], index: 1, kind: input, shape index: {}]   ;;  %s4186_s2 = inlined_call_operand.vmem [shape: f32[17,32], index: 2, kind: input, shape index: {}]   ;;  %s4187_s3 = inlined_call_operand.vmem [shape: f32[2,1,32], index: 3, kind: input, shape index: {}]   ;;  %s4188_s4 = inlined_call_operand.vmem [shape: f32[2,1,32], index: 4, kind: input, shape index: {}]   ;;  %s4189_s5 = inlined_call_operand.vmem [shape: f32[2,32,96], index: 5, kind: input, shape index: {}]   ;;  %s4190_s6 = inlined_call_operand.vmem [shape: f32[2,1,96], index: 6, kind: input, shape index: {}]   ;;  %s4191_s7 = inlined_call_operand.vmem [shape: f32[2,32,32], index: 7, kind: input, shape index: {}]   ;;  %s4192_s8 = inlined_call_operand.vmem [shape: f32[2,1,32], index: 8, kind: input, shape index: {}]   ;;  %s4193_s9 = inlined_call_operand.vmem [shape: f32[2,1,32], index: 9, kind: input, shape index: {}]   ;;  %s4194_s10 = inlined_call_operand.vmem [shape: f32[2,1,32], index: 10, kind: input, shape index: {}]   ;;  %s4195_s11 = inlined_call_operand.vmem [shape: f32[2,32,64], index: 11, kind: input, shape index: {}]   ;;  %s4196_s12 = inlined_call_operand.vmem [shape: f32[2,1,64], index: 12, kind: input, shape index: {}]   ;;  %s4197_s13 = inlined_call_operand.vmem [shape: f32[2,64,32], index: 13, kind: input, shape index: {}]   ;;  %s4198_s14 = inlined_call_operand.vmem [shape: f32[2,1,32], index: 14, kind: input, shape index: {}]   ;;  %s4199_s15 = inlined_call_operand.vmem [shape: f32[1,32], index: 15, kind: input, shape index: {}]   ;;  %s4200_s16 = inlined_call_operand.vmem [shape: f32[1,32], index: 16, kind: input, shape index: {}]   ;;  %s4201_s17 = inlined_call_operand.vmem [shape: f32[32,10], index: 17, kind: input, shape index: {}]   ;;  %s4202_s18 = inlined_call_operand.vmem [shape: f32[1,10], index: 18, kind: input, shape index: {}]   ;;  %s4203_s19 = inlined_call_operand.hbm [shape: f32[2,1,10], index: 19, kind: output, shape index: {}]  }
   0x1   :  { %4231 = sst [smem:[#allocation12_spill]] %s4184_s0 }
   0x2   :  { %4232 = sst [smem:[#allocation13_spill]] %s4185_s1 }
   0x3   :  { %4233 = sst [smem:[#allocation14_spill]] %s4186_s2 }
   0x4   :  { %4234 = sst [smem:[#allocation15_spill]] %s4187_s3 }
   0x5   :  { %4235 = sst [smem:[#allocation16_spill]] %s4188_s4 }
   0x6   :  { %4236 = sst [smem:[#allocation17_spill]] %s4189_s5 }
   0x7   :  { %4237 = sst [smem:[#allocation18_spill]] %s4190_s6 }
   0x8   :  { %4238 = sst [smem:[#allocation19_spill]] %s4202_s18 }
   0x9   :  { %24 = vsyncpa [#allocation3], 0 }
   0xa   :  { %26 = vsyncpa [#allocation3 + $0x1], 0  ;;  %s3287_s0 = smov 0   ;;  %s3289_s30 = smov 0  }
   0xb   :  { %s3291_s20 = smov 0   ;;  %s3293_s21 = smov 0  }
   0xc LB: > { %4239 = sst [smem:[#allocation5_spill]] %s3160_s0  ;;  %s3308_s1 = sadd.s32 4294967295, %s3172_s21   ;;  %s3172_s21 = sphi %s3293_s21, %s4269_s21   ;;  %s3168_s20 = sphi %s3291_s20, %s4271_s20   ;;  %s3164_s30 = sphi %s3289_s30, %s4273_s30   ;;  %s3160_s0 = sphi %s3287_s0, %s4272_s0  }
   0xd   : > { %4240 = sst [smem:[#allocation6_spill]] %s3168_s20  ;;  %s2799_s22 = sadd.s32 4294967294, %s3172_s21  }
   0xe   : > { %4241 = sst [smem:[#allocation7_spill]] %s3172_s21  ;;  %s3312_s2 = sadd.s32 1, %s3172_s21  }
   0xf   : > { %4242 = sst [smem:[#allocation8_spill]] %s3312_s2  ;;  %s443_s23 = sadd.s32 1, %s3168_s20 }
  0x10   : > { %s440_s24 = ssub.s32 %s3172_s21, %s3312_s2  ;;  %p453_p0 = scmp.ne.s32.totalorder %s3168_s20, %s3164_s30 }
  0x11   : > { %p441_p1 = scmp.eq.s32.totalorder %s440_s24, 0  ;;  %p454_p2 = scmp.eq.s32.totalorder %s3308_s1, 1 }
  0x12   : > { %p459_p3 = scmp.ne.s32.totalorder %s3164_s30, %s3160_s0  ;;  %p460_p4 = scmp.eq.s32.totalorder %s2799_s22, 1 }
  0x13   : > { %s3323_s25 = scalar_select %p441_p1, %s3168_s20, %s443_s23  }
  0x14   : > { %p3325_p5 = por %p454_p2, %p453_p0  ;;  %p3329_p6 = por %p460_p4, %p459_p3 }
  0x15   : > { %4243 = sst [smem:[#allocation9_spill]] %s3323_s25  ;;  %p2802_p7 = scmp.ge.s32.totalorder %s3172_s21, 1 }
  0x16   : > { %s4244_s3 = scalar_select %p3325_p5, 1, 0 }
  0x17   : > { %s4246_s26 = scalar_select %p3329_p6, 1, 0 }
  0x18   : > { %4245 = sst [smem:[#allocation10_spill]] %s4244_s3  ;;  %p540_p8 = scmp.lt.s32.totalorder %s3172_s21, 3 }
  0x19   : > { %4247 = sst [smem:[#allocation11_spill]] %s4246_s26 }
  0x1a   : > { %p541_p9 = pnand %p2802_p7, %p540_p8 }
  0x1b   : > { %s4248_s29 = sld [smem:[#allocation13_spill]] (!%p541_p9)  ;;  %p595_p10 = scmp.lt.s32.totalorder (!%p541_p9), %s3308_s1, 1 }
  0x1c   : > { %544 = sbr.rel (%p541_p9) target bundleno = 5430 (0x1536), region = 96  ;;  %s4249_s26 = sld [smem:[#allocation12_spill]] (!%p541_p9) }
  0x1d   : > { %s4250_s0 = sld [smem:[#allocation14_spill]] (!%p541_p9)  ;;  %s3175_s20 = smov (!%p541_p9), 96  }
  0x1e   : > { %s4252_s5 = sld [smem:[#allocation17_spill]] (!%p541_p9)  ;;  %s3176_s2 = smov (!%p541_p9), 64  }
  0x1f   : > { %s4253_s28 = sld [smem:[#allocation15_spill]] (!%p541_p9)  ;;  %s4229_s3 = smov (!%p541_p9), 120  }
  0x20   : > { %s4254_s4 = sld [smem:[#allocation16_spill]] (!%p541_p9)  ;;  %s4225_s25 = smov (!%p541_p9), 80  }
  0x21   : > { %v621_v0 = vld [vmem:[%s4248_s29 + $0x70] sm:$0xff]  ;;  %v622_v1 = vld [vmem:[%s4248_s29 + $0x78] sm:$0xff]  ;;  %v619_v2 = vld [vmem:[%s4248_s29 + $0x60] sm:$0xff]  ;;  %s596_s22 = scalar_select %p595_p10, %s3308_s1, 1  ;;  %vm650_vm0 = vcmask 523264   ;;  %vm695_vm1 = vcmask 261120  }
  0x22   : > { %v642_v3 = vpack.c.bf16 %v622_v1, %v621_v0  ;;  %v620_v4 = vld [vmem:[%s4248_s29 + $0x68] sm:$0xff]  ;;  %v629_v5 = vld [vmem:[%s4248_s29 + $0xb0] sm:$0xff]  ;;  %v630_v6 = vld [vmem:[%s4248_s29 + $0xb8] sm:$0xff]  ;;  %vm702_vm2 = vcmask 253952   ;;  %s4255_s6 = sld [smem:[#allocation18_spill]]  ;;  %vm914_vm13 = vcmask 1040384  }
  0x23   : > { %v641_v7 = vpack.c.bf16 %v620_v4, %v619_v2  ;;  %v646_v8 = vpack.c.bf16 %v630_v6, %v629_v5  ;;  %v627_v9 = vld [vmem:[%s4248_s29 + $0xa0] sm:$0xff]  ;;  %v628_v10 = vld [vmem:[%s4248_s29 + $0xa8] sm:$0xff]  ;;  %v617_v11 = vld [vmem:[%s4248_s29 + $0x50] sm:$0xff]  ;;  %s2903_s27 = smul.u32 48, %s596_s22  ;;  %v3174_v2 = vmov 32.0   ;;  %vm835_vm14 = vcmask 64512  }
  0x24   : > { %657 = vmatpush.bf16.msra.mxu0 %v642_v3  ;;  %v618_v12 = vld [vmem:[%s4248_s29 + $0x58] sm:$0xff]  ;;  %v645_v13 = vpack.c.bf16 %v628_v10, %v627_v9  ;;  %v625_v14 = vld [vmem:[%s4248_s29 + $0x90] sm:$0xff]  ;;  %v615_v17 = vld [vmem:[%s4248_s29 + $0x40] sm:$0xff]  ;;  %2974 = vrcp.f32 %v3174_v2  ;;  %vm866_vm15 = vcmask 138240   ;;  %s4227_s22 = smov 72   ;;  %s4219_s24 = smov 56  }
  0x25   : > { %679 = vmatpush.bf16.msra.mxu1 %v646_v8  ;;  %v626_v15 = vld [vmem:[%s4248_s29 + $0x98] sm:$0xff]  ;;  %v640_v16 = vpack.c.bf16 %v618_v12, %v617_v11  ;;  %v616_v18 = vld [vmem:[%s4248_s29 + $0x48] sm:$0xff]  ;;  %s3382_s18 = scalar_lea.vmem %s4249_s26, %s2903_s27  ;;  %v623_v20 = vld [vmem:[%s4248_s29 + $0x80] sm:$0xff]  ;;  %s4251_s26 = smov %s4250_s0 }
  0x26   : > { %v644_v19 = vpack.c.bf16 %v626_v15, %v625_v14  ;;  %v624_v21 = vld [vmem:[%s4248_s29 + $0x88] sm:$0xff]  ;;  %v613_v22 = vld [vmem:[%s4248_s29 + $0x30] sm:$0xff]  ;;  %v614_v23 = vld [vmem:[%s4248_s29 + $0x38] sm:$0xff]  ;;  %v639_v24 = vpack.c.bf16 %v616_v18, %v615_v17  ;;  %s3178_s27 = smov 88   ;;  %s4217_s23 = smov 48  }
  0x27   : > { %v602_v25 = vld [vmem:[%s3382_s18 + $0x8] sm:$0xff]  ;;  %v604_v26 = vld [vmem:[%s3382_s18 + $0x18] sm:$0xff]  ;;  %v643_v27 = vpack.c.bf16 %v624_v21, %v623_v20  ;;  %v638_v28 = vpack.c.bf16 %v614_v23, %v613_v22  ;;  %v611_v29 = vld [vmem:[%s4248_s29 + $0x20] sm:$0xff]  ;;  %s4215_s21 = smov 40  }
  0x28   : > { %658 = vmatpush.bf16.msra.mxu0 %v641_v7  ;;  %v612_v30 = vld [vmem:[%s4248_s29 + $0x28] sm:$0xff]  ;;  %v632_v31 = vpack.c.bf16 %v604_v26, %v602_v25  ;;  %v609_v33 = vld [vmem:[%s4248_s29 + $0x10] sm:$0xff]  ;;  %v610_v34 = vld [vmem:[%s4248_s29 + $0x18] sm:$0xff] }
  0x29   : > { %680 = vmatpush.bf16.msra.mxu1 %v645_v13  ;;  %v637_v32 = vpack.c.bf16 %v612_v30, %v611_v29  ;;  %v636_v35 = vpack.c.bf16 %v610_v34, %v609_v33  ;;  %v607_v36 = vld [vmem:[%s4248_s29] sm:$0xff]  ;;  %v608_v37 = vld [vmem:[%s4248_s29 + $0x8] sm:$0xff]  ;;  %v603_v40 = vld [vmem:[%s3382_s18 + $0x10] sm:$0xff] }
  0x2a   : > { %v635_v38 = vpack.c.bf16 %v608_v37, %v607_v36  ;;  %v601_v39 = vld [vmem:[%s3382_s18] sm:$0xff]  ;;  %v606_v41 = vld [vmem:[%s3382_s18 + $0x28] sm:$0x1]  ;;  %v649_v60 = vld [vmem:[%s4251_s26 + $0x10] sm:$0x1]  ;;  %v2975_v3 = vpop.eup %2974 }
  0x2b   : > { %v631_v42 = vpack.c.bf16 %v603_v40, %v601_v39  ;;  %v634_v43 = vpack.c.bf16 %v606_v41, %v606_v41  ;;  %v605_v44 = vld [vmem:[%s3382_s18 + $0x20] sm:$0x1]  ;;  %v648_v54 = vld [vmem:[%s4251_s26 + $0x8] sm:$0xff]  ;;  %v707_v4 = vmul.f32 32.0, %v2975_v3  ;;  %vm711_vm3 = vweird.f32 %v2975_v3  ;;  %v785_v25 = vld [vmem:[%s4252_s5 + $0x18] sm:$0xff]  ;;  %s4223_s18 = smov 112  }
  0x2c   : > { %659 = vmatpush.bf16.msra.mxu0 %v640_v16  ;;  %v633_v45 = vpack.c.bf16 %v605_v44, %v605_v44  ;;  %v647_v48 = vld [vmem:[%s4250_s0] sm:$0xff]  ;;  %v783_v30 = vld [vmem:[%s4252_s5 + $0x8] sm:$0xff]  ;;  %s4221_s0 = smov 104  }
  0x2d   : > { %681 = vmatpush.bf16.msra.mxu1 %v644_v19  ;;  %v708_v5 = vsub.f32 1.0, %v707_v4  ;;  %v782_v29 = vld [vmem:[%s4252_s5] sm:$0xff] }
  0x2f   : > { %v709_v6 = vmul.f32 %v2975_v3, %v708_v5 }
  0x30   : > { %660 = vmatpush.bf16.msra.mxu0 %v639_v24  ;;  %v784_v24 = vld [vmem:[%s4252_s5 + $0x10] sm:$0xff] }
  0x31   : > { %682 = vmatpush.bf16.msra.mxu1 %v643_v27  ;;  %v710_v7 = vadd.f32 %v2975_v3, %v709_v6  ;;  %v789_v26 = vpack.c.bf16 %v785_v25, %v784_v24 }
  0x33   : > { %v3443_v8 = vsel %vm711_vm3, %v2975_v3, %v710_v7  ;;  %806 = vmatpush.bf16.msra.mxu2 %v789_v26  ;;  %vm873_vm3 = vcmask 131072  }
  0x34   : > { %661 = vmatpush.bf16.msra.mxu0 %v638_v28  ;;  %2804 = vmatmul.msk.bf16.vlgmr.msra.gmra.mxu1 %vm650_vm0, %v632_v31  ;;  %v788_v31 = vpack.c.bf16 %v783_v30, %v782_v29 }
  0x37   : > { %807 = vmatpush.bf16.msra.mxu2 %v788_v31 }
  0x38   : > { %662 = vmatpush.bf16.msra.mxu0 %v637_v32 }
  0x3c   : > { %663 = vmatpush.bf16.msra.mxu0 %v636_v35 }
  0x40   : > { %664 = vmatpush.bf16.msra.mxu0 %v635_v38 }
  0x43   : > { %665 = vmatmul.bf16.vlgmr.msra.gmra.mxu0 %v631_v42 }
  0x44   : > { %2805 = vmatmul.msk.bf16.gmra.mxu1 %vm650_vm0, %v634_v43 }
  0x53   : > { %670 = vmatmul.bf16.gmra.mxu0 %v633_v45 }
  0xb1   : > { %v684_v46 = vpop.f32.mrf.mxu1 }
  0xb9   : > { %v686_v47 = vpop.f32.mrf.mxu1 }
  0xc0   : > { %v666_v49 = vpop.f32.mrf.mxu0 }
  0xc1   : > { %v667_v50 = vadd.f32 %v666_v49, %v647_v48  ;;  %v689_v51 = vpop.f32.mrf.mxu1 }
  0xc3   : > { %v3425_v52 = vadd.f32 %v684_v46, %v667_v50 }
  0xc5   : > { %v696_v53 = vsel %vm695_vm1, %v3425_v52, 0.0 }
  0xc6   : > { %697 = vadd.xlane.f32.xlu0 %v696_v53 }
  0xc8   : > { %v668_v55 = vpop.f32.mrf.mxu0 }
  0xc9   : > { %v669_v56 = vadd.f32 %v668_v55, %v648_v54  ;;  %v691_v57 = vpop.f32.mrf.mxu1  ;;  %v2956_v54 = vld [vmem:[%s4253_s28] ss:$0 sm:$0xff] }
  0xcb   : > { %v3432_v58 = vadd.f32 %v686_v47, %v669_v56 }
  0xcd   : > { %v699_v59 = vsel %vm695_vm1, %v3432_v58, 0.0 }
  0xce   : > { %700 = vadd.xlane.f32.xlu0 %v699_v59 }
  0xd0   : > { %v671_v61 = vpop.f32.mrf.mxu0 }
  0xd1   : > { %v672_v62 = vadd.f32 %v671_v61, %v649_v60 }
  0xd3   : > { %v3439_v63 = vadd.f32 %v689_v51, %v672_v62  ;;  %v2957_v62 = vld [vmem:[%s4254_s4] ss:$0 sm:$0xff] }
  0xd5   : > { %v703_v0 = vsel %vm702_vm2, %v3439_v63, 0.0 }
  0xd6   : > { %704 = vadd.xlane.f32.xlu1 %v703_v0 }
  0xd8   : > { %v673_v1 = vpop.f32.mrf.mxu0 }
 0x139   : > { %v698_v9 = vpop.xlane.xlu0 %697 }
 0x13a   : > { %v713_v10 = vmul.f32 %v3443_v8, %v698_v9 }
 0x13c   : > { %v716_v11 = vsub.f32 %v3425_v52, %v713_v10 }
 0x13e   : > { %v719_v12 = vmul.f32 %v716_v11, %v716_v11 }
 0x140   : > { %v722_v13 = vsel %vm695_vm1, %v719_v12, 0.0 }
 0x141   : > { %723 = vadd.xlane.f32.xlu1 %v722_v13  ;;  %v701_v14 = vpop.xlane.xlu0 %700 }
 0x142   : > { %v714_v15 = vmul.f32 %v3443_v8, %v701_v14  ;;  %v2958_v14 = vld [vmem:[%s4255_s6] ss:$0 sm:$0xff] }
 0x144   : > { %v717_v16 = vsub.f32 %v3432_v58, %v714_v15 }
 0x146   : > { %v720_v17 = vmul.f32 %v717_v16, %v717_v16 }
 0x148   : > { %v725_v18 = vsel %vm695_vm1, %v720_v17, 0.0 }
 0x149   : > { %v705_v19 = vpop.xlane.xlu1 %704  ;;  %726 = vadd.xlane.f32.xlu2 %v725_v18 }
 0x14a   : > { %v715_v20 = vmul.f32 %v3443_v8, %v705_v19 }
 0x14c   : > { %v3453_v21 = vsub.f32 %v3439_v63, %v715_v20 }
 0x14e   : > { %v721_v22 = vmul.f32 %v3453_v21, %v3453_v21 }
 0x150   : > { %v728_v23 = vsel %vm702_vm2, %v721_v22, 0.0 }
 0x151   : > { %729 = vadd.xlane.f32.xlu2 %v728_v23 }
 0x1b4   : > { %v724_v27 = vpop.xlane.xlu1 %723 }
 0x1b5   : > { %v731_v28 = vmul.f32 %v724_v27, %v3443_v8  ;;  %v3177_v27 = vmov 0  }
 0x1b7   : > { %v734_v32 = vadd.f32 1e-06, %v731_v28  ;;  %v3497_v28 = vsel %vm914_vm13, 65535, %v3177_v27 }
 0x1b9   : > { %2976 = vrsqrt.f32 %v734_v32  ;;  %vm743_vm5 = vweird.f32 %v734_v32 }
 0x1bc   : > { %v727_v33 = vpop.xlane.xlu2 %726 }
 0x1bd   : > { %v732_v34 = vmul.f32 %v727_v33, %v3443_v8 }
 0x1bf   : > { %v2977_v35 = vpop.eup %2976  ;;  %v735_v36 = vadd.f32 1e-06, %v732_v34 }
 0x1c0   : > { %v738_v37 = vmul.f32 %v2977_v35, %v734_v32  ;;  %vm744_vm4 = vweird.f32 %v2977_v35 }
 0x1c1   : > { %2978 = vrsqrt.f32 %v735_v36  ;;  %vm745_vm6 = vmor %vm743_vm5, %vm744_vm4  ;;  %vm753_vm8 = vweird.f32 %v735_v36  ;;  %vm1057_vm4 = vcmask 1043456  }
 0x1c2   : > { %v739_v38 = vmul.f32 %v2977_v35, %v738_v37 }
 0x1c4   : > { %v740_v39 = vmul.f32 0.5, %v739_v38  ;;  %v730_v40 = vpop.xlane.xlu2 %729 }
 0x1c5   : > { %v733_v41 = vmul.f32 %v730_v40, %v3443_v8 }
 0x1c6   : > { %v741_v42 = vsub.f32 1.5, %v740_v39 }
 0x1c7   : > { %v2979_v43 = vpop.eup %2978  ;;  %v736_v44 = vadd.f32 1e-06, %v733_v41 }
 0x1c8   : > { %v742_v45 = vmul.f32 %v2977_v35, %v741_v42  ;;  %v748_v46 = vmul.f32 %v2979_v43, %v735_v36  ;;  %vm754_vm7 = vweird.f32 %v2979_v43 }
 0x1c9   : > { %2980 = vrsqrt.f32 %v736_v44  ;;  %vm755_vm9 = vmor %vm753_vm8, %vm754_vm7  ;;  %vm763_vm11 = vweird.f32 %v736_v44 }
 0x1ca   : > { %v749_v47 = vmul.f32 %v2979_v43, %v748_v46  ;;  %v746_v48 = vsel %vm745_vm6, %v2977_v35, %v742_v45 }
 0x1cb   : > { %v767_v53 = vmul.f32 %v746_v48, %v716_v11 }
 0x1cc   : > { %v750_v49 = vmul.f32 0.5, %v749_v47 }
 0x1cd   : > { %v773_v61 = vmul.f32 %v2956_v54, %v767_v53 }
 0x1ce   : > { %v751_v50 = vsub.f32 1.5, %v750_v49 }
 0x1cf   : > { %v2981_v51 = vpop.eup %2980  ;;  %v779_v3 = vadd.f32 %v2957_v62, %v773_v61 }
 0x1d0   : > { %v752_v55 = vmul.f32 %v2979_v43, %v751_v50  ;;  %v758_v56 = vmul.f32 %v2981_v51, %v736_v44  ;;  %vm764_vm10 = vweird.f32 %v2981_v51 }
 0x1d1   : > { %vm765_vm12 = vmor %vm763_vm11, %vm764_vm10 }
 0x1d2   : > { %v756_v57 = vsel %vm755_vm9, %v2979_v43, %v752_v55  ;;  %v759_v59 = vmul.f32 %v2981_v51, %v758_v56 }
 0x1d3   : > { %v768_v60 = vmul.f32 %v756_v57, %v717_v16 }
 0x1d4   : > { %v760_v0 = vmul.f32 0.5, %v759_v59 }
 0x1d5   : > { %v774_v1 = vmul.f32 %v2956_v54, %v768_v60 }
 0x1d6   : > { %v761_v2 = vsub.f32 1.5, %v760_v0 }
 0x1d7   : > { %v780_v4 = vadd.f32 %v2957_v62, %v774_v1 }
 0x1d8   : > { %v762_v5 = vmul.f32 %v2981_v51, %v761_v2 }
 0x1d9   : > { %v786_v6 = vpack.c.bf16 %v780_v4, %v779_v3 }
 0x1da   : > { %v766_v7 = vsel %vm765_vm12, %v2981_v51, %v762_v5 }
 0x1db   : > { %2806 = vmatmul.msk.bf16.vlgmr.msra.gmra.mxu2 %vm695_vm1, %v786_v6  ;;  %v769_v9 = vmul.f32 %v766_v7, %v3453_v21 }
 0x1dd   : > { %v775_v10 = vmul.f32 %v2956_v54, %v769_v9 }
 0x1df   : > { %v781_v11 = vadd.f32 %v2957_v62, %v775_v10  ;;  %v818_v62 = vld [vmem:[%s4191_s7] sm:$0xff] }
 0x1e0   : > { %v940_v0 = vpack.c.bf16 %v818_v62, %v818_v62 }
 0x1e1   : > { %v787_v12 = vpack.c.bf16 %v781_v11, %v781_v11 }
 0x1e2   : > { %v1086_v3 = vsel %vm1057_vm4, %v940_v0, 0 }
 0x1eb   : > { %2807 = vmatmul.msk.bf16.gmra.mxu2 %vm695_vm1, %v787_v12 }
 0x25e   : > { %v809_v13 = vpop.f32.mrf.mxu2 }
 0x25f   : > { %v810_v15 = vadd.f32 %v2958_v14, %v809_v13 }
 0x261   : > { %v822_v18 = vmul.f32 0.35355338, %v810_v15 }
 0x266   : > { %v811_v16 = vpop.f32.mrf.mxu2 }
 0x267   : > { %v812_v17 = vadd.f32 %v2958_v14, %v811_v16 }
 0x269   : > { %v823_v19 = vmul.f32 0.35355338, %v812_v17  ;;  %v3485_v20 = vpack.c.bf16 %v812_v17, %v810_v15 }
 0x26b   : > { %v3487_v22 = vpack.c.bf16 %v823_v19, %v822_v18  ;;  %831 = vrot.lane.b32.xlu1 %v3485_v20, %s3175_s20 }
 0x26e   : > { %v814_v21 = vpop.f32.mrf.mxu2 }
 0x26f   : > { %v815_v23 = vadd.f32 %v2958_v14, %v814_v21 }
 0x271   : > { %v3491_v24 = vpack.c.bf16 %v815_v23, %v815_v23  ;;  %v824_v34 = vmul.f32 0.35355338, %v815_v23 }
 0x273   : > { %905 = vrot.lane.b32.xlu1 %v3491_v24, %s3176_s2  ;;  %833 = vrot.lane.b32.xlu0 %v3491_v24, %s3175_s20  ;;  %v826_v35 = vpack.c.bf16 %v824_v34, %v824_v34 }
 0x276   : > { %v816_v25 = vpop.f32.mrf.mxu2 }
 0x2dd   : > { %v832_v26 = vpop.permute.xlu1 %831 }
 0x2de   : > { %v843_v33 = vsel %vm835_vm14, %v832_v26, 0 }
 0x2e5   : > { %v906_v29 = vpop.permute.xlu1 %905  ;;  %v834_v30 = vpop.permute.xlu0 %833 }
 0x2e6   : > { %v918_v31 = vand.u32 %v3497_v28, %v906_v29  ;;  %v846_v32 = vsel %vm835_vm14, %v834_v30, 0 }
 0x2e7   : > { %854 = vmatpush.bf16.xpose.msra.mxu3 %v846_v32 }
 0x2e8   : > { %926 = vmatpush.bf16.msrb.mxu2 %v918_v31 }
 0x2ef   : > { %855 = vmatpush.bf16.xpose.msra.mxu3 %v843_v33 }
 0x2f6   : > { %2808 = vmatmul.msk.bf16.vlgmr.msra.gmra.mxu3 %vm835_vm14, %v3487_v22 }
 0x306   : > { %2809 = vmatmul.msk.bf16.gmra.mxu3 %vm835_vm14, %v826_v35 }
 0x379   : > { %v857_v36 = vpop.f32.mrf.mxu3 }
 0x37a   : > { %v867_v37 = vsel %vm866_vm15, %v857_v36, -inf }
 0x37b   : > { %868 = vmax.xlane.f32.xlu2 %v867_v37 }
 0x381   : > { %v859_v38 = vpop.f32.mrf.mxu3 }
 0x382   : > { %v870_v39 = vsel %vm866_vm15, %v859_v38, -inf }
 0x383   : > { %871 = vmax.xlane.f32.xlu2 %v870_v39 }
 0x389   : > { %v862_v40 = vpop.f32.mrf.mxu3 }
 0x38a   : > { %v874_v41 = vsel %vm873_vm3, %v862_v40, -inf }
 0x38b   : > { %875 = vmax.xlane.f32.xlu2 %v874_v41 }
 0x391   : > { %v864_v42 = vpop.f32.mrf.mxu3 }
 0x3ee   : > { %v869_v43 = vpop.xlane.xlu2 %868 }
 0x3ef   : > { %v877_v44 = vsub.f32 %v857_v36, %v869_v43 }
 0x3f1   : > { %v880_v45 = vmul.f32 1.442695, %v877_v44 }
 0x3f3   : > { %2982 = vpow2.f32 %v880_v45 }
 0x3f6   : > { %v872_v46 = vpop.xlane.xlu2 %871 }
 0x3f7   : > { %v878_v47 = vsub.f32 %v859_v38, %v872_v46 }
 0x3f9   : > { %v2983_v48 = vpop.eup %2982  ;;  %v882_v49 = vmul.f32 1.442695, %v878_v47 }
 0x3fa   : > { %v886_v50 = vsel %vm866_vm15, %v2983_v48, 0.0 }
 0x3fb   : > { %2984 = vpow2.f32 %v882_v49  ;;  %887 = vadd.xlane.f32.xlu0 %v886_v50 }
 0x3fe   : > { %v876_v51 = vpop.xlane.xlu2 %875 }
 0x3ff   : > { %v879_v53 = vsub.f32 %v862_v40, %v876_v51 }
 0x401   : > { %v2985_v54 = vpop.eup %2984  ;;  %v884_v55 = vmul.f32 1.442695, %v879_v53 }
 0x402   : > { %v889_v56 = vsel %vm866_vm15, %v2985_v54, 0.0 }
 0x403   : > { %2986 = vpow2.f32 %v884_v55  ;;  %890 = vadd.xlane.f32.xlu2 %v889_v56 }
 0x409   : > { %v2987_v57 = vpop.eup %2986 }
 0x40a   : > { %v892_v59 = vsel %vm873_vm3, %v2987_v57, 0.0 }
 0x40b   : > { %893 = vadd.xlane.f32.xlu1 %v892_v59 }
 0x40f   : > { %947 = vrot.lane.b32.xlu0 %v3485_v20, %s3178_s27 }
 0x417   : > { %1248 = vrot.lane.b32.xlu0 %v3485_v20, %s4227_s22 }
 0x41b   : > { %903 = vrot.lane.b32.xlu2 %v3485_v20, %s3176_s2 }
 0x41f   : > { %1244 = vrot.lane.b32.xlu0 %v3487_v22, %s4221_s0 }
 0x423   : > { %949 = vrot.lane.b32.xlu2 %v3491_v24, %s3178_s27 }
 0x424   : > { %945 = vrot.lane.b32.xlu1 %v826_v35, %s4229_s3 }
 0x427   : > { %1246 = vrot.lane.b32.xlu0 %v826_v35, %s4221_s0 }
 0x42b   : > { %943 = vrot.lane.b32.xlu2 %v3487_v22, %s4229_s3  ;;  %s4261_s3 = smov 56  }
 0x42c   : > { %1108 = vrot.lane.b32.xlu1 %v826_v35, %s4223_s18 }
 0x433   : > { %1250 = vrot.lane.b32.xlu2 %v3491_v24, %s4227_s22 }
 0x43b   : > { %1112 = vrot.lane.b32.xlu2 %v3491_v24, %s4225_s25 }
 0x443   : > { %1110 = vrot.lane.b32.xlu2 %v3485_v20, %s4225_s25  ;;  %s4263_s25 = smov 40  }
 0x44b   : > { %1106 = vrot.lane.b32.xlu2 %v3487_v22, %s4223_s18  ;;  %s4262_s18 = smov 48  }
 0x46e   : > { %v888_v60 = vpop.xlane.xlu0 %887 }
 0x46f   : > { %2988 = vrcp.f32 %v888_v60 }
 0x475   : > { %v2989_v1 = vpop.eup %2988 }
 0x476   : > { %v891_v61 = vpop.xlane.xlu2 %890  ;;  %v898_v4 = vmul.f32 %v2989_v1, %v2983_v48 }
 0x477   : > { %2990 = vrcp.f32 %v891_v61 }
 0x47d   : > { %v2991_v2 = vpop.eup %2990 }
 0x47e   : > { %v899_v5 = vmul.f32 %v2991_v2, %v2985_v54  ;;  %v904_v6 = vpop.permute.xlu2 %903  ;;  %v894_v7 = vpop.xlane.xlu1 %893 }
 0x47f   : > { %927 = vmatpush.bf16.msrb.mxu2 %v904_v6  ;;  %2992 = vrcp.f32 %v894_v7 }
 0x480   : > { %v901_v9 = vpack.c.bf16 %v899_v5, %v898_v4 }
 0x481   : > { %v948_v13 = vpop.permute.xlu0 %947 }
 0x482   : > { %2810 = vmatmul.msk.bf16.vlgmr.msrb.gmra.mxu2 %vm866_vm15, %v901_v9  ;;  %v958_v16 = vsel %vm835_vm14, %v948_v13, 0 }
 0x483   : > { %1095 = vmatpush.bf16.msra.mxu2 %v1086_v3 }
 0x485   : > { %v2993_v12 = vpop.eup %2992 }
 0x486   : > { %v950_v10 = vpop.permute.xlu2 %949  ;;  %v900_v14 = vmul.f32 %v2993_v12, %v2987_v57 }
 0x487   : > { %v961_v11 = vsel %vm835_vm14, %v950_v10, 0 }
 0x488   : > { %969 = vmatpush.bf16.xpose.msrb.mxu1 %v961_v11  ;;  %v902_v17 = vpack.c.bf16 %v900_v14, %v900_v14 }
 0x489   : > { %v1249_v22 = vpop.permute.xlu0 %1248 }
 0x48a   : > { %v1259_v23 = vsel %vm835_vm14, %v1249_v22, 0 }
 0x48e   : > { %v944_v15 = vpop.permute.xlu2 %943 }
 0x490   : > { %970 = vmatpush.bf16.xpose.msrb.mxu1 %v958_v16 }
 0x491   : > { %v1245_v45 = vpop.permute.xlu0 %1244 }
 0x492   : > { %2811 = vmatmul.msk.bf16.gmra.mxu2 %vm866_vm15, %v902_v17 }
 0x496   : > { %v1251_v18 = vpop.permute.xlu2 %1250  ;;  %v946_v26 = vpop.permute.xlu1 %945 }
 0x497   : > { %v1262_v19 = vsel %vm835_vm14, %v1251_v18, 0  ;;  %2812 = vmatmul.msk.bf16.vlgmr.msrb.gmra.mxu1 %vm835_vm14, %v944_v15 }
 0x498   : > { %1270 = vmatpush.bf16.xpose.msrb.mxu2 %v1262_v19 }
 0x499   : > { %v1247_v50 = vpop.permute.xlu0 %1246 }
 0x49e   : > { %v1113_v21 = vpop.permute.xlu2 %1112  ;;  %v1109_v31 = vpop.permute.xlu1 %1108 }
 0x49f   : > { %v1124_v25 = vsel %vm835_vm14, %v1113_v21, 0 }
 0x4a0   : > { %1132 = vmatpush.bf16.xpose.msra.mxu1 %v1124_v25  ;;  %1271 = vmatpush.bf16.xpose.msrb.mxu2 %v1259_v23 }
 0x4a6   : > { %v1111_v27 = vpop.permute.xlu2 %1110 }
 0x4a7   : > { %v1121_v29 = vsel %vm835_vm14, %v1111_v27, 0  ;;  %2813 = vmatmul.msk.bf16.gmra.mxu1 %vm835_vm14, %v946_v26 }
 0x4a8   : > { %1133 = vmatpush.bf16.xpose.msra.mxu1 %v1121_v29 }
 0x4ae   : > { %v1107_v30 = vpop.permute.xlu2 %1106 }
 0x4b7   : > { %2820 = vmatmul.msk.bf16.vlgmr.msra.gmra.mxu1 %vm835_vm14, %v1107_v30 }
 0x4c7   : > { %2821 = vmatmul.msk.bf16.gmra.mxu1 %vm835_vm14, %v1109_v31 }
 0x505   : > { %v929_v32 = vpop.f32.mrf.mxu2 }
 0x50d   : > { %v931_v33 = vpop.f32.mrf.mxu2 }
 0x50e   : > { %v938_v34 = vpack.c.bf16 %v931_v33, %v929_v32 }
 0x510   : > { %2818 = vmatmul.msk.bf16.vlgmr.msra.gmra.mxu2 %vm835_vm14, %v938_v34 }
 0x514   : > { %v972_v35 = vpop.f32.mrf.mxu1 }
 0x515   : > { %v934_v36 = vpop.f32.mrf.mxu2  ;;  %v981_v37 = vsel %vm866_vm15, %v972_v35, -inf }
 0x516   : > { %982 = vmax.xlane.f32.xlu2 %v981_v37  ;;  %v939_v41 = vpack.c.bf16 %v934_v36, %v934_v36 }
 0x51c   : > { %v974_v38 = vpop.f32.mrf.mxu1 }
 0x51d   : > { %v936_v39 = vpop.f32.mrf.mxu2  ;;  %v984_v40 = vsel %vm866_vm15, %v974_v38, -inf }
 0x51e   : > { %985 = vmax.xlane.f32.xlu0 %v984_v40 }
 0x520   : > { %2819 = vmatmul.msk.bf16.gmra.mxu2 %vm835_vm14, %v939_v41 }
 0x524   : > { %v977_v42 = vpop.f32.mrf.mxu1 }
 0x525   : > { %v987_v43 = vsel %vm873_vm3, %v977_v42, -inf }
 0x526   : > { %988 = vmax.xlane.f32.xlu1 %v987_v43 }
 0x52c   : > { %v979_v44 = vpop.f32.mrf.mxu1 }
 0x530   : > { %2826 = vmatmul.msk.bf16.vlgmr.msrb.gmra.mxu2 %vm835_vm14, %v1245_v45 }
 0x534   : > { %v1135_v46 = vpop.f32.mrf.mxu1 }
 0x535   : > { %v1144_v47 = vsel %vm866_vm15, %v1135_v46, -inf }
 0x536   : > { %1145 = vmax.xlane.f32.xlu2 %v1144_v47 }
 0x53c   : > { %v1137_v48 = vpop.f32.mrf.mxu1 }
 0x53d   : > { %v1147_v49 = vsel %vm866_vm15, %v1137_v48, -inf }
 0x53e   : > { %1148 = vmax.xlane.f32.xlu0 %v1147_v49 }
 0x540   : > { %2827 = vmatmul.msk.bf16.gmra.mxu2 %vm835_vm14, %v1247_v50 }
 0x544   : > { %v3559_v51 = vpop.f32.mrf.mxu1 }
 0x545   : > { %v1150_v19 = vsel %vm873_vm3, %v3559_v51, -inf }
 0x54c   : > { %v1142_v53 = vpop.f32.mrf.mxu1 }
 0x589   : > { %v983_v54 = vpop.xlane.xlu2 %982 }
 0x58a   : > { %v990_v55 = vsub.f32 %v972_v35, %v983_v54 }
 0x58c   : > { %v993_v56 = vmul.f32 1.442695, %v990_v55 }
 0x58e   : > { %2994 = vpow2.f32 %v993_v56 }
 0x591   : > { %v986_v57 = vpop.xlane.xlu0 %985 }
 0x592   : > { %v991_v59 = vsub.f32 %v974_v38, %v986_v57 }
 0x593   : > { %v3561_v60 = vpop.f32.mrf.mxu2 }
 0x594   : > { %v3563_v61 = vpop.eup %2994  ;;  %v995_v62 = vmul.f32 1.442695, %v991_v59 }
 0x595   : > { %v999_v0 = vsel %vm866_vm15, %v3563_v61, 0.0 }
 0x596   : > { %2996 = vpow2.f32 %v995_v62  ;;  %1000 = vadd.xlane.f32.xlu0 %v999_v0 }
 0x599   : > { %v989_v5 = vpop.xlane.xlu1 %988 }
 0x59a   : > { %v992_v6 = vsub.f32 %v977_v42, %v989_v5 }
 0x59b   : > { %v3567_v1 = vpop.f32.mrf.mxu2 }
 0x59c   : > { %v3569_v2 = vpop.eup %2996  ;;  %v997_v9 = vmul.f32 1.442695, %v992_v6 }
 0x59d   : > { %v1002_v3 = vsel %vm866_vm15, %v3569_v2, 0.0 }
 0x59e   : > { %1003 = vadd.xlane.f32.xlu1 %v1002_v3  ;;  %2998 = vpow2.f32 %v997_v9 }
 0x5a3   : > { %v3573_v4 = vpop.f32.mrf.mxu2 }
 0x5a4   : > { %v3578_v12 = vpop.eup %2998 }
 0x5a5   : > { %v1005_v14 = vsel %vm873_vm3, %v3578_v12, 0.0 }
 0x5a9   : > { %v1146_v16 = vpop.xlane.xlu2 %1145 }
 0x5aa   : > { %1016 = vrot.lane.b32.xlu0 %v3485_v20, %s4219_s24  ;;  %v1153_v17 = vsub.f32 %v1135_v46, %v1146_v16 }
 0x5ab   : > { %v1104_v7 = vpop.f32.mrf.mxu2 }
 0x5ac   : > { %v1156_v22 = vmul.f32 1.442695, %v1153_v17 }
 0x5ae   : > { %3000 = vpow2.f32 %v1156_v22 }
 0x5b1   : > { %v1149_v26 = vpop.xlane.xlu0 %1148 }
 0x5b2   : > { %v1154_v27 = vsub.f32 %v1137_v48, %v1149_v26 }
 0x5b3   : > { %v1273_v10 = vpop.f32.mrf.mxu2 }
 0x5b4   : > { %v1282_v11 = vsel %vm866_vm15, %v1273_v10, -inf  ;;  %v3587_v23 = vpop.eup %3000  ;;  %v1158_v29 = vmul.f32 1.442695, %v1154_v27 }
 0x5b5   : > { %1283 = vmax.xlane.f32.xlu1 %v1282_v11  ;;  %v1162_v25 = vsel %vm866_vm15, %v3587_v23, 0.0 }
 0x5b6   : > { %3002 = vpow2.f32 %v1158_v29 }
 0x5bb   : > { %v1275_v13 = vpop.f32.mrf.mxu2 }
 0x5bc   : > { %v1285_v15 = vsel %vm866_vm15, %v1275_v13, -inf  ;;  %v3003_v30 = vpop.eup %3002 }
 0x5bd   : > { %1006 = vadd.xlane.f32.xlu1 %v1005_v14  ;;  %1286 = vmax.xlane.f32.xlu2 %v1285_v15  ;;  %v1165_v31 = vsel %vm866_vm15, %v3003_v30, 0.0 }
 0x5c3   : > { %v3583_v18 = vpop.f32.mrf.mxu2 }
 0x5c4   : > { %v1288_v32 = vsel %vm873_vm3, %v3583_v18, -inf }
 0x5c5   : > { %1151 = vmax.xlane.f32.xlu1 %v1150_v19 }
 0x5cb   : > { %v1280_v21 = vpop.f32.mrf.mxu2 }
 0x5cc   : > { %v819_v21 = vld [vmem:[%s4191_s7 + $0x8] sm:$0xff] }
 0x5d4   : > { %1163 = vadd.xlane.f32.xlu0 %v1162_v25 }
 0x5d5   : > { %1018 = vrot.lane.b32.xlu2 %v3491_v24, %s4219_s24  ;;  %s2740_s24 = scalar_lea.hbm %s4203_s19, %s3308_s1 }
 0x5d6   : > { %s2744_s0 = sshll.u32 %s2740_s24, 4  ;;  %s2745_s0 = int_to_ptr.hbm [resolvable:$true] %s2744_s0 }
 0x5de   : > { %1181 = vrot.lane.b32.xlu1 %v3491_v24, %s4217_s23 }
 0x5e8   : > { %1319 = vrot.lane.b32.xlu0 %v3491_v24, %s4215_s21 }
 0x5fe   : > { %1166 = vadd.xlane.f32.xlu2 %v1165_v31 }
 0x608   : > { %1289 = vmax.xlane.f32.xlu1 %v1288_v32 }
 0x609   : > { %v1001_v37 = vpop.xlane.xlu0 %1000 }
 0x611   : > { %v1004_v33 = vpop.xlane.xlu1 %1003 }
 0x616   : > { %1179 = vrot.lane.b32.xlu2 %v3485_v20, %s4217_s23  ;;  %s4258_s23 = smov 80  }
 0x61c   : > { %v1017_v50 = vpop.permute.xlu0 %1016 }
 0x628   : > { %v1284_v34 = vpop.xlane.xlu1 %1283 }
 0x629   : > { %v1291_v35 = vsub.f32 %v1273_v10, %v1284_v34 }
 0x62b   : > { %v1294_v36 = vmul.f32 1.442695, %v1291_v35 }
 0x62d   : > { %3004 = vpow2.f32 %v1294_v36 }
 0x62e   : > { %3006 = vrcp.f32 %v1004_v33 }
 0x62f   : > { %3008 = vrcp.f32 %v1001_v37 }
 0x630   : > { %v1287_v24 = vpop.xlane.xlu2 %1286  ;;  %v1007_v53 = vpop.xlane.xlu1 %1006 }
 0x631   : > { %v1292_v38 = vsub.f32 %v1275_v13, %v1287_v24 }
 0x633   : > { %v3602_v39 = vpop.eup %3004  ;;  %v1296_v40 = vmul.f32 1.442695, %v1292_v38 }
 0x634   : > { %v1300_v41 = vsel %vm866_vm15, %v3602_v39, 0.0  ;;  %v3007_v43 = vpop.eup %3006 }
 0x635   : > { %3010 = vpow2.f32 %v1296_v40  ;;  %1301 = vadd.xlane.f32.xlu1 %v1300_v41  ;;  %v3009_v45 = vpop.eup %3008  ;;  %v1012_v47 = vmul.f32 %v3007_v43, %v3569_v2  ;;  %v820_v40 = vld [vmem:[%s4191_s7 + $0x10] sm:$0xff] }
 0x636   : > { %v1011_v49 = vmul.f32 %v3009_v45, %v3563_v61  ;;  %3012 = vrcp.f32 %v1007_v53  ;;  %v1213_v41 = vpack.c.bf16 %v820_v40, %v820_v40 }
 0x638   : > { %v1019_v42 = vpop.permute.xlu2 %1018  ;;  %v1014_v54 = vpack.c.bf16 %v1012_v47, %v1011_v49  ;;  %v1152_v55 = vpop.xlane.xlu1 %1151 }
 0x639   : > { %v1028_v44 = vand.u32 %v1019_v42, %v3497_v28  ;;  %v1155_v5 = vsub.f32 %v3559_v51, %v1152_v55  ;;  %v821_v55 = vld [vmem:[%s4191_s7 + $0x18] sm:$0xff] }
 0x63b   : > { %v3011_v46 = vpop.eup %3010  ;;  %1036 = vmatpush.bf16.msrb.mxu3 %v1028_v44  ;;  %v1160_v7 = vmul.f32 1.442695, %v1155_v5 }
 0x63c   : > { %v1303_v48 = vsel %vm866_vm15, %v3011_v46, 0.0  ;;  %v3013_v56 = vpop.eup %3012 }
 0x63d   : > { %1304 = vadd.xlane.f32.xlu1 %v1303_v48  ;;  %v1013_v57 = vmul.f32 %v3013_v56, %v3578_v12  ;;  %v1351_v56 = vpack.c.bf16 %v821_v55, %v821_v55 }
 0x63f   : > { %1037 = vmatpush.bf16.msrb.mxu3 %v1017_v50  ;;  %v1015_v62 = vpack.c.bf16 %v1013_v57, %v1013_v57  ;;  %v1359_v57 = vsel %vm1057_vm4, %v1351_v56, 0  ;;  %v1472_v56 = vld [vmem:[%s4195_s11] sm:$0xff] }
 0x642   : > { %2814 = vmatmul.msk.bf16.vlgmr.msrb.gmra.mxu3 %vm866_vm15, %v1014_v54 }
 0x647   : > { %v1164_v2 = vpop.xlane.xlu0 %1163 }
 0x648   : > { %3014 = vrcp.f32 %v1164_v2 }
 0x64e   : > { %v3015_v9 = vpop.eup %3014 }
 0x64f   : > { %v1174_v11 = vmul.f32 %v3015_v9, %v3587_v23  ;;  %v1050_v23 = vpack.c.bf16 %v819_v21, %v819_v21 }
 0x650   : > { %v1182_v59 = vpop.permute.xlu1 %1181 }
 0x651   : > { %v1191_v0 = vand.u32 %v1182_v59, %v3497_v28  ;;  %v1059_v25 = vsel %vm1057_vm4, %v1050_v23, 0 }
 0x652   : > { %2815 = vmatmul.msk.bf16.gmra.mxu3 %vm866_vm15, %v1015_v62  ;;  %1068 = vmatpush.bf16.msrb.mxu0 %v1059_v25 }
 0x653   : > { %1199 = vmatpush.bf16.msra.mxu3 %v1191_v0 }
 0x656   : > { %1317 = vrot.lane.b32.xlu1 %v3485_v20, %s4215_s21  ;;  %s4259_s21 = smov 112  }
 0x65a   : > { %v1320_v61 = vpop.permute.xlu0 %1319 }
 0x65b   : > { %v1329_v3 = vand.u32 %v1320_v61, %v3497_v28 }
 0x65d   : > { %1337 = vmatpush.bf16.msrb.mxu1 %v1329_v3 }
 0x671   : > { %v1167_v6 = vpop.xlane.xlu2 %1166 }
 0x672   : > { %3016 = vrcp.f32 %v1167_v6 }
 0x673   : > { %3018 = vpow2.f32 %v1160_v7 }
 0x678   : > { %v3017_v10 = vpop.eup %3016 }
 0x679   : > { %v1175_v12 = vmul.f32 %v3017_v10, %v3003_v30  ;;  %v1180_v13 = vpop.permute.xlu2 %1179  ;;  %v3019_v15 = vpop.eup %3018 }
 0x67a   : > { %1200 = vmatpush.bf16.msra.mxu3 %v1180_v13  ;;  %v1168_v17 = vsel %vm873_vm3, %v3019_v15, 0.0 }
 0x67b   : > { %v1177_v14 = vpack.c.bf16 %v1175_v12, %v1174_v11  ;;  %v1290_v20 = vpop.xlane.xlu1 %1289 }
 0x67c   : > { %v1293_v16 = vsub.f32 %v3583_v18, %v1290_v20 }
 0x67d   : > { %2822 = vmatmul.msk.bf16.vlgmr.msra.gmra.mxu3 %vm866_vm15, %v1177_v14 }
 0x67e   : > { %v1298_v51 = vmul.f32 1.442695, %v1293_v16  ;;  %1368 = vmatpush.bf16.msrb.mxu3 %v1359_v57  ;;  %v1473_v57 = vld [vmem:[%s4195_s11 + $0x8] sm:$0xff] }
 0x680   : > { %3020 = vpow2.f32 %v1298_v51  ;;  %1169 = vadd.xlane.f32.xlu1 %v1168_v17  ;;  %v2959_v51 = vld [vmem:[%s4192_s8] ss:$0 sm:$0xff] }
 0x686   : > { %v3021_v19 = vpop.eup %3020 }
 0x687   : > { %v1306_v22 = vsel %vm873_vm3, %v3021_v19, 0.0 }
 0x688   : > { %1307 = vadd.xlane.f32.xlu0 %v1306_v22 }
 0x6a8   : > { %v1302_v18 = vpop.xlane.xlu1 %1301 }
 0x6b0   : > { %v1305_v26 = vpop.xlane.xlu1 %1304 }
 0x6b1   : > { %3022 = vrcp.f32 %v1305_v26 }
 0x6b2   : > { %3024 = vrcp.f32 %v1302_v18 }
 0x6b7   : > { %v3023_v27 = vpop.eup %3022 }
 0x6b8   : > { %v3025_v29 = vpop.eup %3024  ;;  %v1313_v31 = vmul.f32 %v3023_v27, %v3011_v46 }
 0x6b9   : > { %v1312_v32 = vmul.f32 %v3025_v29, %v3602_v39  ;;  %v1221_v39 = vsel %vm1057_vm4, %v1213_v41, 0 }
 0x6ba   : > { %1230 = vmatpush.bf16.msra.mxu0 %v1221_v39 }
 0x6bb   : > { %v1315_v34 = vpack.c.bf16 %v1313_v31, %v1312_v32 }
 0x6c5   : > { %v1039_v30 = vpop.f32.mrf.mxu3 }
 0x6c8   : > { %v1318_v33 = vpop.permute.xlu1 %1317 }
 0x6c9   : > { %1338 = vmatpush.bf16.msrb.mxu1 %v1318_v33 }
 0x6cc   : > { %2828 = vmatmul.msk.bf16.vlgmr.msrb.gmra.mxu1 %vm866_vm15, %v1315_v34 }
 0x6cd   : > { %v1041_v35 = vpop.f32.mrf.mxu3 }
 0x6ce   : > { %v1048_v36 = vpack.c.bf16 %v1041_v35, %v1039_v30 }
 0x6d0   : > { %2816 = vmatmul.msk.bf16.vlgmr.msrb.gmra.mxu0 %vm835_vm14, %v1048_v36 }
 0x6d5   : > { %v1044_v24 = vpop.f32.mrf.mxu3 }
 0x6d6   : > { %v1049_v38 = vpack.c.bf16 %v1044_v24, %v1044_v24 }
 0x6dd   : > { %v1046_v37 = vpop.f32.mrf.mxu3 }
 0x6e0   : > { %2817 = vmatmul.msk.bf16.gmra.mxu0 %vm835_vm14, %v1049_v38 }
 0x6f3   : > { %v1170_v42 = vpop.xlane.xlu1 %1169 }
 0x6f4   : > { %3026 = vrcp.f32 %v1170_v42 }
 0x6fa   : > { %v3027_v43 = vpop.eup %3026 }
 0x6fb   : > { %v1308_v44 = vpop.xlane.xlu0 %1307  ;;  %v1176_v45 = vmul.f32 %v3027_v43, %v3019_v15 }
 0x6fc   : > { %3028 = vrcp.f32 %v1308_v44 }
 0x6fd   : > { %v1178_v46 = vpack.c.bf16 %v1176_v45, %v1176_v45 }
 0x6ff   : > { %2823 = vmatmul.msk.bf16.gmra.mxu3 %vm866_vm15, %v1178_v46 }
 0x700   : > { %v1202_v47 = vpop.f32.mrf.mxu3 }
 0x702   : > { %v3029_v48 = vpop.eup %3028 }
 0x703   : > { %v1314_v49 = vmul.f32 %v3029_v48, %v3021_v19 }
 0x705   : > { %v1316_v50 = vpack.c.bf16 %v1314_v49, %v1314_v49  ;;  %v1474_v49 = vld [vmem:[%s4195_s11 + $0x10] sm:$0xff] }
 0x707   : > { %2829 = vmatmul.msk.bf16.gmra.mxu1 %vm866_vm15, %v1316_v50  ;;  %v1475_v50 = vld [vmem:[%s4195_s11 + $0x18] sm:$0xff] }
 0x708   : > { %v1204_v53 = vpop.f32.mrf.mxu3 }
 0x709   : > { %v1211_v54 = vpack.c.bf16 %v1204_v53, %v1202_v47  ;;  %v1479_v53 = vpack.c.bf16 %v1475_v50, %v1474_v49 }
 0x70b   : > { %2824 = vmatmul.msk.bf16.vlgmr.msra.gmra.mxu0 %vm835_vm14, %v1211_v54 }
 0x70c   : > { %1496 = vmatpush.bf16.msrb.mxu0 %v1479_v53 }
 0x749   : > { %v1340_v59 = vpop.f32.mrf.mxu1 }
 0x74d   : > { %v1070_v62 = vpop.f32.mrf.mxu0 }
 0x74e   : > { %v1098_v14 = vadd.f32 %v3561_v60, %v1070_v62 }
 0x751   : > { %v1342_v0 = vpop.f32.mrf.mxu1 }
 0x752   : > { %v1349_v2 = vpack.c.bf16 %v1342_v0, %v1340_v59  ;;  %v1478_v59 = vpack.c.bf16 %v1473_v57, %v1472_v56 }
 0x754   : > { %2830 = vmatmul.msk.bf16.vlgmr.msrb.gmra.mxu3 %vm835_vm14, %v1349_v2  ;;  %1497 = vmatpush.bf16.msrb.mxu0 %v1478_v59 }
 0x755   : > { %v1072_v61 = vpop.f32.mrf.mxu0 }
 0x756   : > { %v1100_v22 = vadd.f32 %v3567_v1, %v1072_v61 }
 0x75d   : > { %v1075_v3 = vpop.f32.mrf.mxu0 }
 0x75e   : > { %v1103_v1 = vadd.f32 %v3573_v4, %v1075_v3 }
 0x765   : > { %v1077_v5 = vpop.f32.mrf.mxu0 }
 0x782   : > { %v1207_v6 = vpop.f32.mrf.mxu3 }
 0x783   : > { %v1212_v7 = vpack.c.bf16 %v1207_v6, %v1207_v6 }
 0x784   : > { %v1345_v9 = vpop.f32.mrf.mxu1 }
 0x785   : > { %v1350_v10 = vpack.c.bf16 %v1345_v9, %v1345_v9  ;;  %2825 = vmatmul.msk.bf16.gmra.mxu0 %vm835_vm14, %v1212_v7 }
 0x787   : > { %2831 = vmatmul.msk.bf16.gmra.mxu3 %vm835_vm14, %v1350_v10 }
 0x788   : > { %v1232_v13 = vpop.f32.mrf.mxu0 }
 0x789   : > { %v1241_v20 = vadd.f32 %v1232_v13, %v1098_v14 }
 0x78a   : > { %v1209_v11 = vpop.f32.mrf.mxu3 }
 0x78c   : > { %v1347_v12 = vpop.f32.mrf.mxu1 }
 0x790   : > { %v1234_v19 = vpop.f32.mrf.mxu0 }
 0x791   : > { %v1242_v23 = vadd.f32 %v1234_v19, %v1100_v22  ;;  %v2961_v22 = vld [vmem:[%s4194_s10] ss:$0 sm:$0xff] }
 0x7d7   : > { %v1370_v15 = vpop.f32.mrf.mxu3 }
 0x7d8   : > { %v1379_v16 = vadd.f32 %v1370_v15, %v1241_v20 }
 0x7da   : > { %v1382_v17 = vadd.f32 %v1379_v16, %v3425_v52  ;;  %v2960_v16 = vld [vmem:[%s4193_s9] ss:$0 sm:$0xff] }
 0x7dc   : > { %v3651_v21 = vadd.f32 %v2959_v51, %v1382_v17 }
 0x7de   : > { %v1394_v25 = vsel %vm695_vm1, %v3651_v21, 0.0 }
 0x7df   : > { %1395 = vadd.xlane.f32.xlu2 %v1394_v25  ;;  %v1372_v60 = vpop.f32.mrf.mxu3 }
 0x7e0   : > { %v1380_v18 = vadd.f32 %v1372_v60, %v1242_v23 }
 0x7e2   : > { %v1383_v26 = vadd.f32 %v1380_v18, %v3432_v58 }
 0x7e4   : > { %v3656_v27 = vadd.f32 %v2959_v51, %v1383_v26 }
 0x7e6   : > { %v1397_v29 = vsel %vm695_vm1, %v3656_v27, 0.0 }
 0x7e7   : > { %1398 = vadd.xlane.f32.xlu1 %v1397_v29 }
 0x802   : > { %v1237_v52 = vpop.f32.mrf.mxu0 }
 0x803   : > { %v1243_v30 = vadd.f32 %v1237_v52, %v1103_v1 }
 0x80a   : > { %v1239_v31 = vpop.f32.mrf.mxu0  ;;  %v1375_v32 = vpop.f32.mrf.mxu3 }
 0x80b   : > { %v1381_v33 = vadd.f32 %v1375_v32, %v1243_v30 }
 0x80d   : > { %v1384_v34 = vadd.f32 %v1381_v33, %v3439_v63 }
 0x80f   : > { %v3662_v35 = vadd.f32 %v2959_v51, %v1384_v34 }
 0x811   : > { %v1400_v58 = vsel %vm702_vm2, %v3662_v35, 0.0 }
 0x812   : > { %1401 = vadd.xlane.f32.xlu0 %v1400_v58  ;;  %v1377_v36 = vpop.f32.mrf.mxu3 }
 0x852   : > { %v1396_v24 = vpop.xlane.xlu2 %1395 }
 0x853   : > { %v1403_v37 = vmul.f32 %v1396_v24, %v3443_v8 }
 0x855   : > { %v1406_v38 = vsub.f32 %v3651_v21, %v1403_v37 }
 0x857   : > { %v1409_v40 = vmul.f32 %v1406_v38, %v1406_v38 }
 0x859   : > { %v1412_v4 = vsel %vm695_vm1, %v1409_v40, 0.0 }
 0x85a   : > { %1413 = vadd.xlane.f32.xlu1 %v1412_v4  ;;  %v1399_v41 = vpop.xlane.xlu1 %1398 }
 0x85b   : > { %v1404_v39 = vmul.f32 %v1399_v41, %v3443_v8  ;;  %v3706_v41 = vld [vmem:[%s4196_s12] ss:$0 sm:$0xff] }
 0x85d   : > { %v1407_v63 = vsub.f32 %v3656_v27, %v1404_v39 }
 0x85f   : > { %v1410_v42 = vmul.f32 %v1407_v63, %v1407_v63 }
 0x861   : > { %v1415_v43 = vsel %vm695_vm1, %v1410_v42, 0.0 }
 0x862   : > { %1416 = vadd.xlane.f32.xlu2 %v1415_v43 }
 0x885   : > { %v1402_v44 = vpop.xlane.xlu0 %1401 }
 0x886   : > { %v1405_v45 = vmul.f32 %v1402_v44, %v3443_v8 }
 0x888   : > { %v3674_v46 = vsub.f32 %v3662_v35, %v1405_v45 }
 0x88a   : > { %v1411_v47 = vmul.f32 %v3674_v46, %v3674_v46 }
 0x88c   : > { %v1418_v48 = vsel %vm702_vm2, %v1411_v47, 0.0 }
 0x88d   : > { %1419 = vadd.xlane.f32.xlu0 %v1418_v48 }
 0x8cd   : > { %v1414_v54 = vpop.xlane.xlu1 %1413 }
 0x8ce   : > { %v1421_v55 = vmul.f32 %v1414_v54, %v3443_v8 }
 0x8d0   : > { %v1424_v62 = vadd.f32 1e-06, %v1421_v55 }
 0x8d2   : > { %3030 = vrsqrt.f32 %v1424_v62  ;;  %vm1433_vm6 = vweird.f32 %v1424_v62 }
 0x8d5   : > { %v1417_v0 = vpop.xlane.xlu2 %1416 }
 0x8d6   : > { %v1422_v2 = vmul.f32 %v1417_v0, %v3443_v8  ;;  %v1647_v0 = vld [vmem:[%s4197_s13 + $0x38] sm:$0xff] }
 0x8d8   : > { %v3031_v61 = vpop.eup %3030  ;;  %v1425_v3 = vadd.f32 1e-06, %v1422_v2 }
 0x8d9   : > { %v1428_v5 = vmul.f32 %v3031_v61, %v1424_v62  ;;  %vm1434_vm5 = vweird.f32 %v3031_v61  ;;  %v1646_v62 = vld [vmem:[%s4197_s13 + $0x30] sm:$0xff] }
 0x8da   : > { %3032 = vrsqrt.f32 %v1425_v3  ;;  %vm1435_vm7 = vmor %vm1433_vm6, %vm1434_vm5  ;;  %vm1443_vm9 = vweird.f32 %v1425_v3 }
 0x8db   : > { %v1429_v6 = vmul.f32 %v3031_v61, %v1428_v5 }
 0x8dd   : > { %v1430_v7 = vmul.f32 0.5, %v1429_v6 }
 0x8df   : > { %v1431_v9 = vsub.f32 1.5, %v1430_v7 }
 0x8e0   : > { %v3033_v10 = vpop.eup %3032 }
 0x8e1   : > { %v1432_v11 = vmul.f32 %v3031_v61, %v1431_v9  ;;  %v1438_v12 = vmul.f32 %v3033_v10, %v1425_v3  ;;  %vm1444_vm8 = vweird.f32 %v3033_v10 }
 0x8e2   : > { %vm1445_vm10 = vmor %vm1443_vm9, %vm1444_vm8 }
 0x8e3   : > { %v1439_v13 = vmul.f32 %v3033_v10, %v1438_v12  ;;  %v1436_v14 = vsel %vm1435_vm7, %v3031_v61, %v1432_v11  ;;  %v1653_v61 = vpack.c.bf16 %v1647_v0, %v1646_v62  ;;  %v1644_v11 = vld [vmem:[%s4197_s13 + $0x20] sm:$0xff]  ;;  %v1645_v12 = vld [vmem:[%s4197_s13 + $0x28] sm:$0xff] }
 0x8e4   : > { %v1457_v51 = vmul.f32 %v1436_v14, %v1406_v38  ;;  %v1652_v14 = vpack.c.bf16 %v1645_v12, %v1644_v11 }
 0x8e5   : > { %v1440_v20 = vmul.f32 0.5, %v1439_v13  ;;  %1664 = vmatpush.bf16.msra.mxu2 %v1653_v61 }
 0x8e6   : > { %v1463_v23 = vmul.f32 %v2960_v16, %v1457_v51 }
 0x8e7   : > { %v1441_v15 = vsub.f32 1.5, %v1440_v20 }
 0x8e8   : > { %v1469_v18 = vadd.f32 %v2961_v22, %v1463_v23  ;;  %v1643_v23 = vld [vmem:[%s4197_s13 + $0x18] sm:$0xff] }
 0x8e9   : > { %v1442_v17 = vmul.f32 %v3033_v10, %v1441_v15  ;;  %1665 = vmatpush.bf16.msra.mxu2 %v1652_v14 }
 0x8eb   : > { %v1446_v19 = vsel %vm1445_vm10, %v3033_v10, %v1442_v17 }
 0x8ec   : > { %v1458_v25 = vmul.f32 %v1446_v19, %v1407_v63 }
 0x8ee   : > { %v1464_v60 = vmul.f32 %v2960_v16, %v1458_v25 }
 0x8f0   : > { %v1470_v26 = vadd.f32 %v2961_v22, %v1464_v60 }
 0x8f2   : > { %v1476_v29 = vpack.c.bf16 %v1470_v26, %v1469_v18 }
 0x8f4   : > { %2832 = vmatmul.msk.bf16.vlgmr.msrb.gmra.mxu0 %vm695_vm1, %v1476_v29 }
 0x900   : > { %v1420_v52 = vpop.xlane.xlu0 %1419 }
 0x901   : > { %v1423_v1 = vmul.f32 %v1420_v52, %v3443_v8 }
 0x903   : > { %v1426_v30 = vadd.f32 1e-06, %v1423_v1 }
 0x905   : > { %3034 = vrsqrt.f32 %v1426_v30  ;;  %vm1453_vm12 = vweird.f32 %v1426_v30 }
 0x90b   : > { %v3035_v31 = vpop.eup %3034 }
 0x90c   : > { %v1448_v32 = vmul.f32 %v3035_v31, %v1426_v30  ;;  %vm1454_vm11 = vweird.f32 %v3035_v31  ;;  %v1640_v30 = vld [vmem:[%s4197_s13] sm:$0xff] }
 0x90d   : > { %vm1455_vm13 = vmor %vm1453_vm12, %vm1454_vm11 }
 0x90e   : > { %v1449_v33 = vmul.f32 %v3035_v31, %v1448_v32 }
 0x910   : > { %v1450_v34 = vmul.f32 0.5, %v1449_v33 }
 0x912   : > { %v1451_v58 = vsub.f32 1.5, %v1450_v34 }
 0x914   : > { %v1452_v36 = vmul.f32 %v3035_v31, %v1451_v58 }
 0x916   : > { %v1456_v24 = vsel %vm1455_vm13, %v3035_v31, %v1452_v36  ;;  %v1641_v31 = vld [vmem:[%s4197_s13 + $0x8] sm:$0xff] }
 0x917   : > { %v1459_v37 = vmul.f32 %v1456_v24, %v3674_v46  ;;  %v1650_v33 = vpack.c.bf16 %v1641_v31, %v1640_v30 }
 0x919   : > { %v1465_v38 = vmul.f32 %v2960_v16, %v1459_v37 }
 0x91b   : > { %v1471_v40 = vadd.f32 %v2961_v22, %v1465_v38  ;;  %v1642_v22 = vld [vmem:[%s4197_s13 + $0x10] sm:$0xff] }
 0x91c   : > { %v1651_v60 = vpack.c.bf16 %v1643_v23, %v1642_v22 }
 0x91d   : > { %v1477_v4 = vpack.c.bf16 %v1471_v40, %v1471_v40 }
 0x91e   : > { %1666 = vmatpush.bf16.msra.mxu2 %v1651_v60 }
 0x91f   : > { %2833 = vmatmul.msk.bf16.gmra.mxu0 %vm695_vm1, %v1477_v4 }
 0x922   : > { %1667 = vmatpush.bf16.msra.mxu2 %v1650_v33 }
 0x971   : > { %v1499_v39 = vpop.f32.mrf.mxu0 }
 0x972   : > { %v3709_v63 = vadd.f32 %v3706_v41, %v1499_v39 }
 0x974   : > { %v3712_v42 = vmul.f32 0.70710677, %v3709_v63  ;;  %v1508_v30 = vmul.f32 0.5, %v3709_v63 }
 0x976   : > { %v1514_v43 = vmul.f32 %v3712_v42, %v3712_v42 }
 0x978   : > { %v1515_v44 = vmin.f32 %v1514_v43, 16.0 }
 0x979   : > { %v1501_v45 = vpop.f32.mrf.mxu0 }
 0x97a   : > { %v1516_v46 = vmul.f32 2.1237322e-06, %v1515_v44  ;;  %v1527_v47 = vmul.f32 3.8918573e-05, %v1515_v44  ;;  %v3717_v48 = vadd.f32 %v3706_v41, %v1501_v45 }
 0x97c   : > { %v1517_v49 = vadd.f32 0.00028619796, %v1516_v46  ;;  %v1528_v50 = vadd.f32 0.001143296, %v1527_v47  ;;  %v3720_v53 = vmul.f32 0.70710677, %v3717_v48 }
 0x97d   : > { %v1509_v31 = vmul.f32 0.5, %v3717_v48 }
 0x97e   : > { %v1529_v54 = vmul.f32 %v1528_v50, %v1515_v44  ;;  %v1554_v55 = vmul.f32 %v3720_v53, %v3720_v53  ;;  %v1518_v56 = vmul.f32 %v1517_v49, %v1515_v44 }
 0x980   : > { %v1530_v57 = vadd.f32 0.014752088, %v1529_v54  ;;  %v3724_v59 = vmin.f32 %v1554_v55, 16.0  ;;  %v1519_v6 = vadd.f32 0.0036580483, %v1518_v56 }
 0x982   : > { %v1531_v2 = vmul.f32 %v1530_v57, %v1515_v44  ;;  %v1556_v3 = vmul.f32 2.1237322e-06, %v3724_v59  ;;  %v1567_v5 = vmul.f32 3.8918573e-05, %v3724_v59  ;;  %v1520_v16 = vmul.f32 %v1519_v6, %v1515_v44 }
 0x984   : > { %v1532_v7 = vadd.f32 0.112945676, %v1531_v2  ;;  %v1557_v9 = vadd.f32 0.00028619796, %v1556_v3  ;;  %v1568_v10 = vadd.f32 0.001143296, %v1567_v5 }
 0x985   : > { %v1521_v26 = vadd.f32 0.05243302, %v1520_v16 }
 0x986   : > { %v1533_v13 = vmul.f32 %v1532_v7, %v1515_v44  ;;  %v1558_v20 = vmul.f32 %v1557_v9, %v3724_v59  ;;  %v1569_v15 = vmul.f32 %v1568_v10, %v3724_v59 }
 0x987   : > { %v1522_v34 = vmul.f32 %v1521_v26, %v1515_v44 }
 0x988   : > { %v1534_v51 = vadd.f32 0.4994258, %v1533_v13  ;;  %v1559_v17 = vadd.f32 0.0036580483, %v1558_v20  ;;  %v1570_v19 = vadd.f32 0.014752088, %v1569_v15 }
 0x989   : > { %v1523_v38 = vadd.f32 0.18741608, %v1522_v34 }
 0x98a   : > { %v1535_v25 = vmul.f32 %v1534_v51, %v1515_v44  ;;  %v1571_v18 = vmul.f32 %v1570_v19, %v3724_v59  ;;  %v1560_v52 = vmul.f32 %v1559_v17, %v3724_v59 }
 0x98b   : > { %v1524_v45 = vmul.f32 %v1523_v38, %v1515_v44 }
 0x98c   : > { %v1536_v29 = vadd.f32 1.0, %v1535_v25  ;;  %v1572_v1 = vadd.f32 0.112945676, %v1571_v18  ;;  %v1561_v58 = vadd.f32 0.05243302, %v1560_v52 }
 0x98d   : > { %v1525_v55 = vadd.f32 1.1283791, %v1524_v45 }
 0x98e   : > { %3036 = vrcp.f32 %v1536_v29  ;;  %v1573_v32 = vmul.f32 %v1572_v1, %v3724_v59  ;;  %v1562_v4 = vmul.f32 %v1561_v58, %v3724_v59  ;;  %v1548_v47 = vand.u32 2147483648, %v1536_v29 }
 0x98f   : > { %v1546_v50 = vand.u32 2147483647, %v1536_v29  ;;  %vm1542_vm6 = vweird.f32 %v1536_v29  ;;  %v1526_v6 = vmul.f32 %v1525_v55, %v3712_v42 }
 0x990   : > { %v1574_v36 = vadd.f32 0.4994258, %v1573_v32  ;;  %v1563_v49 = vadd.f32 0.18741608, %v1562_v4  ;;  %v1549_v0 = vor.u32 1.1754944e-38, %v1548_v47 }
 0x991   : > { %vm1547_vm8 = vcmp.eq.f32.partialorder %v1546_v50, 8.507059e+37 }
 0x992   : > { %v1575_v24 = vmul.f32 %v1574_v36, %v3724_v59  ;;  %v1564_v2 = vmul.f32 %v1563_v49, %v3724_v59 }
 0x994   : > { %v3037_v37 = vpop.eup %3036  ;;  %v1576_v39 = vadd.f32 1.0, %v1575_v24  ;;  %v1565_v9 = vadd.f32 1.1283791, %v1564_v2 }
 0x995   : > { %v1538_v40 = vmul.f32 %v3037_v37, %v1536_v29  ;;  %vm1543_vm5 = vweird.f32 %v3037_v37 }
 0x996   : > { %3038 = vrcp.f32 %v1576_v39  ;;  %vm1544_vm7 = vmor %vm1542_vm6, %vm1543_vm5  ;;  %v1588_v10 = vand.u32 2147483648, %v1576_v39  ;;  %v1586_v59 = vand.u32 2147483647, %v1576_v39  ;;  %vm1582_vm10 = vweird.f32 %v1576_v39 }
 0x997   : > { %v1539_v43 = vsub.f32 1.0, %v1538_v40  ;;  %v1566_v42 = vmul.f32 %v1565_v9, %v3720_v53 }
 0x998   : > { %v1589_v15 = vor.u32 1.1754944e-38, %v1588_v10  ;;  %vm1587_vm12 = vcmp.eq.f32.partialorder %v1586_v59, 8.507059e+37 }
 0x999   : > { %v1540_v46 = vmul.f32 %v3037_v37, %v1539_v43 }
 0x99b   : > { %v1541_v54 = vadd.f32 %v3037_v37, %v1540_v46 }
 0x99c   : > { %v1504_v56 = vpop.f32.mrf.mxu0  ;;  %v3039_v57 = vpop.eup %3038 }
 0x99d   : > { %v1545_v62 = vsel %vm1544_vm7, %v3037_v37, %v1541_v54  ;;  %v3761_v61 = vadd.f32 %v3706_v41, %v1504_v56  ;;  %v1578_v44 = vmul.f32 %v3039_v57, %v1576_v39  ;;  %vm1583_vm9 = vweird.f32 %v3039_v57 }
 0x99e   : > { %v1550_v3 = vsel %vm1547_vm8, %v1549_v0, %v1545_v62  ;;  %vm1584_vm11 = vmor %vm1582_vm10, %vm1583_vm9 }
 0x99f   : > { %v3764_v5 = vmul.f32 0.70710677, %v3761_v61  ;;  %v1579_v7 = vsub.f32 1.0, %v1578_v44  ;;  %v1551_v12 = vmul.f32 %v1550_v3, %v1526_v6 }
 0x9a1   : > { %v1594_v11 = vmul.f32 %v3764_v5, %v3764_v5  ;;  %v1580_v13 = vmul.f32 %v3039_v57, %v1579_v7  ;;  %v2834_v17 = vclamps-f32 %v1551_v12, 1.0  ;;  %v1510_v7 = vmul.f32 0.5, %v3761_v61  ;;  %v2963_v12 = vld [vmem:[%s4198_s14] ss:$0 sm:$0xff] }
 0x9a3   : > { %v1595_v41 = vmin.f32 %v1594_v11, 16.0  ;;  %v1581_v14 = vadd.f32 %v3039_v57, %v1580_v13  ;;  %v1634_v29 = vadd.f32 1.0, %v2834_v17 }
 0x9a4   : > { %v1506_v20 = vpop.f32.mrf.mxu0 }
 0x9a5   : > { %v1596_v16 = vmul.f32 2.1237322e-06, %v1595_v41  ;;  %v1607_v51 = vmul.f32 3.8918573e-05, %v1595_v41  ;;  %v1585_v19 = vsel %vm1584_vm11, %v3039_v57, %v1581_v14  ;;  %v1637_v58 = vmul.f32 %v1634_v29, %v1508_v30 }
 0x9a6   : > { %v1590_v22 = vsel %vm1587_vm12, %v1589_v15, %v1585_v19 }
 0x9a7   : > { %v1597_v23 = vadd.f32 0.00028619796, %v1596_v16  ;;  %v1608_v25 = vadd.f32 0.001143296, %v1607_v51  ;;  %v1591_v60 = vmul.f32 %v1590_v22, %v1566_v42 }
 0x9a9   : > { %v1598_v18 = vmul.f32 %v1597_v23, %v1595_v41  ;;  %v1609_v26 = vmul.f32 %v1608_v25, %v1595_v41  ;;  %v2835_v52 = vclamps-f32 %v1591_v60, 1.0 }
 0x9ab   : > { %v1610_v1 = vadd.f32 0.014752088, %v1609_v26  ;;  %v1635_v32 = vadd.f32 1.0, %v2835_v52  ;;  %v1599_v33 = vadd.f32 0.0036580483, %v1598_v18 }
 0x9ad   : > { %v1611_v34 = vmul.f32 %v1610_v1, %v1595_v41  ;;  %v1638_v53 = vmul.f32 %v1635_v32, %v1509_v31  ;;  %v1600_v37 = vmul.f32 %v1599_v33, %v1595_v41  ;;  %v2843_v33 = vld [vmem:[%s4252_s5 + $0x30] sm:$0xff] }
 0x9af   : > { %v1612_v36 = vadd.f32 0.112945676, %v1611_v34  ;;  %v1648_v24 = vpack.c.bf16 %v1638_v53, %v1637_v58  ;;  %v1601_v4 = vadd.f32 0.05243302, %v1600_v37  ;;  %v2844_v34 = vld [vmem:[%s4252_s5 + $0x38] sm:$0xff]  ;;  %v2842_v37 = vld [vmem:[%s4252_s5 + $0x28] sm:$0xff] }
 0x9b0   : > { %v1778_v58 = vpack.c.bf16 %v2844_v34, %v2843_v33 }
 0x9b1   : > { %v1613_v38 = vmul.f32 %v1612_v36, %v1595_v41  ;;  %2837 = vmatmul.msk.bf16.vlgmr.msra.gmra.mxu2 %vm650_vm0, %v1648_v24  ;;  %v1602_v45 = vmul.f32 %v1601_v4, %v1595_v41  ;;  %v2841_v24 = vld [vmem:[%s4252_s5 + $0x20] sm:$0xff]  ;;  %s3124_s5 = sshra.s32 %s2745_s0, 4  ;;  %s3125_s5 = int_to_ptr.hbm [resolvable:$true] %s3124_s5 }
 0x9b2   : > { %1796 = vmatpush.bf16.msra.mxu1 %v1778_v58  ;;  %p3131_p0 = scmp.lt.s32.totalorder %s3125_s5, %s4203_s19 }
 0x9b3   : > { %v1614_v40 = vadd.f32 0.4994258, %v1613_v38  ;;  %v1603_v63 = vadd.f32 0.18741608, %v1602_v45 }
 0x9b5   : > { %v1615_v39 = vmul.f32 %v1614_v40, %v1595_v41  ;;  %v1604_v48 = vmul.f32 %v1603_v63, %v1595_v41  ;;  %v1777_v40 = vpack.c.bf16 %v2842_v37, %v2841_v24 }
 0x9b7   : > { %v1616_v43 = vadd.f32 1.0, %v1615_v39  ;;  %v1605_v54 = vadd.f32 1.1283791, %v1604_v48  ;;  %1797 = vmatpush.bf16.msra.mxu1 %v1777_v40 }
 0x9b9   : > { %3040 = vrcp.f32 %v1616_v43  ;;  %v1628_v50 = vand.u32 2147483648, %v1616_v43  ;;  %v1626_v56 = vand.u32 2147483647, %v1616_v43  ;;  %vm1622_vm5 = vweird.f32 %v1616_v43 }
 0x9ba   : > { %v1606_v0 = vmul.f32 %v1605_v54, %v3764_v5 }
 0x9bb   : > { %v1629_v62 = vor.u32 1.1754944e-38, %v1628_v50  ;;  %vm1627_vm7 = vcmp.eq.f32.partialorder %v1626_v56, 8.507059e+37 }
 0x9bf   : > { %v3041_v46 = vpop.eup %3040 }
 0x9c0   : > { %v1618_v47 = vmul.f32 %v3041_v46, %v1616_v43  ;;  %vm1623_vm13 = vweird.f32 %v3041_v46 }
 0x9c1   : > { %vm1624_vm6 = vmor %vm1622_vm5, %vm1623_vm13 }
 0x9c2   : > { %v1619_v49 = vsub.f32 1.0, %v1618_v47 }
 0x9c4   : > { %v1620_v55 = vmul.f32 %v3041_v46, %v1619_v49 }
 0x9c6   : > { %v1621_v57 = vadd.f32 %v3041_v46, %v1620_v55 }
 0x9c8   : > { %v1625_v2 = vsel %vm1624_vm6, %v3041_v46, %v1621_v57 }
 0x9c9   : > { %v1630_v44 = vsel %vm1627_vm7, %v1629_v62, %v1625_v2 }
 0x9ca   : > { %v1631_v3 = vmul.f32 %v1630_v44, %v1606_v0  ;;  %v2964_v0 = vld [vmem:[%s4253_s28 + $0x1] ss:$0 sm:$0xff] }
 0x9cc   : > { %v2836_v6 = vclamps-f32 %v1631_v3, 1.0 }
 0x9ce   : > { %v1636_v9 = vadd.f32 1.0, %v2836_v6  ;;  %v2965_v6 = vld [vmem:[%s4254_s4 + $0x1] ss:$0 sm:$0xff] }
 0x9d0   : > { %v1639_v10 = vmul.f32 %v1636_v9, %v1510_v7 }
 0x9d2   : > { %v1649_v11 = vpack.c.bf16 %v1639_v10, %v1639_v10 }
 0x9d4   : > { %2838 = vmatmul.msk.bf16.gmra.mxu2 %vm650_vm0, %v1649_v11 }
 0xa34   : > { %v1669_v13 = vpop.f32.mrf.mxu2 }
 0xa35   : > { %v1678_v59 = vadd.f32 %v1669_v13, %v3651_v21 }
 0xa37   : > { %v3780_v5 = vadd.f32 %v2963_v12, %v1678_v59 }
 0xa39   : > { %v1692_v41 = vsel %vm695_vm1, %v3780_v5, 0.0 }
 0xa3a   : > { %1693 = vadd.xlane.f32.xlu1 %v1692_v41 }
 0xa3c   : > { %v1671_v14 = vpop.f32.mrf.mxu2 }
 0xa3d   : > { %v1679_v61 = vadd.f32 %v1671_v14, %v3656_v27 }
 0xa3f   : > { %v3785_v20 = vadd.f32 %v2963_v12, %v1679_v61 }
 0xa41   : > { %v1695_v15 = vsel %vm695_vm1, %v3785_v20, 0.0 }
 0xa42   : > { %1696 = vadd.xlane.f32.xlu2 %v1695_v15 }
 0xa57   : > { %v1674_v16 = vpop.f32.mrf.mxu2 }
 0xa58   : > { %v1680_v51 = vadd.f32 %v1674_v16, %v3662_v35 }
 0xa5a   : > { %v3790_v17 = vadd.f32 %v2963_v12, %v1680_v51 }
 0xa5c   : > { %v1698_v21 = vsel %vm702_vm2, %v3790_v17, 0.0 }
 0xa5d   : > { %1699 = vadd.xlane.f32.xlu0 %v1698_v21 }
 0xa5f   : > { %v1676_v42 = vpop.f32.mrf.mxu2 }
 0xaad   : > { %v1694_v19 = vpop.xlane.xlu1 %1693 }
 0xaae   : > { %v1701_v22 = vmul.f32 %v1694_v19, %v3443_v8 }
 0xab0   : > { %v1704_v27 = vsub.f32 %v3780_v5, %v1701_v22 }
 0xab2   : > { %v1707_v23 = vmul.f32 %v1704_v27, %v1704_v27 }
 0xab4   : > { %v1710_v25 = vsel %vm695_vm1, %v1707_v23, 0.0 }
 0xab5   : > { %1711 = vadd.xlane.f32.xlu1 %v1710_v25  ;;  %v1697_v60 = vpop.xlane.xlu2 %1696 }
 0xab6   : > { %v1702_v18 = vmul.f32 %v1697_v60, %v3443_v8 }
 0xab8   : > { %v1705_v35 = vsub.f32 %v3785_v20, %v1702_v18  ;;  %v2966_v18 = vld [vmem:[%s4255_s6 + $0x1] ss:$0 sm:$0xff]  ;;  %s3126_s6 = scalar_lea.hbm %s3125_s5, 1 }
 0xab9   : > { %p3127_p11 = scmp.ne.s32.totalorder %s3125_s5, %s3126_s6 }
 0xaba   : > { %v1708_v26 = vmul.f32 %v1705_v35, %v1705_v35 }
 0xabb   : > { %p3128_p12 = pnand %p3127_p11, %p3325_p5 }
 0xabc   : > { %v1713_v29 = vsel %vm695_vm1, %v1708_v26, 0.0 }
 0xabd   : > { %1714 = vadd.xlane.f32.xlu2 %v1713_v29  ;;  %p3129_p13 = pneg %p3128_p12 }
 0xad0   : > { %v1700_v52 = vpop.xlane.xlu0 %1699 }
 0xad1   : > { %v1703_v1 = vmul.f32 %v1700_v52, %v3443_v8 }
 0xad3   : > { %v3802_v30 = vsub.f32 %v3790_v17, %v1703_v1 }
 0xad5   : > { %v1709_v31 = vmul.f32 %v3802_v30, %v3802_v30 }
 0xad7   : > { %v1716_v32 = vsel %vm702_vm2, %v1709_v31, 0.0 }
 0xad8   : > { %1717 = vadd.xlane.f32.xlu0 %v1716_v32 }
 0xb28   : > { %v1712_v53 = vpop.xlane.xlu1 %1711 }
 0xb29   : > { %v1719_v36 = vmul.f32 %v1712_v53, %v3443_v8 }
 0xb2b   : > { %v1722_v38 = vadd.f32 1e-06, %v1719_v36 }
 0xb2d   : > { %3042 = vrsqrt.f32 %v1722_v38  ;;  %vm1731_vm9 = vweird.f32 %v1722_v38 }
 0xb30   : > { %v1715_v4 = vpop.xlane.xlu2 %1714 }
 0xb31   : > { %v1720_v39 = vmul.f32 %v1715_v4, %v3443_v8 }
 0xb33   : > { %v3043_v43 = vpop.eup %3042  ;;  %v1723_v45 = vadd.f32 1e-06, %v1720_v39 }
 0xb34   : > { %v1726_v63 = vmul.f32 %v3043_v43, %v1722_v38  ;;  %vm1732_vm8 = vweird.f32 %v3043_v43 }
 0xb35   : > { %3044 = vrsqrt.f32 %v1723_v45  ;;  %vm1733_vm10 = vmor %vm1731_vm9, %vm1732_vm8  ;;  %vm1741_vm12 = vweird.f32 %v1723_v45 }
 0xb36   : > { %v1727_v46 = vmul.f32 %v3043_v43, %v1726_v63 }
 0xb38   : > { %v1728_v48 = vmul.f32 0.5, %v1727_v46 }
 0xb3a   : > { %v1729_v47 = vsub.f32 1.5, %v1728_v48 }
 0xb3b   : > { %v3045_v49 = vpop.eup %3044 }
 0xb3c   : > { %v1730_v50 = vmul.f32 %v3043_v43, %v1729_v47  ;;  %v1736_v54 = vmul.f32 %v3045_v49, %v1723_v45  ;;  %vm1742_vm11 = vweird.f32 %v3045_v49 }
 0xb3d   : > { %vm1743_vm13 = vmor %vm1741_vm12, %vm1742_vm11 }
 0xb3e   : > { %v1737_v55 = vmul.f32 %v3045_v49, %v1736_v54  ;;  %v1734_v56 = vsel %vm1733_vm10, %v3043_v43, %v1730_v50 }
 0xb3f   : > { %v1755_v2 = vmul.f32 %v1734_v56, %v1704_v27 }
 0xb40   : > { %v1738_v57 = vmul.f32 0.5, %v1737_v55 }
 0xb41   : > { %v1761_v7 = vmul.f32 %v2964_v0, %v1755_v2 }
 0xb42   : > { %v1739_v62 = vsub.f32 1.5, %v1738_v57 }
 0xb43   : > { %v1767_v12 = vadd.f32 %v2965_v6, %v1761_v7 }
 0xb44   : > { %v1740_v44 = vmul.f32 %v3045_v49, %v1739_v62 }
 0xb46   : > { %v1744_v3 = vsel %vm1743_vm13, %v3045_v49, %v1740_v44 }
 0xb47   : > { %v1756_v9 = vmul.f32 %v1744_v3, %v1705_v35 }
 0xb49   : > { %v1762_v10 = vmul.f32 %v2964_v0, %v1756_v9 }
 0xb4b   : > { %v1718_v11 = vpop.xlane.xlu0 %1717  ;;  %v1768_v13 = vadd.f32 %v2965_v6, %v1762_v10 }
 0xb4c   : > { %v1721_v59 = vmul.f32 %v1718_v11, %v3443_v8 }
 0xb4d   : > { %v1775_v14 = vpack.c.bf16 %v1768_v13, %v1767_v12  ;;  %v2848_v13 = vld [vmem:[%s4191_s7 + $0x20] sm:$0xff] }
 0xb4e   : > { %v1724_v41 = vadd.f32 1e-06, %v1721_v59  ;;  %v1925_v59 = vpack.c.bf16 %v2848_v13, %v2848_v13 }
 0xb4f   : > { %2846 = vmatmul.msk.bf16.vlgmr.msra.gmra.mxu1 %vm695_vm1, %v1775_v14 }
 0xb50   : > { %3046 = vrsqrt.f32 %v1724_v41  ;;  %vm1751_vm6 = vweird.f32 %v1724_v41  ;;  %v2070_v14 = vsel %vm1057_vm4, %v1925_v59, 0 }
 0xb56   : > { %v3047_v61 = vpop.eup %3046 }
 0xb57   : > { %v1746_v15 = vmul.f32 %v3047_v61, %v1724_v41  ;;  %vm1752_vm5 = vweird.f32 %v3047_v61 }
 0xb58   : > { %vm1753_vm7 = vmor %vm1751_vm6, %vm1752_vm5 }
 0xb59   : > { %v1747_v16 = vmul.f32 %v3047_v61, %v1746_v15 }
 0xb5b   : > { %v1748_v51 = vmul.f32 0.5, %v1747_v16 }
 0xb5d   : > { %v1749_v21 = vsub.f32 1.5, %v1748_v51 }
 0xb5f   : > { %v1750_v42 = vmul.f32 %v3047_v61, %v1749_v21 }
 0xb61   : > { %v1754_v19 = vsel %vm1753_vm7, %v3047_v61, %v1750_v42 }
 0xb62   : > { %v1757_v22 = vmul.f32 %v1754_v19, %v3802_v30 }
 0xb64   : > { %v1763_v27 = vmul.f32 %v2964_v0, %v1757_v22 }
 0xb66   : > { %v1769_v23 = vadd.f32 %v2965_v6, %v1763_v27 }
 0xb68   : > { %v1776_v25 = vpack.c.bf16 %v1769_v23, %v1769_v23 }
 0xb6a   : > { %2847 = vmatmul.msk.bf16.gmra.mxu1 %vm695_vm1, %v1776_v25 }
 0xbcc   : > { %v1799_v60 = vpop.f32.mrf.mxu1 }
 0xbcd   : > { %v1800_v35 = vadd.f32 %v2966_v18, %v1799_v60 }
 0xbcf   : > { %v1813_v52 = vmul.f32 0.35355338, %v1800_v35 }
 0xbd4   : > { %v1801_v26 = vpop.f32.mrf.mxu1 }
 0xbd5   : > { %v1802_v29 = vadd.f32 %v2966_v18, %v1801_v26 }
 0xbd7   : > { %v1814_v1 = vmul.f32 0.35355338, %v1802_v29  ;;  %v3834_v31 = vpack.c.bf16 %v1802_v29, %v1800_v35 }
 0xbd9   : > { %v3836_v32 = vpack.c.bf16 %v1814_v1, %v1813_v52  ;;  %1822 = vrot.lane.b32.xlu2 %v3834_v31, %s3175_s20 }
 0xbe7   : > { %v1804_v30 = vpop.f32.mrf.mxu1 }
 0xbe8   : > { %v1805_v33 = vadd.f32 %v2966_v18, %v1804_v30 }
 0xbea   : > { %v3840_v34 = vpack.c.bf16 %v1805_v33, %v1805_v33  ;;  %v1815_v38 = vmul.f32 0.35355338, %v1805_v33 }
 0xbec   : > { %1824 = vrot.lane.b32.xlu1 %v3840_v34, %s3175_s20  ;;  %v3848_v40 = vpack.c.bf16 %v1815_v38, %v1815_v38  ;;  %s4256_s20 = smov 120  }
 0xbef   : > { %v1806_v58 = vpop.f32.mrf.mxu1 }
 0xc33   : > { %v1823_v24 = vpop.permute.xlu2 %1822 }
 0xc34   : > { %v1833_v37 = vsel %vm835_vm14, %v1823_v24, 0 }
 0xc5e   : > { %v1825_v53 = vpop.permute.xlu1 %1824 }
 0xc5f   : > { %v1836_v36 = vsel %vm835_vm14, %v1825_v53, 0 }
 0xc60   : > { %1844 = vmatpush.bf16.xpose.msra.mxu3 %v1836_v36 }
 0xc68   : > { %1845 = vmatpush.bf16.xpose.msra.mxu3 %v1833_v37 }
 0xc6f   : > { %2852 = vmatmul.msk.bf16.vlgmr.msra.gmra.mxu3 %vm835_vm14, %v3836_v32 }
 0xc7f   : > { %2853 = vmatmul.msk.bf16.gmra.mxu3 %vm835_vm14, %v3848_v40 }
 0xcf2   : > { %v1847_v4 = vpop.f32.mrf.mxu3 }
 0xcf3   : > { %v1856_v39 = vsel %vm866_vm15, %v1847_v4, -inf }
 0xcf4   : > { %1857 = vmax.xlane.f32.xlu0 %v1856_v39 }
 0xcfa   : > { %v1849_v43 = vpop.f32.mrf.mxu3 }
 0xcfb   : > { %v1859_v45 = vsel %vm866_vm15, %v1849_v43, -inf }
 0xcfc   : > { %1860 = vmax.xlane.f32.xlu0 %v1859_v45 }
 0xd02   : > { %v1852_v63 = vpop.f32.mrf.mxu3 }
 0xd03   : > { %v1862_v46 = vsel %vm873_vm3, %v1852_v63, -inf }
 0xd04   : > { %1863 = vmax.xlane.f32.xlu0 %v1862_v46 }
 0xd0a   : > { %v1854_v48 = vpop.f32.mrf.mxu3 }
 0xd18   : > { %1893 = vrot.lane.b32.xlu0 %v3840_v34, %s3176_s2 }
 0xd20   : > { %1891 = vrot.lane.b32.xlu0 %v3834_v31, %s3176_s2  ;;  %s4257_s2 = smov 72  }
 0xd67   : > { %v1858_v47 = vpop.xlane.xlu0 %1857 }
 0xd68   : > { %v1865_v49 = vsub.f32 %v1847_v4, %v1858_v47 }
 0xd6a   : > { %v1868_v50 = vmul.f32 1.442695, %v1865_v49 }
 0xd6c   : > { %3048 = vpow2.f32 %v1868_v50 }
 0xd6f   : > { %v1861_v54 = vpop.xlane.xlu0 %1860 }
 0xd70   : > { %v1866_v55 = vsub.f32 %v1849_v43, %v1861_v54 }
 0xd72   : > { %v3049_v56 = vpop.eup %3048  ;;  %v1870_v57 = vmul.f32 1.442695, %v1866_v55 }
 0xd73   : > { %v1874_v62 = vsel %vm866_vm15, %v3049_v56, 0.0 }
 0xd74   : > { %3050 = vpow2.f32 %v1870_v57  ;;  %1875 = vadd.xlane.f32.xlu1 %v1874_v62 }
 0xd77   : > { %v1864_v0 = vpop.xlane.xlu0 %1863 }
 0xd78   : > { %v1867_v2 = vsub.f32 %v1852_v63, %v1864_v0 }
 0xd7a   : > { %v3051_v44 = vpop.eup %3050  ;;  %v1872_v3 = vmul.f32 1.442695, %v1867_v2 }
 0xd7b   : > { %v1877_v6 = vsel %vm866_vm15, %v3051_v44, 0.0 }
 0xd7c   : > { %3052 = vpow2.f32 %v1872_v3  ;;  %1878 = vadd.xlane.f32.xlu2 %v1877_v6 }
 0xd82   : > { %v3053_v7 = vpop.eup %3052 }
 0xd83   : > { %v1880_v9 = vsel %vm873_vm3, %v3053_v7, 0.0 }
 0xd84   : > { %1881 = vadd.xlane.f32.xlu0 %v1880_v9 }
 0xd8a   : > { %v1894_v10 = vpop.permute.xlu0 %1893 }
 0xd8b   : > { %v1903_v11 = vand.u32 %v1894_v10, %v3497_v28 }
 0xd8d   : > { %1934 = vrot.lane.b32.xlu1 %v3840_v34, %s3178_s27  ;;  %1911 = vmatpush.bf16.msra.mxu0 %v1903_v11 }
 0xd92   : > { %v1892_v12 = vpop.permute.xlu0 %1891 }
 0xd93   : > { %1912 = vmatpush.bf16.msra.mxu0 %v1892_v12 }
 0xd94   : > { %1932 = vrot.lane.b32.xlu2 %v3834_v31, %s3178_s27  ;;  %s4260_s27 = smov 104  }
 0xd95   : > { %1930 = vrot.lane.b32.xlu1 %v3848_v40, %s4256_s20 }
 0xd97   : > { %2079 = vmatpush.bf16.msrb.mxu0 %v2070_v14 }
 0xd98   : > { %2234 = vrot.lane.b32.xlu0 %v3840_v34, %s4257_s2 }
 0xd9c   : > { %1928 = vrot.lane.b32.xlu2 %v3836_v32, %s4256_s20 }
 0xd9d   : > { %2094 = vrot.lane.b32.xlu1 %v3834_v31, %s4258_s23 }
 0xda4   : > { %2096 = vrot.lane.b32.xlu2 %v3840_v34, %s4258_s23  ;;  %s4264_s23 = sld [smem:[#allocation19_spill]] }
 0xda5   : > { %2232 = vrot.lane.b32.xlu1 %v3834_v31, %s4257_s2 }
 0xdac   : > { %2090 = vrot.lane.b32.xlu2 %v3836_v32, %s4259_s21 }
 0xdad   : > { %2092 = vrot.lane.b32.xlu1 %v3848_v40, %s4259_s21 }
 0xdb4   : > { %2228 = vrot.lane.b32.xlu2 %v3836_v32, %s4260_s27 }
 0xde7   : > { %v1876_v41 = vpop.xlane.xlu1 %1875 }
 0xde8   : > { %3054 = vrcp.f32 %v1876_v41 }
 0xdee   : > { %v3055_v15 = vpop.eup %3054 }
 0xdef   : > { %v1879_v61 = vpop.xlane.xlu2 %1878  ;;  %v1886_v51 = vmul.f32 %v3055_v15, %v3049_v56 }
 0xdf0   : > { %3056 = vrcp.f32 %v1879_v61 }
 0xdf6   : > { %v3057_v16 = vpop.eup %3056 }
 0xdf7   : > { %v1887_v21 = vmul.f32 %v3057_v16, %v3051_v44  ;;  %v1933_v42 = vpop.permute.xlu2 %1932  ;;  %v1882_v22 = vpop.xlane.xlu0 %1881 }
 0xdf8   : > { %3058 = vrcp.f32 %v1882_v22  ;;  %v1943_v29 = vsel %vm835_vm14, %v1933_v42, 0 }
 0xdf9   : > { %v1889_v19 = vpack.c.bf16 %v1887_v21, %v1886_v51 }
 0xdfb   : > { %2854 = vmatmul.msk.bf16.vlgmr.msra.gmra.mxu0 %vm866_vm15, %v1889_v19 }
 0xdfe   : > { %v3059_v60 = vpop.eup %3058 }
 0xdff   : > { %v1935_v27 = vpop.permute.xlu1 %1934  ;;  %v1929_v23 = vpop.permute.xlu2 %1928  ;;  %v1888_v18 = vmul.f32 %v3059_v60, %v3053_v7 }
 0xe00   : > { %v1946_v25 = vsel %vm835_vm14, %v1935_v27, 0 }
 0xe01   : > { %1954 = vmatpush.bf16.xpose.msrb.mxu2 %v1946_v25  ;;  %v1890_v1 = vpack.c.bf16 %v1888_v18, %v1888_v18 }
 0xe07   : > { %v1931_v35 = vpop.permute.xlu1 %1930  ;;  %v2097_v26 = vpop.permute.xlu2 %2096 }
 0xe08   : > { %v2108_v52 = vsel %vm835_vm14, %v2097_v26, 0 }
 0xe09   : > { %1955 = vmatpush.bf16.xpose.msrb.mxu2 %v1943_v29 }
 0xe0a   : > { %v2235_v32 = vpop.permute.xlu0 %2234 }
 0xe0b   : > { %v2246_v30 = vsel %vm835_vm14, %v2235_v32, 0  ;;  %2855 = vmatmul.msk.bf16.gmra.mxu0 %vm866_vm15, %v1890_v1 }
 0xe0c   : > { %2254 = vmatpush.bf16.xpose.msra.mxu0 %v2246_v30 }
 0xe0f   : > { %v2095_v33 = vpop.permute.xlu1 %2094  ;;  %v2091_v24 = vpop.permute.xlu2 %2090 }
 0xe10   : > { %v2105_v58 = vsel %vm835_vm14, %v2095_v33, 0  ;;  %2856 = vmatmul.msk.bf16.vlgmr.msrb.gmra.mxu2 %vm835_vm14, %v1929_v23 }
 0xe11   : > { %2116 = vmatpush.bf16.xpose.msra.mxu2 %v2108_v52 }
 0xe17   : > { %v2233_v53 = vpop.permute.xlu1 %2232  ;;  %v2229_v50 = vpop.permute.xlu2 %2228 }
 0xe18   : > { %v2243_v36 = vsel %vm835_vm14, %v2233_v53, 0 }
 0xe19   : > { %2117 = vmatpush.bf16.xpose.msra.mxu2 %v2105_v58  ;;  %2255 = vmatpush.bf16.xpose.msra.mxu0 %v2243_v36 }
 0xe1f   : > { %v2093_v37 = vpop.permute.xlu1 %2092 }
 0xe20   : > { %2857 = vmatmul.msk.bf16.gmra.mxu2 %vm835_vm14, %v1931_v35 }
 0xe30   : > { %2864 = vmatmul.msk.bf16.vlgmr.msra.gmra.mxu2 %vm835_vm14, %v2091_v24 }
 0xe40   : > { %2865 = vmatmul.msk.bf16.gmra.mxu2 %vm835_vm14, %v2093_v37 }
 0xe78   : > { %v1914_v38 = vpop.f32.mrf.mxu0 }
 0xe80   : > { %v1916_v4 = vpop.f32.mrf.mxu0 }
 0xe81   : > { %v1923_v39 = vpack.c.bf16 %v1916_v4, %v1914_v38 }
 0xe83   : > { %2862 = vmatmul.msk.bf16.vlgmr.msrb.gmra.mxu0 %vm835_vm14, %v1923_v39 }
 0xe88   : > { %v1919_v43 = vpop.f32.mrf.mxu0 }
 0xe89   : > { %v1924_v63 = vpack.c.bf16 %v1919_v43, %v1919_v43 }
 0xe90   : > { %v1921_v45 = vpop.f32.mrf.mxu0 }
 0xe93   : > { %v1957_v46 = vpop.f32.mrf.mxu2  ;;  %2863 = vmatmul.msk.bf16.gmra.mxu0 %vm835_vm14, %v1924_v63 }
 0xe94   : > { %v1966_v48 = vsel %vm866_vm15, %v1957_v46, -inf }
 0xe95   : > { %1967 = vmax.xlane.f32.xlu0 %v1966_v48 }
 0xe9b   : > { %v1959_v47 = vpop.f32.mrf.mxu2 }
 0xe9c   : > { %v1969_v49 = vsel %vm866_vm15, %v1959_v47, -inf }
 0xe9d   : > { %1970 = vmax.xlane.f32.xlu2 %v1969_v49 }
 0xea3   : > { %v1962_v54 = vpop.f32.mrf.mxu2  ;;  %2870 = vmatmul.msk.bf16.vlgmr.msra.gmra.mxu0 %vm835_vm14, %v2229_v50 }
 0xea4   : > { %v1972_v55 = vsel %vm873_vm3, %v1962_v54, -inf }
 0xea5   : > { %1973 = vmax.xlane.f32.xlu1 %v1972_v55 }
 0xeab   : > { %v1964_v56 = vpop.f32.mrf.mxu2 }
 0xeb3   : > { %v2119_v57 = vpop.f32.mrf.mxu2 }
 0xeb4   : > { %v2128_v62 = vsel %vm866_vm15, %v2119_v57, -inf }
 0xeb5   : > { %2129 = vmax.xlane.f32.xlu0 %v2128_v62 }
 0xebb   : > { %v2121_v0 = vpop.f32.mrf.mxu2 }
 0xebc   : > { %v2131_v2 = vsel %vm866_vm15, %v2121_v0, -inf }
 0xebd   : > { %2132 = vmax.xlane.f32.xlu2 %v2131_v2 }
 0xec3   : > { %v3909_v44 = vpop.f32.mrf.mxu2 }
 0xec4   : > { %v2134_v36 = vsel %vm873_vm3, %v3909_v44, -inf }
 0xecb   : > { %v2126_v3 = vpop.f32.mrf.mxu2 }
 0xf00   : > { %v3911_v6 = vpop.f32.mrf.mxu0 }
 0xf08   : > { %v3913_v7 = vpop.f32.mrf.mxu0  ;;  %v1968_v9 = vpop.xlane.xlu0 %1967 }
 0xf09   : > { %v1975_v10 = vsub.f32 %v1957_v46, %v1968_v9 }
 0xf0b   : > { %v1978_v11 = vmul.f32 1.442695, %v1975_v10 }
 0xf0d   : > { %3060 = vpow2.f32 %v1978_v11 }
 0xf10   : > { %v1971_v12 = vpop.xlane.xlu2 %1970  ;;  %v3915_v13 = vpop.f32.mrf.mxu0 }
 0xf11   : > { %v1976_v59 = vsub.f32 %v1959_v47, %v1971_v12 }
 0xf13   : > { %v3917_v41 = vpop.eup %3060  ;;  %v1980_v14 = vmul.f32 1.442695, %v1976_v59 }
 0xf14   : > { %v1984_v61 = vsel %vm866_vm15, %v3917_v41, 0.0 }
 0xf15   : > { %3062 = vpow2.f32 %v1980_v14  ;;  %1985 = vadd.xlane.f32.xlu2 %v1984_v61 }
 0xf18   : > { %v1974_v15 = vpop.xlane.xlu1 %1973  ;;  %v2088_v16 = vpop.f32.mrf.mxu0 }
 0xf19   : > { %v1977_v21 = vsub.f32 %v1962_v54, %v1974_v15 }
 0xf1b   : > { %v3063_v51 = vpop.eup %3062  ;;  %v1982_v19 = vmul.f32 1.442695, %v1977_v21 }
 0xf1c   : > { %v1987_v42 = vsel %vm866_vm15, %v3063_v51, 0.0 }
 0xf1d   : > { %1988 = vadd.xlane.f32.xlu1 %v1987_v42  ;;  %3064 = vpow2.f32 %v1982_v19 }
 0xf20   : > { %v2257_v22 = vpop.f32.mrf.mxu0 }
 0xf21   : > { %v2266_v27 = vsel %vm866_vm15, %v2257_v22, -inf }
 0xf23   : > { %v3065_v60 = vpop.eup %3064 }
 0xf24   : > { %v1990_v29 = vsel %vm873_vm3, %v3065_v60, 0.0 }
 0xf25   : > { %2267 = vmax.xlane.f32.xlu1 %v2266_v27 }
 0xf28   : > { %v2259_v23 = vpop.f32.mrf.mxu0  ;;  %v2130_v25 = vpop.xlane.xlu0 %2129 }
 0xf29   : > { %v2137_v18 = vsub.f32 %v2119_v57, %v2130_v25  ;;  %v2269_v35 = vsel %vm866_vm15, %v2259_v23, -inf  ;;  %v2849_v25 = vld [vmem:[%s4191_s7 + $0x28] sm:$0xff] }
 0xf2a   : > { %2270 = vmax.xlane.f32.xlu0 %v2269_v35 }
 0xf2b   : > { %v2140_v26 = vmul.f32 1.442695, %v2137_v18 }
 0xf2d   : > { %3066 = vpow2.f32 %v2140_v26  ;;  %1991 = vadd.xlane.f32.xlu1 %v1990_v29  ;;  %2001 = vrot.lane.b32.xlu2 %v3834_v31, %s4261_s3 }
 0xf30   : > { %v2133_v52 = vpop.xlane.xlu2 %2132 }
 0xf31   : > { %v2138_v1 = vsub.f32 %v2121_v0, %v2133_v52 }
 0xf33   : > { %v3927_v32 = vpop.eup %3066  ;;  %v2142_v30 = vmul.f32 1.442695, %v2138_v1 }
 0xf34   : > { %v2146_v33 = vsel %vm866_vm15, %v3927_v32, 0.0 }
 0xf35   : > { %3068 = vpow2.f32 %v2142_v30  ;;  %2147 = vadd.xlane.f32.xlu1 %v2146_v33 }
 0xf3b   : > { %v3069_v58 = vpop.eup %3068 }
 0xf3c   : > { %v2149_v53 = vsel %vm866_vm15, %v3069_v58, 0.0 }
 0xf3d   : > { %2150 = vadd.xlane.f32.xlu1 %v2149_v53  ;;  %v2850_v53 = vld [vmem:[%s4191_s7 + $0x30] sm:$0xff] }
 0xf3e   : > { %2003 = vrot.lane.b32.xlu0 %v3840_v34, %s4261_s3  ;;  %s593_s3 = sand.u32 1, %s3164_s30  }
 0xf3f   : > { %s2732_s4 = scalar_lea.sflag [#allocation3], %s593_s3 }
 0xf56   : > { %2165 = vrot.lane.b32.xlu1 %v3840_v34, %s4262_s18 }
 0xf5e   : > { %2303 = vrot.lane.b32.xlu1 %v3840_v34, %s4263_s25 }
 0xf66   : > { %2163 = vrot.lane.b32.xlu1 %v3834_v31, %s4262_s18 }
 0xf88   : > { %v1986_v47 = vpop.xlane.xlu2 %1985 }
 0xf90   : > { %v1989_v24 = vpop.xlane.xlu1 %1988  ;;  %2135 = vmax.xlane.f32.xlu1 %v2134_v36  ;;  %v2002_v0 = vpop.permute.xlu2 %2001 }
 0xf98   : > { %v2268_v37 = vpop.xlane.xlu1 %2267 }
 0xf99   : > { %v2275_v38 = vsub.f32 %v2257_v22, %v2268_v37 }
 0xf9b   : > { %v2278_v4 = vmul.f32 1.442695, %v2275_v38 }
 0xf9d   : > { %3070 = vpow2.f32 %v2278_v4  ;;  %v2271_v39 = vpop.xlane.xlu0 %2270 }
 0xf9e   : > { %v2276_v43 = vsub.f32 %v2259_v23, %v2271_v39 }
 0xfa0   : > { %v2280_v45 = vmul.f32 1.442695, %v2276_v43  ;;  %v1992_v49 = vpop.xlane.xlu1 %1991 }
 0xfa2   : > { %3072 = vpow2.f32 %v2280_v45 }
 0xfa3   : > { %v3942_v63 = vpop.eup %3070  ;;  %3074 = vrcp.f32 %v1989_v24  ;;  %v2197_v24 = vpack.c.bf16 %v2850_v53, %v2850_v53 }
 0xfa4   : > { %v2284_v34 = vsel %vm866_vm15, %v3942_v63, 0.0  ;;  %3076 = vrcp.f32 %v1986_v47  ;;  %v2851_v47 = vld [vmem:[%s4191_s7 + $0x38] sm:$0xff] }
 0xfa5   : > { %2285 = vadd.xlane.f32.xlu0 %v2284_v34  ;;  %3078 = vrcp.f32 %v1992_v49  ;;  %v2205_v37 = vsel %vm1057_vm4, %v2197_v24, 0  ;;  %v2335_v49 = vpack.c.bf16 %v2851_v47, %v2851_v47 }
 0xfa8   : > { %v3073_v46 = vpop.eup %3072  ;;  %v2148_v2 = vpop.xlane.xlu1 %2147 }
 0xfa9   : > { %v2287_v48 = vsel %vm866_vm15, %v3073_v46, 0.0  ;;  %v3075_v54 = vpop.eup %3074 }
 0xfaa   : > { %2288 = vadd.xlane.f32.xlu2 %v2287_v48  ;;  %v3077_v56 = vpop.eup %3076  ;;  %v1997_v57 = vmul.f32 %v3075_v54, %v3063_v51  ;;  %v2343_v54 = vsel %vm1057_vm4, %v2335_v49, 0 }
 0xfab   : > { %v1996_v62 = vmul.f32 %v3077_v56, %v3917_v41  ;;  %v3079_v10 = vpop.eup %3078 }
 0xfac   : > { %v1998_v11 = vmul.f32 %v3079_v10, %v3065_v60  ;;  %v2035_v60 = vpack.c.bf16 %v2849_v25, %v2849_v25 }
 0xfad   : > { %v1999_v3 = vpack.c.bf16 %v1997_v57, %v1996_v62 }
 0xfae   : > { %v2000_v59 = vpack.c.bf16 %v1998_v11, %v1998_v11  ;;  %v2043_v35 = vsel %vm1057_vm4, %v2035_v60, 0 }
 0xfaf   : > { %2052 = vmatpush.bf16.msrb.mxu3 %v2043_v35 }
 0xfb0   : > { %v2004_v50 = vpop.permute.xlu0 %2003  ;;  %v2151_v9 = vpop.xlane.xlu1 %2150 }
 0xfb1   : > { %v2013_v55 = vand.u32 %v2004_v50, %v3497_v28  ;;  %3080 = vrcp.f32 %v2151_v9 }
 0xfb2   : > { %3082 = vrcp.f32 %v2148_v2 }
 0xfb3   : > { %2021 = vmatpush.bf16.msrb.mxu1 %v2013_v55  ;;  %2214 = vmatpush.bf16.msra.mxu3 %v2205_v37 }
 0xfb7   : > { %2022 = vmatpush.bf16.msrb.mxu1 %v2002_v0  ;;  %v3081_v61 = vpop.eup %3080 }
 0xfb8   : > { %v3083_v15 = vpop.eup %3082  ;;  %v2159_v16 = vmul.f32 %v3081_v61, %v3069_v58 }
 0xfb9   : > { %2301 = vrot.lane.b32.xlu0 %v3834_v31, %s4263_s25  ;;  %v2158_v51 = vmul.f32 %v3083_v15, %v3927_v32  ;;  %s3130_s25 = scalar_lea.hbm %s4203_s19, 2 }
 0xfba   : > { %2858 = vmatmul.msk.bf16.vlgmr.msrb.gmra.mxu1 %vm866_vm15, %v1999_v3  ;;  %p3132_p1 = scmp.lt.s32.totalorder %s3130_s25, %s3126_s6 }
 0xfbb   : > { %v2161_v21 = vpack.c.bf16 %v2159_v16, %v2158_v51 }
 0xfbc   : > { %p3133_p2 = por %p3132_p1, %p3131_p0 }
 0xfbe   : > { %p3134_p3 = pnand %p3133_p2, %p3129_p13 }
 0xfc2   : > { %2230 = vrot.lane.b32.xlu2 %v3848_v40, %s4260_s27  ;;  %s594_s27 = scalar_lea.vmem [#allocation2], %s593_s3 }
 0xfc3   : > { %s2742_s22 = sshll.u32 %s594_s27, 4  ;;  %s2743_s22 = int_to_ptr.vmem [resolvable:$true] %s2742_s22 }
 0xfc8   : > { %v2166_v12 = vpop.permute.xlu1 %2165 }
 0xfc9   : > { %v2175_v41 = vand.u32 %v2166_v12, %v3497_v28 }
 0xfca   : > { %2859 = vmatmul.msk.bf16.gmra.mxu1 %vm866_vm15, %v2000_v59 }
 0xfcb   : > { %2183 = vmatpush.bf16.msra.mxu1 %v2175_v41 }
 0xfd0   : > { %v2304_v14 = vpop.permute.xlu1 %2303 }
 0xfd1   : > { %v2313_v31 = vand.u32 %v2304_v14, %v3497_v28 }
 0xfd3   : > { %2321 = vmatpush.bf16.msrb.mxu2 %v2313_v31 }
 0xfd8   : > { %v2164_v40 = vpop.permute.xlu1 %2163 }
 0xfd9   : > { %2184 = vmatpush.bf16.msra.mxu1 %v2164_v40 }
 0xfdc   : > { %2866 = vmatmul.msk.bf16.vlgmr.msra.gmra.mxu1 %vm866_vm15, %v2161_v21 }
 0xfdd   : > { %2352 = vmatpush.bf16.msrb.mxu1 %v2343_v54 }
0x1003   : > { %v2136_v42 = vpop.xlane.xlu1 %2135 }
0x1004   : > { %v2139_v19 = vsub.f32 %v3909_v44, %v2136_v42 }
0x1006   : > { %v2144_v22 = vmul.f32 1.442695, %v2139_v19 }
0x1008   : > { %3084 = vpow2.f32 %v2144_v22  ;;  %v3988_v22 = vld [vmem:[%s4192_s8 + $0x1] ss:$0 sm:$0xff] }
0x100e   : > { %v3085_v27 = vpop.eup %3084 }
0x100f   : > { %v2152_v23 = vsel %vm873_vm3, %v3085_v27, 0.0 }
0x1010   : > { %2153 = vadd.xlane.f32.xlu0 %v2152_v23 }
0x1018   : > { %v2286_v18 = vpop.xlane.xlu0 %2285 }
0x101d   : > { %v2289_v28 = vpop.xlane.xlu2 %2288 }
0x101e   : > { %3086 = vrcp.f32 %v2289_v28 }
0x101f   : > { %3088 = vrcp.f32 %v2286_v18 }
0x1024   : > { %v3087_v44 = vpop.eup %3086 }
0x1025   : > { %v2231_v26 = vpop.permute.xlu2 %2230  ;;  %v3089_v29 = vpop.eup %3088  ;;  %v2297_v52 = vmul.f32 %v3087_v44, %v3073_v46 }
0x1026   : > { %2871 = vmatmul.msk.bf16.gmra.mxu0 %vm835_vm14, %v2231_v26  ;;  %v2296_v1 = vmul.f32 %v3089_v29, %v3942_v63 }
0x1028   : > { %v2299_v30 = vpack.c.bf16 %v2297_v52, %v2296_v1 }
0x102b   : > { %v2302_v32 = vpop.permute.xlu0 %2301 }
0x102c   : > { %2322 = vmatpush.bf16.msrb.mxu2 %v2302_v32 }
0x102f   : > { %2872 = vmatmul.msk.bf16.vlgmr.msrb.gmra.mxu2 %vm866_vm15, %v2299_v30 }
0x1037   : > { %v2024_v33 = vpop.f32.mrf.mxu1 }
0x103f   : > { %v2026_v58 = vpop.f32.mrf.mxu1 }
0x1040   : > { %v2033_v36 = vpack.c.bf16 %v2026_v58, %v2024_v33 }
0x1042   : > { %2860 = vmatmul.msk.bf16.vlgmr.msrb.gmra.mxu3 %vm835_vm14, %v2033_v36 }
0x1047   : > { %v2029_v38 = vpop.f32.mrf.mxu1 }
0x1048   : > { %v2034_v39 = vpack.c.bf16 %v2029_v38, %v2029_v38 }
0x104f   : > { %v2031_v4 = vpop.f32.mrf.mxu1 }
0x1052   : > { %2861 = vmatmul.msk.bf16.gmra.mxu3 %vm835_vm14, %v2034_v39 }
0x1059   : > { %v2186_v43 = vpop.f32.mrf.mxu1 }
0x1061   : > { %v2188_v45 = vpop.f32.mrf.mxu1 }
0x1062   : > { %v2195_v63 = vpack.c.bf16 %v2188_v45, %v2186_v43 }
0x1064   : > { %2868 = vmatmul.msk.bf16.vlgmr.msra.gmra.mxu3 %vm835_vm14, %v2195_v63 }
0x1083   : > { %v2154_v34 = vpop.xlane.xlu0 %2153 }
0x1084   : > { %3090 = vrcp.f32 %v2154_v34 }
0x108a   : > { %v3091_v46 = vpop.eup %3090 }
0x108b   : > { %v2160_v48 = vmul.f32 %v3091_v46, %v3085_v27  ;;  %v2881_v46 = vld [vmem:[%s4195_s11 + $0x30] sm:$0xff] }
0x108d   : > { %v2162_v50 = vpack.c.bf16 %v2160_v48, %v2160_v48  ;;  %v2882_v48 = vld [vmem:[%s4195_s11 + $0x38] sm:$0xff] }
0x108e   : > { %v2467_v49 = vpack.c.bf16 %v2882_v48, %v2881_v46 }
0x108f   : > { %2867 = vmatmul.msk.bf16.gmra.mxu1 %vm866_vm15, %v2162_v50 }
0x1090   : > { %2485 = vmatpush.bf16.msrb.mxu3 %v2467_v49 }
0x10a3   : > { %v2262_v55 = vpop.f32.mrf.mxu0 }
0x10a4   : > { %v2272_v56 = vsel %vm873_vm3, %v2262_v55, -inf }
0x10a5   : > { %2273 = vmax.xlane.f32.xlu2 %v2272_v56  ;;  %v2880_v56 = vld [vmem:[%s4195_s11 + $0x28] sm:$0xff] }
0x10ab   : > { %v2264_v57 = vpop.f32.mrf.mxu0 }
0x10b2   : > { %v2324_v62 = vpop.f32.mrf.mxu2 }
0x10ba   : > { %v2326_v0 = vpop.f32.mrf.mxu2 }
0x10bb   : > { %v2333_v2 = vpack.c.bf16 %v2326_v0, %v2324_v62 }
0x10bd   : > { %2874 = vmatmul.msk.bf16.vlgmr.msrb.gmra.mxu1 %vm835_vm14, %v2333_v2 }
0x10c5   : > { %v2054_v3 = vpop.f32.mrf.mxu3 }
0x10c6   : > { %v2082_v40 = vadd.f32 %v3911_v6, %v2054_v3 }
0x10cd   : > { %v2056_v9 = vpop.f32.mrf.mxu3 }
0x10ce   : > { %v2084_v28 = vadd.f32 %v3913_v7, %v2056_v9 }
0x10d5   : > { %v2059_v10 = vpop.f32.mrf.mxu3 }
0x10dd   : > { %v2061_v11 = vpop.f32.mrf.mxu3 }
0x10e7   : > { %v2216_v51 = vpop.f32.mrf.mxu3 }
0x10e8   : > { %v2225_v21 = vadd.f32 %v2216_v51, %v2082_v40  ;;  %v4027_v51 = vld [vmem:[%s4193_s9 + $0x1] ss:$0 sm:$0xff] }
0x10ef   : > { %v2218_v23 = vpop.f32.mrf.mxu3 }
0x10f0   : > { %v2226_v60 = vadd.f32 %v2218_v23, %v2084_v28 }
0x110c   : > { %v2191_v12 = vpop.f32.mrf.mxu1 }
0x110d   : > { %v2196_v59 = vpack.c.bf16 %v2191_v12, %v2191_v12 }
0x110f   : > { %2869 = vmatmul.msk.bf16.gmra.mxu3 %vm835_vm14, %v2196_v59 }
0x1114   : > { %v2193_v41 = vpop.f32.mrf.mxu1 }
0x1118   : > { %v2274_v14 = vpop.xlane.xlu2 %2273 }
0x1119   : > { %v2277_v31 = vsub.f32 %v2262_v55, %v2274_v14  ;;  %v2879_v55 = vld [vmem:[%s4195_s11 + $0x20] sm:$0xff] }
0x111a   : > { %v2466_v57 = vpack.c.bf16 %v2880_v56, %v2879_v55  ;;  %v2893_v56 = vld [vmem:[%s4197_s13 + $0x60] sm:$0xff] }
0x111b   : > { %v2282_v61 = vmul.f32 1.442695, %v2277_v31 }
0x111c   : > { %2486 = vmatpush.bf16.msrb.mxu3 %v2466_v57  ;;  %v2894_v57 = vld [vmem:[%s4197_s13 + $0x68] sm:$0xff] }
0x111d   : > { %3092 = vpow2.f32 %v2282_v61 }
0x1123   : > { %v3093_v15 = vpop.eup %3092 }
0x1124   : > { %v2290_v16 = vsel %vm873_vm3, %v3093_v15, 0.0 }
0x1125   : > { %2291 = vadd.xlane.f32.xlu1 %v2290_v16 }
0x113a   : > { %v2354_v42 = vpop.f32.mrf.mxu1 }
0x113b   : > { %v2363_v19 = vadd.f32 %v2354_v42, %v2225_v21 }
0x113d   : > { %v2366_v27 = vadd.f32 %v2363_v19, %v3780_v5  ;;  %v2087_v5 = vadd.f32 %v3915_v13, %v2059_v10  ;;  %v4032_v19 = vld [vmem:[%s4194_s10 + $0x1] ss:$0 sm:$0xff] }
0x113f   : > { %v3993_v25 = vadd.f32 %v3988_v22, %v2366_v27 }
0x1141   : > { %v2381_v6 = vsel %vm695_vm1, %v3993_v25, 0.0 }
0x1142   : > { %v2356_v18 = vpop.f32.mrf.mxu1  ;;  %2382 = vadd.xlane.f32.xlu1 %v2381_v6 }
0x1143   : > { %v2364_v35 = vadd.f32 %v2356_v18, %v2226_v60 }
0x1145   : > { %v2367_v26 = vadd.f32 %v2364_v35, %v3785_v20 }
0x1147   : > { %v2375_v44 = vadd.f32 %v3988_v22, %v2367_v26 }
0x1149   : > { %v2384_v29 = vsel %vm695_vm1, %v2375_v44, 0.0 }
0x114a   : > { %2385 = vadd.xlane.f32.xlu0 %v2384_v29 }
0x1192   : > { %v2221_v7 = vpop.f32.mrf.mxu3 }
0x1193   : > { %v4001_v52 = vadd.f32 %v2221_v7, %v2087_v5 }
0x1198   : > { %v2292_v1 = vpop.xlane.xlu1 %2291 }
0x1199   : > { %3094 = vrcp.f32 %v2292_v1  ;;  %v4049_v1 = vld [vmem:[%s4196_s12 + $0x1] ss:$0 sm:$0xff] }
0x119a   : > { %v2223_v32 = vpop.f32.mrf.mxu3 }
0x119f   : > { %v3095_v30 = vpop.eup %3094 }
0x11a0   : > { %v2298_v33 = vmul.f32 %v3095_v30, %v3093_v15 }
0x11a2   : > { %v2300_v58 = vpack.c.bf16 %v2298_v33, %v2298_v33 }
0x11a4   : > { %2873 = vmatmul.msk.bf16.gmra.mxu2 %vm866_vm15, %v2300_v58 }
0x11b5   : > { %v2383_v53 = vpop.xlane.xlu1 %2382 }
0x11b6   : > { %v2390_v20 = vmul.f32 %v2383_v53, %v3443_v8 }
0x11b8   : > { %v2393_v36 = vsub.f32 %v3993_v25, %v2390_v20 }
0x11ba   : > { %v2396_v24 = vmul.f32 %v2393_v36, %v2393_v36 }
0x11bc   : > { %v2399_v37 = vsel %vm695_vm1, %v2396_v24, 0.0 }
0x11bd   : > { %2400 = vadd.xlane.f32.xlu1 %v2399_v37  ;;  %v2386_v13 = vpop.xlane.xlu0 %2385 }
0x11be   : > { %v2391_v38 = vmul.f32 %v2386_v13, %v3443_v8 }
0x11c0   : > { %v2394_v4 = vsub.f32 %v2375_v44, %v2391_v38 }
0x11c2   : > { %v2397_v39 = vmul.f32 %v2394_v4, %v2394_v4 }
0x11c4   : > { %v2402_v43 = vsel %vm695_vm1, %v2397_v39, 0.0 }
0x11c5   : > { %2403 = vadd.xlane.f32.xlu2 %v2402_v43 }
0x1227   : > { %v2329_v45 = vpop.f32.mrf.mxu2 }
0x1228   : > { %v2334_v63 = vpack.c.bf16 %v2329_v45, %v2329_v45  ;;  %v2895_v45 = vld [vmem:[%s4197_s13 + $0x70] sm:$0xff] }
0x122a   : > { %2875 = vmatmul.msk.bf16.gmra.mxu1 %vm835_vm14, %v2334_v63  ;;  %v2896_v63 = vld [vmem:[%s4197_s13 + $0x78] sm:$0xff] }
0x122b   : > { %v2643_v46 = vpack.c.bf16 %v2896_v63, %v2895_v45 }
0x122d   : > { %2654 = vmatpush.bf16.msrb.mxu0 %v2643_v46 }
0x122f   : > { %v2331_v34 = vpop.f32.mrf.mxu2 }
0x1230   : > { %v2401_v47 = vpop.xlane.xlu1 %2400 }
0x1231   : > { %v2408_v50 = vmul.f32 %v2401_v47, %v3443_v8 }
0x1233   : > { %v2411_v54 = vadd.f32 1e-06, %v2408_v50 }
0x1235   : > { %3096 = vrsqrt.f32 %v2411_v54  ;;  %vm2420_vm15 = vweird.f32 %v2411_v54 }
0x1238   : > { %v2404_v62 = vpop.xlane.xlu2 %2403 }
0x1239   : > { %v2409_v0 = vmul.f32 %v2404_v62, %v3443_v8 }
0x123b   : > { %v3097_v2 = vpop.eup %3096  ;;  %v2412_v3 = vadd.f32 1e-06, %v2409_v0  ;;  %v2642_v0 = vpack.c.bf16 %v2894_v57, %v2893_v56 }
0x123c   : > { %v2415_v9 = vmul.f32 %v3097_v2, %v2411_v54  ;;  %vm2421_vm14 = vweird.f32 %v3097_v2 }
0x123d   : > { %3098 = vrsqrt.f32 %v2412_v3  ;;  %vm2422_vm3 = vmor %vm2420_vm15, %vm2421_vm14  ;;  %vm2430_vm8 = vweird.f32 %v2412_v3  ;;  %2655 = vmatpush.bf16.msrb.mxu0 %v2642_v0 }
0x123e   : > { %v2416_v10 = vmul.f32 %v3097_v2, %v2415_v9 }
0x1240   : > { %v2417_v11 = vmul.f32 0.5, %v2416_v10 }
0x1242   : > { %v2418_v12 = vsub.f32 1.5, %v2417_v11 }
0x1243   : > { %v3099_v59 = vpop.eup %3098 }
0x1244   : > { %v2419_v41 = vmul.f32 %v3097_v2, %v2418_v12  ;;  %v2425_v14 = vmul.f32 %v3099_v59, %v2412_v3  ;;  %vm2431_vm4 = vweird.f32 %v3099_v59 }
0x1245   : > { %vm2432_vm9 = vmor %vm2430_vm8, %vm2431_vm4 }
0x1246   : > { %v2426_v31 = vmul.f32 %v3099_v59, %v2425_v14  ;;  %v2423_v61 = vsel %vm2422_vm3, %v3097_v2, %v2419_v41  ;;  %v2892_v41 = vld [vmem:[%s4197_s13 + $0x58] sm:$0xff] }
0x1247   : > { %v2444_v40 = vmul.f32 %v2423_v61, %v2393_v36 }
0x1248   : > { %v2427_v15 = vmul.f32 0.5, %v2426_v31 }
0x1249   : > { %v2450_v27 = vmul.f32 %v4027_v51, %v2444_v40 }
0x124a   : > { %v2428_v16 = vsub.f32 1.5, %v2427_v15 }
0x124b   : > { %v2456_v60 = vadd.f32 %v4032_v19, %v2450_v27  ;;  %v2890_v27 = vld [vmem:[%s4197_s13 + $0x48] sm:$0xff] }
0x124c   : > { %v2429_v21 = vmul.f32 %v3099_v59, %v2428_v16 }
0x124e   : > { %v2433_v42 = vsel %vm2432_vm9, %v3099_v59, %v2429_v21  ;;  %v2891_v59 = vld [vmem:[%s4197_s13 + $0x50] sm:$0xff] }
0x124f   : > { %v2445_v23 = vmul.f32 %v2433_v42, %v2394_v4  ;;  %v2641_v31 = vpack.c.bf16 %v2892_v41, %v2891_v59  ;;  %v2889_v42 = vld [vmem:[%s4197_s13 + $0x40] sm:$0xff] }
0x1251   : > { %v2451_v28 = vmul.f32 %v4027_v51, %v2445_v23  ;;  %2656 = vmatpush.bf16.msrb.mxu0 %v2641_v31 }
0x1253   : > { %v2457_v6 = vadd.f32 %v4032_v19, %v2451_v28  ;;  %v2640_v28 = vpack.c.bf16 %v2890_v27, %v2889_v42 }
0x1255   : > { %v2464_v18 = vpack.c.bf16 %v2457_v6, %v2456_v60  ;;  %2657 = vmatpush.bf16.msrb.mxu0 %v2640_v28 }
0x1257   : > { %2884 = vmatmul.msk.bf16.vlgmr.msrb.gmra.mxu3 %vm695_vm1, %v2464_v18 }
0x12a7   : > { %v2359_v35 = vpop.f32.mrf.mxu1 }
0x12a8   : > { %v2365_v26 = vadd.f32 %v2359_v35, %v4001_v52 }
0x12aa   : > { %v2368_v44 = vadd.f32 %v2365_v26, %v3790_v17 }
0x12ac   : > { %v4042_v29 = vadd.f32 %v3988_v22, %v2368_v44 }
0x12ae   : > { %v2387_v5 = vsel %vm702_vm2, %v4042_v29, 0.0 }
0x12af   : > { %v2361_v7 = vpop.f32.mrf.mxu1  ;;  %2388 = vadd.xlane.f32.xlu0 %v2387_v5 }
0x12da   : > { %v2488_v32 = vpop.f32.mrf.mxu3 }
0x12db   : > { %v4052_v30 = vadd.f32 %v4049_v1, %v2488_v32 }
0x12dd   : > { %v4055_v52 = vmul.f32 0.70710677, %v4052_v30 }
0x12df   : > { %v2503_v17 = vmul.f32 %v4055_v52, %v4055_v52 }
0x12e1   : > { %v2504_v22 = vmin.f32 %v2503_v17, 16.0 }
0x12e2   : > { %v2490_v33 = vpop.f32.mrf.mxu3 }
0x12e3   : > { %v2505_v58 = vmul.f32 2.1237322e-06, %v2504_v22  ;;  %v2516_v53 = vmul.f32 3.8918573e-05, %v2504_v22  ;;  %v4060_v20 = vadd.f32 %v4049_v1, %v2490_v33 }
0x12e5   : > { %v2506_v36 = vadd.f32 0.00028619796, %v2505_v58  ;;  %v2517_v24 = vadd.f32 0.001143296, %v2516_v53  ;;  %v4063_v37 = vmul.f32 0.70710677, %v4060_v20 }
0x12e7   : > { %v2518_v13 = vmul.f32 %v2517_v24, %v2504_v22  ;;  %v2543_v38 = vmul.f32 %v4063_v37, %v4063_v37  ;;  %v2507_v4 = vmul.f32 %v2506_v36, %v2504_v22 }
0x12e9   : > { %v2519_v39 = vadd.f32 0.014752088, %v2518_v13  ;;  %v4067_v43 = vmin.f32 %v2543_v38, 16.0  ;;  %v2508_v49 = vadd.f32 0.0036580483, %v2507_v4 }
0x12eb   : > { %v2520_v34 = vmul.f32 %v2519_v39, %v2504_v22  ;;  %v2545_v48 = vmul.f32 2.1237322e-06, %v4067_v43  ;;  %v2556_v47 = vmul.f32 3.8918573e-05, %v4067_v43  ;;  %v2509_v9 = vmul.f32 %v2508_v49, %v2504_v22 }
0x12ed   : > { %v2521_v50 = vadd.f32 0.112945676, %v2520_v34  ;;  %v2546_v54 = vadd.f32 0.00028619796, %v2545_v48  ;;  %v2557_v55 = vadd.f32 0.001143296, %v2556_v47 }
0x12ee   : > { %v2510_v15 = vadd.f32 0.05243302, %v2509_v9 }
0x12ef   : > { %v2522_v62 = vmul.f32 %v2521_v50, %v2504_v22  ;;  %v2547_v2 = vmul.f32 %v2546_v54, %v4067_v43  ;;  %v2558_v3 = vmul.f32 %v2557_v55, %v4067_v43 }
0x12f0   : > { %v2511_v60 = vmul.f32 %v2510_v15, %v2504_v22 }
0x12f1   : > { %v2523_v10 = vadd.f32 0.4994258, %v2522_v62  ;;  %v2548_v11 = vadd.f32 0.0036580483, %v2547_v2  ;;  %v2559_v12 = vadd.f32 0.014752088, %v2558_v3 }
0x12f2   : > { %v2512_v44 = vadd.f32 0.18741608, %v2511_v60 }
0x12f3   : > { %v2524_v14 = vmul.f32 %v2523_v10, %v2504_v22  ;;  %v2560_v61 = vmul.f32 %v2559_v12, %v4067_v43  ;;  %v2549_v40 = vmul.f32 %v2548_v11, %v4067_v43  ;;  %v2497_v10 = vmul.f32 0.5, %v4052_v30  ;;  %v2971_v30 = vld [vmem:[%s4198_s14 + $0x1] ss:$0 sm:$0xff] }
0x12f4   : > { %v2513_v33 = vmul.f32 %v2512_v44, %v2504_v22  ;;  %v2498_v11 = vmul.f32 0.5, %v4060_v20 }
0x12f5   : > { %v2525_v16 = vadd.f32 1.0, %v2524_v14  ;;  %v2561_v21 = vadd.f32 0.112945676, %v2560_v61  ;;  %v2550_v6 = vadd.f32 0.05243302, %v2549_v40 }
0x12f6   : > { %v2514_v38 = vadd.f32 1.1283791, %v2513_v33 }
0x12f7   : > { %3100 = vrcp.f32 %v2525_v16  ;;  %v2562_v23 = vmul.f32 %v2561_v21, %v4067_v43  ;;  %v2551_v7 = vmul.f32 %v2550_v6, %v4067_v43  ;;  %v2537_v53 = vand.u32 2147483648, %v2525_v16 }
0x12f8   : > { %v2535_v24 = vand.u32 2147483647, %v2525_v16  ;;  %vm2531_vm11 = vweird.f32 %v2525_v16  ;;  %v2515_v48 = vmul.f32 %v2514_v38, %v4055_v52 }
0x12f9   : > { %v2563_v18 = vadd.f32 0.4994258, %v2562_v23  ;;  %v2552_v36 = vadd.f32 0.18741608, %v2551_v7  ;;  %v2538_v45 = vor.u32 1.1754944e-38, %v2537_v53 }
0x12fa   : > { %vm2536_vm13 = vcmp.eq.f32.partialorder %v2535_v24, 8.507059e+37 }
0x12fb   : > { %v2564_v35 = vmul.f32 %v2563_v18, %v4067_v43  ;;  %v2553_v63 = vmul.f32 %v2552_v36, %v4067_v43 }
0x12fd   : > { %v3101_v26 = vpop.eup %3100  ;;  %v2565_v32 = vadd.f32 1.0, %v2564_v35  ;;  %v2554_v47 = vadd.f32 1.1283791, %v2553_v63 }
0x12fe   : > { %v2527_v5 = vmul.f32 %v3101_v26, %v2525_v16  ;;  %vm2532_vm10 = vweird.f32 %v3101_v26 }
0x12ff   : > { %3102 = vrcp.f32 %v2565_v32  ;;  %vm2533_vm12 = vmor %vm2531_vm11, %vm2532_vm10  ;;  %v2577_v49 = vand.u32 2147483648, %v2565_v32  ;;  %v2575_v55 = vand.u32 2147483647, %v2565_v32  ;;  %vm2571_vm6 = vweird.f32 %v2565_v32 }
0x1300   : > { %v2528_v17 = vsub.f32 1.0, %v2527_v5  ;;  %v2555_v0 = vmul.f32 %v2554_v47, %v4063_v37 }
0x1301   : > { %v2578_v57 = vor.u32 1.1754944e-38, %v2577_v49  ;;  %vm2576_vm14 = vcmp.eq.f32.partialorder %v2575_v55, 8.507059e+37 }
0x1302   : > { %v2529_v58 = vmul.f32 %v3101_v26, %v2528_v17 }
0x1304   : > { %v2530_v13 = vadd.f32 %v3101_v26, %v2529_v58 }
0x1305   : > { %v3103_v4 = vpop.eup %3102 }
0x1306   : > { %v2534_v39 = vsel %vm2533_vm12, %v3101_v26, %v2530_v13  ;;  %v2567_v34 = vmul.f32 %v3103_v4, %v2565_v32  ;;  %vm2572_vm5 = vweird.f32 %v3103_v4 }
0x1307   : > { %v2539_v46 = vsel %vm2536_vm13, %v2538_v45, %v2534_v39  ;;  %vm2573_vm7 = vmor %vm2571_vm6, %vm2572_vm5  ;;  %vm2729_vm13 = vcmask 73728  }
0x1308   : > { %v2568_v22 = vsub.f32 1.0, %v2567_v34  ;;  %v2540_v50 = vmul.f32 %v2539_v46, %v2515_v48 }
0x130a   : > { %v2569_v54 = vmul.f32 %v3103_v4, %v2568_v22  ;;  %v2886_v62 = vclamps-f32 %v2540_v50, 1.0 }
0x130c   : > { %v2570_v56 = vadd.f32 %v3103_v4, %v2569_v54  ;;  %v2623_v9 = vadd.f32 1.0, %v2886_v62 }
0x130e   : > { %v2574_v43 = vsel %vm2573_vm7, %v3103_v4, %v2570_v56  ;;  %v2626_v59 = vmul.f32 %v2623_v9, %v2497_v10 }
0x130f   : > { %v2579_v2 = vsel %vm2576_vm14, %v2578_v57, %v2574_v43 }
0x1310   : > { %v2580_v3 = vmul.f32 %v2579_v2, %v2555_v0 }
0x1312   : > { %v2887_v52 = vclamps-f32 %v2580_v3, 1.0 }
0x1314   : > { %v2624_v12 = vadd.f32 1.0, %v2887_v52 }
0x1316   : > { %v2627_v41 = vmul.f32 %v2624_v12, %v2498_v11 }
0x1318   : > { %v2638_v14 = vpack.c.bf16 %v2627_v41, %v2626_v59 }
0x131a   : > { %2897 = vmatmul.msk.bf16.vlgmr.msrb.gmra.mxu0 %vm650_vm0, %v2638_v14 }
0x1322   : > { %v2389_v31 = vpop.xlane.xlu0 %2388 }
0x1323   : > { %v2392_v61 = vmul.f32 %v2389_v31, %v3443_v8 }
0x1325   : > { %v2395_v37 = vsub.f32 %v4042_v29, %v2392_v61 }
0x1327   : > { %v2398_v15 = vmul.f32 %v2395_v37, %v2395_v37 }
0x1329   : > { %v2405_v16 = vsel %vm702_vm2, %v2398_v15, 0.0 }
0x132a   : > { %2406 = vadd.xlane.f32.xlu1 %v2405_v16 }
0x1397   : > { %v2659_v20 = vpop.f32.mrf.mxu0 }
0x1398   : > { %v2666_v40 = vadd.f32 %v2659_v20, %v3993_v25 }
0x139a   : > { %v2672_v21 = vadd.f32 %v2971_v30, %v2666_v40 }
0x139c   : > { %v2675_v27 = vsel %vm695_vm1, %v2672_v21, 0.0 }
0x139d   : > { %v2407_v42 = vpop.xlane.xlu1 %2406  ;;  %2676 = vadd.xlane.f32.xlu2 %v2675_v27  ;;  %v2707_v27 = vld [vmem:[%s4201_s17 + $0x10] sm:$0xff] }
0x139e   : > { %v2410_v23 = vmul.f32 %v2407_v42, %v3443_v8 }
0x139f   : > { %v2661_v29 = vpop.f32.mrf.mxu0 }
0x13a0   : > { %v2413_v28 = vadd.f32 1e-06, %v2410_v23  ;;  %v2708_v23 = vld [vmem:[%s4201_s17 + $0x18] sm:$0xff]  ;;  %v2705_v29 = vld [vmem:[%s4201_s17] sm:$0xff] }
0x13a2   : > { %3104 = vrsqrt.f32 %v2413_v28  ;;  %vm2440_vm15 = vweird.f32 %v2413_v28 }
0x13a8   : > { %v3105_v60 = vpop.eup %3104 }
0x13a9   : > { %v2435_v6 = vmul.f32 %v3105_v60, %v2413_v28  ;;  %vm2441_vm2 = vweird.f32 %v3105_v60  ;;  %v2711_v28 = vpack.c.bf16 %v2708_v23, %v2707_v27 }
0x13aa   : > { %vm2442_vm3 = vmor %vm2440_vm15, %vm2441_vm2 }
0x13ab   : > { %v2436_v18 = vmul.f32 %v3105_v60, %v2435_v6  ;;  %2722 = vmatpush.bf16.msra.mxu2 %v2711_v28 }
0x13ad   : > { %v2437_v35 = vmul.f32 0.5, %v2436_v18 }
0x13af   : > { %v2438_v26 = vsub.f32 1.5, %v2437_v35 }
0x13b1   : > { %v2439_v44 = vmul.f32 %v3105_v60, %v2438_v26 }
0x13b3   : > { %v2443_v25 = vsel %vm2442_vm3, %v3105_v60, %v2439_v44  ;;  %v2706_v60 = vld [vmem:[%s4201_s17 + $0x8] sm:$0xff] }
0x13b4   : > { %v2446_v5 = vmul.f32 %v2443_v25, %v2395_v37  ;;  %v2710_v6 = vpack.c.bf16 %v2706_v60, %v2705_v29 }
0x13b6   : > { %v2452_v7 = vmul.f32 %v4027_v51, %v2446_v5  ;;  %2723 = vmatpush.bf16.msra.mxu2 %v2710_v6 }
0x13b8   : > { %v2458_v32 = vadd.f32 %v4032_v19, %v2452_v7 }
0x13ba   : > { %v2465_v17 = vpack.c.bf16 %v2458_v32, %v2458_v32 }
0x13bc   : > { %2885 = vmatmul.msk.bf16.gmra.mxu3 %vm695_vm1, %v2465_v17 }
0x1410   : > { %v2677_v33 = vpop.xlane.xlu2 %2676 }
0x1411   : > { %v2678_v58 = vmul.f32 %v2677_v33, %v3443_v8  ;;  %v2972_v33 = vld [vmem:[%s4199_s15] ss:$0 sm:$0xff] }
0x1413   : > { %v4121_v53 = vsub.f32 %v2672_v21, %v2678_v58 }
0x1415   : > { %v2680_v36 = vmul.f32 %v4121_v53, %v4121_v53 }
0x1417   : > { %v2681_v24 = vsel %vm695_vm1, %v2680_v36, 0.0 }
0x1418   : > { %2682 = vadd.xlane.f32.xlu0 %v2681_v24 }
0x143f   : > { %v2493_v13 = vpop.f32.mrf.mxu3 }
0x1440   : > { %v2494_v38 = vadd.f32 %v4049_v1, %v2493_v13 }
0x1442   : > { %v2502_v51 = vmul.f32 0.70710677, %v2494_v38  ;;  %v2499_v20 = vmul.f32 0.5, %v2494_v38 }
0x1444   : > { %v2583_v4 = vmul.f32 %v2502_v51, %v2502_v51 }
0x1446   : > { %v2584_v19 = vmin.f32 %v2583_v4, 16.0 }
0x1447   : > { %v2495_v39 = vpop.f32.mrf.mxu3 }
0x1448   : > { %v2585_v45 = vmul.f32 2.1237322e-06, %v2584_v19  ;;  %v2596_v63 = vmul.f32 3.8918573e-05, %v2584_v19 }
0x144a   : > { %v2586_v34 = vadd.f32 0.00028619796, %v2585_v45  ;;  %v2597_v46 = vadd.f32 0.001143296, %v2596_v63 }
0x144c   : > { %v2587_v48 = vmul.f32 %v2586_v34, %v2584_v19  ;;  %v2598_v22 = vmul.f32 %v2597_v46, %v2584_v19 }
0x144e   : > { %v2599_v47 = vadd.f32 0.014752088, %v2598_v22  ;;  %v2588_v49 = vadd.f32 0.0036580483, %v2587_v48 }
0x1450   : > { %v2600_v50 = vmul.f32 %v2599_v47, %v2584_v19  ;;  %v2589_v55 = vmul.f32 %v2588_v49, %v2584_v19 }
0x1452   : > { %v2601_v54 = vadd.f32 0.112945676, %v2600_v50  ;;  %v2590_v62 = vadd.f32 0.05243302, %v2589_v55 }
0x1454   : > { %v2602_v56 = vmul.f32 %v2601_v54, %v2584_v19  ;;  %v2591_v43 = vmul.f32 %v2590_v62, %v2584_v19 }
0x1456   : > { %v2603_v57 = vadd.f32 0.4994258, %v2602_v56  ;;  %v2592_v2 = vadd.f32 0.18741608, %v2591_v43 }
0x1458   : > { %v2604_v0 = vmul.f32 %v2603_v57, %v2584_v19  ;;  %v2593_v9 = vmul.f32 %v2592_v2, %v2584_v19  ;;  %v2712_v19 = vld [vmem:[%s4264_s23] sm:$0x1] }
0x145a   : > { %v2605_v1 = vadd.f32 1.0, %v2604_v0  ;;  %v2594_v12 = vadd.f32 1.1283791, %v2593_v9 }
0x145c   : > { %3106 = vrcp.f32 %v2605_v1  ;;  %v2617_v11 = vand.u32 2147483648, %v2605_v1  ;;  %v2615_v41 = vand.u32 2147483647, %v2605_v1  ;;  %vm2611_vm8 = vweird.f32 %v2605_v1 }
0x145d   : > { %v2595_v61 = vmul.f32 %v2594_v12, %v2502_v51 }
0x145e   : > { %v2618_v31 = vor.u32 1.1754944e-38, %v2617_v11  ;;  %vm2616_vm10 = vcmp.eq.f32.partialorder %v2615_v41, 8.507059e+37 }
0x1462   : > { %v3107_v3 = vpop.eup %3106 }
0x1463   : > { %v2607_v52 = vmul.f32 %v3107_v3, %v2605_v1  ;;  %vm2612_vm4 = vweird.f32 %v3107_v3 }
0x1464   : > { %vm2613_vm9 = vmor %vm2611_vm8, %vm2612_vm4 }
0x1465   : > { %v2608_v10 = vsub.f32 1.0, %v2607_v52 }
0x1467   : > { %v2609_v59 = vmul.f32 %v3107_v3, %v2608_v10 }
0x1469   : > { %v2610_v14 = vadd.f32 %v3107_v3, %v2609_v59 }
0x146b   : > { %v2614_v37 = vsel %vm2613_vm9, %v3107_v3, %v2610_v14 }
0x146c   : > { %v2619_v15 = vsel %vm2616_vm10, %v2618_v31, %v2614_v37 }
0x146d   : > { %v2620_v16 = vmul.f32 %v2619_v15, %v2595_v61 }
0x146f   : > { %v2888_v30 = vclamps-f32 %v2620_v16, 1.0 }
0x1471   : > { %v2625_v40 = vadd.f32 1.0, %v2888_v30 }
0x1473   : > { %v2628_v21 = vmul.f32 %v2625_v40, %v2499_v20 }
0x1475   : > { %v2639_v42 = vpack.c.bf16 %v2628_v21, %v2628_v21 }
0x1477   : > { %2898 = vmatmul.msk.bf16.gmra.mxu0 %vm650_vm0, %v2639_v42 }
0x148b   : > { %v2683_v18 = vpop.xlane.xlu0 %2682 }
0x148c   : > { %v2684_v35 = vmul.f32 %v2683_v18, %v3443_v8  ;;  %v2973_v8 = vld [vmem:[%s4200_s16] ss:$0 sm:$0xff] }
0x148e   : > { %v2685_v26 = vadd.f32 1e-06, %v2684_v35 }
0x1490   : > { %3108 = vrsqrt.f32 %v2685_v26  ;;  %vm2692_vm11 = vweird.f32 %v2685_v26 }
0x1496   : > { %v3109_v44 = vpop.eup %3108 }
0x1497   : > { %v2687_v25 = vmul.f32 %v3109_v44, %v2685_v26  ;;  %vm2693_vm0 = vweird.f32 %v3109_v44 }
0x1498   : > { %vm2694_vm12 = vmor %vm2692_vm11, %vm2693_vm0 }
0x1499   : > { %v2688_v5 = vmul.f32 %v3109_v44, %v2687_v25 }
0x149b   : > { %v2689_v7 = vmul.f32 0.5, %v2688_v5 }
0x149d   : > { %v2690_v32 = vsub.f32 1.5, %v2689_v7 }
0x149f   : > { %v2691_v17 = vmul.f32 %v3109_v44, %v2690_v32 }
0x14a1   : > { %v2695_v58 = vsel %vm2694_vm12, %v3109_v44, %v2691_v17 }
0x14a2   : > { %v2696_v36 = vmul.f32 %v2695_v58, %v4121_v53 }
0x14a4   : > { %v2700_v24 = vmul.f32 %v2972_v33, %v2696_v36 }
0x14a6   : > { %v2704_v13 = vadd.f32 %v2973_v8, %v2700_v24 }
0x14a8   : > { %v2709_v38 = vpack.c.bf16 %v2704_v13, %v2704_v13 }
0x14aa   : > { %2900 = vmatmul.msk.bf16.vlgmr.msra.gmra.mxu2 %vm695_vm1, %v2709_v38 }
0x14f4   : > { %v2663_v51 = vpop.f32.mrf.mxu0 }
0x14fc   : > { %v2664_v4 = vpop.f32.mrf.mxu0 }
0x152d   : > { %v2725_v53 = vpop.f32.mrf.mxu2 }
0x152e   : > { %v2726_v39 = vadd.f32 %v2725_v53, %v2712_v19 }
0x1530   : > { %2730 = vst.msk [vmem:[%s594_s27] sm:$0x1] %vm2729_vm13, %v2726_v39 }
0x1531   : > { %3137 = shalt.err (!%p3134_p3)
}
0x1532   : > { %2904 = dma.vmem_to_hbm [thread:$0]  (%p3325_p5), %s2743_s22, 16, %s2745_s0, %s2732_s4  }
0x1535   : > { %v2727_v45 = vpop.f32.mrf.mxu2 }
0x1536 PF: > { %s4266_s3 = sld [smem:[#allocation7_spill]] }
0x1537   : > { %s4267_s2 = sld [smem:[#allocation5_spill]] }
0x153c   : > { %p2910_p4 = scmp.ge.s32.totalorder %s4266_s3, 2 }
0x153d   : > { %s2756_s27 = sand.u32 1, %s4267_s2  }
0x153e   : > { %p2907_p7 = pnand %p2910_p4, %p3329_p6  ;;  %s2757_s1 = scalar_lea.sflag [#allocation3], %s2756_s27 }
0x1540   : > { %p2908_p8 = pneg %p2907_p7 }
0x1542   : > { %3155 = dma.done.wait (%p2908_p8), %s2757_s1, 16  }
0x1543   : > { %3157 = vsyncadd (%p2908_p8), %s2757_s1, 4294967280  ;;  %s4269_s21 = sld [smem:[#allocation8_spill]]  ;;  %s4272_s0 = smov %s3164_s30 }
0x1544   : > { %s4270_s5 = sld [smem:[#allocation6_spill]] }
0x1545   : > { %s4271_s20 = sld [smem:[#allocation9_spill]] }
0x1549   : > { %p29_p9 = scmp.ge.s32.totalorder %s4269_s21, 4  }
0x154a   : > { %s4273_s30 = smov %s4270_s5 }
0x154b   :  { %31 = sbr.rel (!%p29_p9) target bundleno = 12 (0xc), region = 143 }
0x1550   :  { %2762 = vsyncpa [#allocation3], 1 }
0x1551   :  { %2764 = vsyncpa [#allocation3 + $0x1], 1 }

</bundles_post_ra>
